<compile_context>
chip_gen: v6e
topology: v6e:2x2x1
jax: 0.10.0
libtpu: 0.0.40
codegen_flags: <defaults>
</compile_context>

<pallas_src>
import functools

import numpy as np
import jax
import jax.numpy as jnp
from jax import lax
from jax.experimental import pallas as pl
from jax.experimental.pallas import tpu as pltpu


N_LEVELS = 6  # fixed by the PyTorch Decoder definition


# -----------------------------------------------------------------------------
# In-kernel helpers (all operate on (C, W) values: channels on sublanes,
# length on lanes; one batch element per grid step)
# -----------------------------------------------------------------------------
def _swish(x):
    return x * jax.nn.sigmoid(x)


def _neighbors(x):
    """left[t] = x[t-1], right[t] = x[t+1] with zero boundaries ('same' conv).

    Built with static slice + zero-column concat: no scratch store/reload, no
    boundary masks (the zero column IS the boundary)."""
    c, w = x.shape
    zcol = jnp.zeros((c, 1), jnp.float32)
    left = jnp.concatenate([zcol, x[:, :w - 1]], axis=1)
    right = jnp.concatenate([x[:, 1:], zcol], axis=1)
    return left, right


def _conv3(x, w_ref, b_ref, lvl):
    """'same' 3-tap Conv1d as ONE MXU matmul.

    x: (Cin, W) f32.  w_ref[lvl]: (Cout, 3*Cin) bf16 with taps packed
    [t-1 | t | t+1] along the reduction axis.  b_ref[lvl]: (Cout, 1) f32."""
    left, right = _neighbors(x)
    stacked = jnp.concatenate([left, x, right], axis=0).astype(jnp.bfloat16)
    return jnp.dot(w_ref[lvl], stacked,
                   preferred_element_type=jnp.float32) + b_ref[lvl]


def _conv1(x, w_ref, b_ref, lvl):
    """1x1 Conv1d: plain channel-mixing matmul (bf16 operands, f32 accum)."""
    return jnp.dot(w_ref[lvl], x.astype(jnp.bfloat16),
                   preferred_element_type=jnp.float32) + b_ref[lvl]


def _upsample2(x, up64):
    """Nearest x2 upsample along lanes.

    Uses a fixed (64, 128) 0/1 scatter constant on 64-lane chunks of x:
    O(1) constant, O(W) work -- no length^2 matrix anywhere."""
    c, n = x.shape
    pieces = []
    for s in range(0, n, 64):
        w = min(64, n - s)
        pieces.append(jnp.dot(x[:, s:s + w], up64[:w, :2 * w],
                              preferred_element_type=jnp.float32))
    return pieces[0] if len(pieces) == 1 else jnp.concatenate(pieces, axis=1)


# -----------------------------------------------------------------------------
# The single fused decoder kernel (one batch element per grid step)
# -----------------------------------------------------------------------------
def _decoder_kernel(
    # inputs
    z_ref, eps1_ref, eps2_ref, eps3_ref, eps4_ref, eps5_ref,
    up_w_ref, up_b_ref, d1_w_ref, d1_b_ref, d2_w_ref, d2_b_ref,
    h1_w_ref, h1_b_ref, h2_w_ref, h2_b_ref,
    hm_w_ref, hm_b_ref, hv_w_ref, hv_b_ref,
    r1_w_ref, r1_b_ref, r2_w_ref, r2_b_ref, ro_w_ref, ro_b_ref,
    # outputs
    out0_ref, out1_ref, out2_ref, out3_ref, out4_ref, out5_ref,
    xhat_ref, xsig_ref,
    *, zd, L0):
    eps_refs = (eps1_ref, eps2_ref, eps3_ref, eps4_ref, eps5_ref)
    dec_refs = (out0_ref, out1_ref, out2_ref, out3_ref, out4_ref, out5_ref)

    # Fixed nearest-x2 scatter constant (64 input lanes -> 128 output lanes),
    # built once per kernel invocation: up64[r, 2r] = up64[r, 2r+1] = 1.
    row_i = lax.broadcasted_iota(jnp.int32, (64, 128), 0)
    col_i = lax.broadcasted_iota(jnp.int32, (64, 128), 1)
    up64 = jnp.where((col_i == 2 * row_i) | (col_i == 2 * row_i + 1),
                     jnp.float32(1.0), jnp.float32(0.0))

    zz = z_ref[...]                                   # (zd, L0)
    dec = jnp.zeros((zd, L0), jnp.float32)            # decoder_out starts at 0

    for i in range(N_LEVELS):
        # ---- DecoderBlock: nearest x2 upsample of cat([decoder_out, z]) -> k3 -> swish
        x_cat = jnp.concatenate([dec, zz], axis=0)          # (2zd, n)
        u = _upsample2(x_cat, up64)                         # (2zd, 2n)
        h = _swish(_conv3(u, up_w_ref, up_b_ref, i))        # (2zd, 2n)
        # ---- DecoderResidualBlock: 1x1 (2zd->zd)+swish, k3 (zd->zd)+swish
        a = _swish(_conv1(h, d1_w_ref, d1_b_ref, i))        # (zd, 2n)
        dec = _swish(_conv3(a, d2_w_ref, d2_b_ref, i))      # (zd, 2n)
        # decoder_outputs[i]: full lane-dense slab, already PyTorch (B, C, L)
        dec_refs[i][...] = dec
        if i == N_LEVELS - 1:
            break
        # ---- condition_z_mean / condition_z_var (packed along Cout) + reparam
        t1 = _swish(_conv3(dec, h1_w_ref, h1_b_ref, i))     # (2zd, 2n)
        t2 = _conv3(t1, h2_w_ref, h2_b_ref, i)              # block-diagonal
        r_m = _swish(dec + t2[0:zd])
        r_v = _swish(dec + t2[zd:2 * zd])
        mu = _conv1(r_m, hm_w_ref, hm_b_ref, i)
        log_var = _conv1(r_v, hv_w_ref, hv_b_ref, i)
        # reparameterization kept fully in f32
        zz = mu + jnp.exp(0.5 * log_var) * eps_refs[i][...]

    # ---- recon head: ResidualBlock(zd) -> Conv1d(zd, zd, 1) (no swish between)
    t1 = _swish(_conv3(dec, r1_w_ref, r1_b_ref, 0))
    t2 = _conv3(t1, r2_w_ref, r2_b_ref, 0)
    rr = dec + t2
    x_hat = _conv1(rr, ro_w_ref, ro_b_ref, 0)
    xhat_ref[...] = x_hat
    xsig_ref[...] = jax.nn.sigmoid(x_hat)


# -----------------------------------------------------------------------------
# Wrapper: PyTorch (B, C, L) layout in / out, one pallas_call for everything,
# batch as a ("parallel",) grid axis.
# -----------------------------------------------------------------------------
def decoder_forward(params, z_bdl, key):
    """z_bdl: (B, z_dim, L) PyTorch layout.  Returns
    (x_hat, x_hat_sigmoid, kl_losses, decoder_outputs), all in (B, C, L')."""
    B, zd, L0 = z_bdl.shape
    eps = [jax.random.normal(jax.random.fold_in(key, i),
                             (B, zd, L0 * 2 ** (i + 1)), jnp.float32)
           for i in range(N_LEVELS - 1)]

    weight_order = ("up_w", "up_b", "d1_w", "d1_b", "d2_w", "d2_b",
                    "h1_w", "h1_b", "h2_w", "h2_b",
                    "hm_w", "hm_b", "hv_w", "hv_b",
                    "r1_w", "r1_b", "r2_w", "r2_b", "ro_w", "ro_b")
    inputs = [z_bdl.astype(jnp.float32)] + eps + [params[k] for k in weight_order]

    def batch_spec(shape):
        nd = len(shape)
        return pl.BlockSpec((None,) + tuple(shape[1:]),
                            lambda b, _nd=nd: (b,) + (0,) * (_nd - 1))

    def whole_spec(shape):
        nd = len(shape)
        return pl.BlockSpec(tuple(shape), lambda b, _nd=nd: (0,) * _nd)

    in_specs = ([batch_spec(z_bdl.shape)]
                + [batch_spec(e.shape) for e in eps]
                + [whole_spec(params[k].shape) for k in weight_order])

    out_shape = tuple(
        jax.ShapeDtypeStruct((B, zd, L0 * 2 ** (i + 1)), jnp.float32)
        for i in range(N_LEVELS)
    ) + (jax.ShapeDtypeStruct((B, zd, L0 * 2 ** N_LEVELS), jnp.float32),) * 2
    out_specs = tuple(batch_spec(s.shape) for s in out_shape)

    outs = pl.pallas_call(
        functools.partial(_decoder_kernel, zd=zd, L0=L0),
        grid=(B,),
        out_shape=out_shape,
        in_specs=in_specs,
        out_specs=out_specs,
        compiler_params=pltpu.CompilerParams(
            dimension_semantics=("parallel",)),
    )(*inputs)

    decoder_outputs = list(outs[:N_LEVELS])
    x_hat, x_hat_sigmoid = outs[N_LEVELS], outs[N_LEVELS + 1]
    kl_losses = []  # xs is None in this forward path -> no KL terms
    return x_hat, x_hat_sigmoid, kl_losses, decoder_outputs


# -----------------------------------------------------------------------------
# Deterministic parameter initialization (packed layouts consumed by the kernel)
# -----------------------------------------------------------------------------
def init_params(key, z_dim):
    zd = z_dim
    counter = [0]

    def nk():
        counter[0] += 1
        return jax.random.fold_in(key, counter[0])

    def conv_w(cout, cin, k):
        kw, kb = jax.random.split(nk())
        w = jax.random.normal(kw, (cout, cin, k), jnp.float32) / np.sqrt(k * cin)
        b = jax.random.normal(kb, (cout, 1), jnp.float32) * 0.01
        return w, b

    def pack3(w):   # (cout, cin, 3) -> (cout, 3*cin), taps ordered [t-1 | t | t+1]
        return jnp.concatenate([w[:, :, 0], w[:, :, 1], w[:, :, 2]], axis=1)

    up_w, up_b, d1_w, d1_b, d2_w, d2_b = [], [], [], [], [], []
    for _ in range(N_LEVELS):
        w, b = conv_w(2 * zd, 2 * zd, 3)      # UpsamplingConvBlock conv (k=3)
        up_w.append(pack3(w)); up_b.append(b)
        w, b = conv_w(zd, 2 * zd, 1)          # DecoderResidualBlock conv1 (k=1)
        d1_w.append(w[:, :, 0]); d1_b.append(b)
        w, b = conv_w(zd, zd, 3)              # DecoderResidualBlock conv2 (k=3)
        d2_w.append(pack3(w)); d2_b.append(b)

    # condition_z_mean / condition_z_var: Sequential(ResidualBlock(zd), Swish,
    # Conv1d(zd, zd, 1)).  Both heads read the same decoder_out, so they are
    # packed along the output channel axis (second residual conv becomes
    # block-diagonal per tap).  Keep packed while 2*zd <= 128 (one MXU tile).
    h1_w, h1_b, h2_w, h2_b = [], [], [], []
    hm_w, hm_b, hv_w, hv_b = [], [], [], []
    zeros = jnp.zeros((zd, zd), jnp.float32)
    for _ in range(N_LEVELS - 1):
        mw1, mb1 = conv_w(zd, zd, 3); mw2, mb2 = conv_w(zd, zd, 3); mwo, mbo = conv_w(zd, zd, 1)
        vw1, vb1 = conv_w(zd, zd, 3); vw2, vb2 = conv_w(zd, zd, 3); vwo, vbo = conv_w(zd, zd, 1)
        h1_w.append(jnp.concatenate([pack3(mw1), pack3(vw1)], axis=0))
        h1_b.append(jnp.concatenate([mb1, vb1], axis=0))
        taps = []
        for k in range(3):
            blk = jnp.concatenate(
                [jnp.concatenate([mw2[:, :, k], zeros], axis=1),
                 jnp.concatenate([zeros, vw2[:, :, k]], axis=1)], axis=0)
            taps.append(blk)
        h2_w.append(jnp.concatenate(taps, axis=1))
        h2_b.append(jnp.concatenate([mb2, vb2], axis=0))
        hm_w.append(mwo[:, :, 0]); hm_b.append(mbo)
        hv_w.append(vwo[:, :, 0]); hv_b.append(vbo)

    rw1, rb1 = conv_w(zd, zd, 3)              # recon ResidualBlock conv1
    rw2, rb2 = conv_w(zd, zd, 3)              # recon ResidualBlock conv2
    rwo, rbo = conv_w(zd, zd, 1)              # recon output conv (k=1)

    stack_w = lambda xs: jnp.stack(xs, axis=0).astype(jnp.bfloat16)   # MXU operands
    stack_b = lambda xs: jnp.stack(xs, axis=0).astype(jnp.float32)    # f32 biases
    return dict(
        up_w=stack_w(up_w), up_b=stack_b(up_b),
        d1_w=stack_w(d1_w), d1_b=stack_b(d1_b),
        d2_w=stack_w(d2_w), d2_b=stack_b(d2_b),
        h1_w=stack_w(h1_w), h1_b=stack_b(h1_b),
        h2_w=stack_w(h2_w), h2_b=stack_b(h2_b),
        hm_w=stack_w(hm_w), hm_b=stack_b(hm_b),
        hv_w=stack_w(hv_w), hv_b=stack_b(hv_b),
        r1_w=stack_w([pack3(rw1)]), r1_b=stack_b([rb1]),
        r2_w=stack_w([pack3(rw2)]), r2_b=stack_b([rb2]),
        ro_w=stack_w([rwo[:, :, 0]]), ro_b=stack_b([rbo]),
    )


# -----------------------------------------------------------------------------
if __name__ == "__main__":
    root = jax.random.PRNGKey(0)
    pkey, zkey, nkey = jax.random.split(root, 3)

    B, z_dim, L = 2, 4, 8                      # z: (B, z_dim, L), PyTorch layout
    params = init_params(pkey, z_dim)
    z = jax.random.normal(zkey, (B, z_dim, L), jnp.float32)

    fwd = jax.jit(decoder_forward)
    x_hat, x_hat_sigmoid, kl_losses, decoder_outputs = fwd(params, z, nkey)
    jax.block_until_ready((x_hat, x_hat_sigmoid, decoder_outputs))

    assert x_hat.shape == (B, z_dim, L * 2 ** N_LEVELS)
    assert x_hat_sigmoid.shape == (B, z_dim, L * 2 ** N_LEVELS)
    assert len(decoder_outputs) == N_LEVELS and len(kl_losses) == 0
    assert all(decoder_outputs[i].shape == (B, z_dim, L * 2 ** (i + 1))
               for i in range(N_LEVELS))
    assert bool(jnp.all(jnp.isfinite(x_hat)))
    assert bool(jnp.all(jnp.isfinite(x_hat_sigmoid)))
    print("KERNEL_OK")
</pallas_src>

<mosaic_0001>
module attributes {stable_mosaic.version = 11 : i64} {
  func.func @_decoder_kernel(%arg0: i32, %arg1: memref<1x4x8xf32, #tpu.memory_space<vmem>>, %arg2: memref<1x4x16xf32, #tpu.memory_space<vmem>>, %arg3: memref<1x4x32xf32, #tpu.memory_space<vmem>>, %arg4: memref<1x4x64xf32, #tpu.memory_space<vmem>>, %arg5: memref<1x4x128xf32, #tpu.memory_space<vmem>>, %arg6: memref<1x4x256xf32, #tpu.memory_space<vmem>>, %arg7: memref<6x8x24xbf16, #tpu.memory_space<vmem>>, %arg8: memref<6x8x1xf32, #tpu.memory_space<vmem>>, %arg9: memref<6x4x8xbf16, #tpu.memory_space<vmem>>, %arg10: memref<6x4x1xf32, #tpu.memory_space<vmem>>, %arg11: memref<6x4x12xbf16, #tpu.memory_space<vmem>>, %arg12: memref<6x4x1xf32, #tpu.memory_space<vmem>>, %arg13: memref<5x8x12xbf16, #tpu.memory_space<vmem>>, %arg14: memref<5x8x1xf32, #tpu.memory_space<vmem>>, %arg15: memref<5x8x24xbf16, #tpu.memory_space<vmem>>, %arg16: memref<5x8x1xf32, #tpu.memory_space<vmem>>, %arg17: memref<5x4x4xbf16, #tpu.memory_space<vmem>>, %arg18: memref<5x4x1xf32, #tpu.memory_space<vmem>>, %arg19: memref<5x4x4xbf16, #tpu.memory_space<vmem>>, %arg20: memref<5x4x1xf32, #tpu.memory_space<vmem>>, %arg21: memref<1x4x12xbf16, #tpu.memory_space<vmem>>, %arg22: memref<1x4x1xf32, #tpu.memory_space<vmem>>, %arg23: memref<1x4x12xbf16, #tpu.memory_space<vmem>>, %arg24: memref<1x4x1xf32, #tpu.memory_space<vmem>>, %arg25: memref<1x4x4xbf16, #tpu.memory_space<vmem>>, %arg26: memref<1x4x1xf32, #tpu.memory_space<vmem>>, %arg27: memref<1x4x16xf32, #tpu.memory_space<vmem>>, %arg28: memref<1x4x32xf32, #tpu.memory_space<vmem>>, %arg29: memref<1x4x64xf32, #tpu.memory_space<vmem>>, %arg30: memref<1x4x128xf32, #tpu.memory_space<vmem>>, %arg31: memref<1x4x256xf32, #tpu.memory_space<vmem>>, %arg32: memref<1x4x512xf32, #tpu.memory_space<vmem>>, %arg33: memref<1x4x512xf32, #tpu.memory_space<vmem>>, %arg34: memref<1x4x512xf32, #tpu.memory_space<vmem>>) attributes {dimension_semantics = [#tpu.dimension_semantics<parallel>], iteration_bounds = array<i64: 2>, scalar_prefetch = 0 : i64, scratch_operands = 0 : i64, tpu.core_type = #tpu.core_type<tc>, window_params = [{transform_indices = @transform_0, window_bounds = array<i64: 1, 4, 8>}, {transform_indices = @transform_1, window_bounds = array<i64: 1, 4, 16>}, {transform_indices = @transform_2, window_bounds = array<i64: 1, 4, 32>}, {transform_indices = @transform_3, window_bounds = array<i64: 1, 4, 64>}, {transform_indices = @transform_4, window_bounds = array<i64: 1, 4, 128>}, {transform_indices = @transform_5, window_bounds = array<i64: 1, 4, 256>}, {pipeline_mode = #tpu.pipeline_mode<synchronous>, transform_indices = @transform_6, window_bounds = array<i64: 6, 8, 24>}, {pipeline_mode = #tpu.pipeline_mode<synchronous>, transform_indices = @transform_7, window_bounds = array<i64: 6, 8, 1>}, {pipeline_mode = #tpu.pipeline_mode<synchronous>, transform_indices = @transform_8, window_bounds = array<i64: 6, 4, 8>}, {pipeline_mode = #tpu.pipeline_mode<synchronous>, transform_indices = @transform_9, window_bounds = array<i64: 6, 4, 1>}, {pipeline_mode = #tpu.pipeline_mode<synchronous>, transform_indices = @transform_10, window_bounds = array<i64: 6, 4, 12>}, {pipeline_mode = #tpu.pipeline_mode<synchronous>, transform_indices = @transform_11, window_bounds = array<i64: 6, 4, 1>}, {pipeline_mode = #tpu.pipeline_mode<synchronous>, transform_indices = @transform_12, window_bounds = array<i64: 5, 8, 12>}, {pipeline_mode = #tpu.pipeline_mode<synchronous>, transform_indices = @transform_13, window_bounds = array<i64: 5, 8, 1>}, {pipeline_mode = #tpu.pipeline_mode<synchronous>, transform_indices = @transform_14, window_bounds = array<i64: 5, 8, 24>}, {pipeline_mode = #tpu.pipeline_mode<synchronous>, transform_indices = @transform_15, window_bounds = array<i64: 5, 8, 1>}, {pipeline_mode = #tpu.pipeline_mode<synchronous>, transform_indices = @transform_16, window_bounds = array<i64: 5, 4, 4>}, {pipeline_mode = #tpu.pipeline_mode<synchronous>, transform_indices = @transform_17, window_bounds = array<i64: 5, 4, 1>}, {pipeline_mode = #tpu.pipeline_mode<synchronous>, transform_indices = @transform_18, window_bounds = array<i64: 5, 4, 4>}, {pipeline_mode = #tpu.pipeline_mode<synchronous>, transform_indices = @transform_19, window_bounds = array<i64: 5, 4, 1>}, {pipeline_mode = #tpu.pipeline_mode<synchronous>, transform_indices = @transform_20, window_bounds = array<i64: 1, 4, 12>}, {pipeline_mode = #tpu.pipeline_mode<synchronous>, transform_indices = @transform_21, window_bounds = array<i64: 1, 4, 1>}, {pipeline_mode = #tpu.pipeline_mode<synchronous>, transform_indices = @transform_22, window_bounds = array<i64: 1, 4, 12>}, {pipeline_mode = #tpu.pipeline_mode<synchronous>, transform_indices = @transform_23, window_bounds = array<i64: 1, 4, 1>}, {pipeline_mode = #tpu.pipeline_mode<synchronous>, transform_indices = @transform_24, window_bounds = array<i64: 1, 4, 4>}, {pipeline_mode = #tpu.pipeline_mode<synchronous>, transform_indices = @transform_25, window_bounds = array<i64: 1, 4, 1>}, {transform_indices = @transform_26, window_bounds = array<i64: 1, 4, 16>}, {transform_indices = @transform_27, window_bounds = array<i64: 1, 4, 32>}, {transform_indices = @transform_28, window_bounds = array<i64: 1, 4, 64>}, {transform_indices = @transform_29, window_bounds = array<i64: 1, 4, 128>}, {transform_indices = @transform_30, window_bounds = array<i64: 1, 4, 256>}, {transform_indices = @transform_31, window_bounds = array<i64: 1, 4, 512>}, {transform_indices = @transform_32, window_bounds = array<i64: 1, 4, 512>}, {transform_indices = @transform_33, window_bounds = array<i64: 1, 4, 512>}]} {
    %0 = tpu.iota {dimensions = array<i32: 0>} : vector<64x128xi32>
    %1 = tpu.iota {dimensions = array<i32: 1>} : vector<64x128xi32>
    %c2_i32 = arith.constant 2 : i32
    %2 = vector.broadcast %c2_i32 : i32 to vector<64x128xi32>
    %3 = arith.muli %2, %0 : vector<64x128xi32>
    %4 = arith.cmpi eq, %1, %3 : vector<64x128xi32>
    %c2_i32_0 = arith.constant 2 : i32
    %5 = vector.broadcast %c2_i32_0 : i32 to vector<64x128xi32>
    %6 = arith.muli %5, %0 : vector<64x128xi32>
    %c1_i32 = arith.constant 1 : i32
    %7 = vector.broadcast %c1_i32 : i32 to vector<64x128xi32>
    %8 = arith.addi %6, %7 : vector<64x128xi32>
    %9 = arith.cmpi eq, %1, %8 : vector<64x128xi32>
    %10 = arith.ori %4, %9 : vector<64x128xi1>
    %cst = arith.constant 1.000000e+00 : f32
    %cst_1 = arith.constant 0.000000e+00 : f32
    %11 = vector.broadcast %cst : f32 to vector<64x128xf32>
    %12 = vector.broadcast %cst_1 : f32 to vector<64x128xf32>
    %13 = arith.select %10, %11, %12 : vector<64x128xi1>, vector<64x128xf32>
    %c0 = arith.constant 0 : index
    %c0_2 = arith.constant 0 : index
    %c0_3 = arith.constant 0 : index
    %14 = vector.load %arg1[%c0, %c0_2, %c0_3] : memref<1x4x8xf32, #tpu.memory_space<vmem>>, vector<1x4x8xf32>
    %15 = vector.shape_cast %14 : vector<1x4x8xf32> to vector<4x8xf32>
    %cst_4 = arith.constant 0.000000e+00 : f32
    %16 = vector.broadcast %cst_4 : f32 to vector<4x8xf32>
    %17 = tpu.concatenate %16, %15 in 0 : vector<4x8xf32>, vector<4x8xf32> -> vector<8x8xf32>
    %18 = vector.extract_strided_slice %13 {offsets = [0, 0], sizes = [8, 16], strides = [1, 1]} : vector<64x128xf32> to vector<8x16xf32>
    %cst_5 = arith.constant dense<0.000000e+00> : vector<8x16xf32>
    %19 = tpu.matmul %17, %18, %cst_5 {dimension_numbers = #tpu.dot_dimension_numbers<[1], [0], [0], [1], [0, 0, 1, 1], [], []>} : vector<8x8xf32>, vector<8x16xf32>, vector<8x16xf32> -> vector<8x16xf32>
    %cst_6 = arith.constant 0.000000e+00 : f32
    %20 = vector.broadcast %cst_6 : f32 to vector<8x1xf32>
    %21 = vector.extract_strided_slice %19 {offsets = [0, 0], sizes = [8, 15], strides = [1, 1]} : vector<8x16xf32> to vector<8x15xf32>
    %22 = tpu.concatenate %20, %21 in 1 : vector<8x1xf32>, vector<8x15xf32> -> vector<8x16xf32>
    %23 = vector.extract_strided_slice %19 {offsets = [0, 1], sizes = [8, 15], strides = [1, 1]} : vector<8x16xf32> to vector<8x15xf32>
    %24 = tpu.concatenate %23, %20 in 1 : vector<8x15xf32>, vector<8x1xf32> -> vector<8x16xf32>
    %25 = tpu.concatenate %22, %19, %24 in 0 : vector<8x16xf32>, vector<8x16xf32>, vector<8x16xf32> -> vector<24x16xf32>
    %26 = arith.truncf %25 : vector<24x16xf32> to vector<24x16xbf16>
    %c0_7 = arith.constant 0 : index
    %c0_8 = arith.constant 0 : index
    %c0_9 = arith.constant 0 : index
    %27 = vector.load %arg7[%c0_7, %c0_8, %c0_9] : memref<6x8x24xbf16, #tpu.memory_space<vmem>>, vector<1x8x24xbf16>
    %28 = vector.shape_cast %27 : vector<1x8x24xbf16> to vector<8x24xbf16>
    %cst_10 = arith.constant dense<0.000000e+00> : vector<8x16xf32>
    %29 = tpu.matmul %28, %26, %cst_10 {dimension_numbers = #tpu.dot_dimension_numbers<[1], [0], [0], [1], [0, 0, 1, 1], [], []>} : vector<8x24xbf16>, vector<24x16xbf16>, vector<8x16xf32> -> vector<8x16xf32>
    %c0_11 = arith.constant 0 : index
    %c0_12 = arith.constant 0 : index
    %c0_13 = arith.constant 0 : index
    %30 = vector.load %arg8[%c0_11, %c0_12, %c0_13] : memref<6x8x1xf32, #tpu.memory_space<vmem>>, vector<1x8x1xf32>
    %31 = vector.shape_cast %30 : vector<1x8x1xf32> to vector<8x1xf32>
    %32 = vector.broadcast %31 : vector<8x1xf32> to vector<8x16xf32>
    %33 = arith.addf %29, %32 : vector<8x16xf32>
    %34 = arith.negf %33 : vector<8x16xf32>
    %35 = math.exp %34 : vector<8x16xf32>
    %cst_14 = arith.constant 1.000000e+00 : f32
    %36 = vector.broadcast %cst_14 : f32 to vector<8x16xf32>
    %37 = arith.addf %36, %35 : vector<8x16xf32>
    %38 = arith.divf %36, %37 : vector<8x16xf32>
    %39 = arith.mulf %33, %38 : vector<8x16xf32>
    %c0_15 = arith.constant 0 : index
    %c0_16 = arith.constant 0 : index
    %c0_17 = arith.constant 0 : index
    %40 = vector.load %arg9[%c0_15, %c0_16, %c0_17] : memref<6x4x8xbf16, #tpu.memory_space<vmem>>, vector<1x4x8xbf16>
    %41 = vector.shape_cast %40 : vector<1x4x8xbf16> to vector<4x8xbf16>
    %42 = arith.truncf %39 : vector<8x16xf32> to vector<8x16xbf16>
    %cst_18 = arith.constant dense<0.000000e+00> : vector<4x16xf32>
    %43 = tpu.matmul %41, %42, %cst_18 {dimension_numbers = #tpu.dot_dimension_numbers<[1], [0], [0], [1], [0, 0, 1, 1], [], []>} : vector<4x8xbf16>, vector<8x16xbf16>, vector<4x16xf32> -> vector<4x16xf32>
    %c0_19 = arith.constant 0 : index
    %c0_20 = arith.constant 0 : index
    %c0_21 = arith.constant 0 : index
    %44 = vector.load %arg10[%c0_19, %c0_20, %c0_21] : memref<6x4x1xf32, #tpu.memory_space<vmem>>, vector<1x4x1xf32>
    %45 = vector.shape_cast %44 : vector<1x4x1xf32> to vector<4x1xf32>
    %46 = vector.broadcast %45 : vector<4x1xf32> to vector<4x16xf32>
    %47 = arith.addf %43, %46 : vector<4x16xf32>
    %48 = arith.negf %47 : vector<4x16xf32>
    %49 = math.exp %48 : vector<4x16xf32>
    %cst_22 = arith.constant 1.000000e+00 : f32
    %50 = vector.broadcast %cst_22 : f32 to vector<4x16xf32>
    %51 = arith.addf %50, %49 : vector<4x16xf32>
    %52 = arith.divf %50, %51 : vector<4x16xf32>
    %53 = arith.mulf %47, %52 : vector<4x16xf32>
    %cst_23 = arith.constant 0.000000e+00 : f32
    %54 = vector.broadcast %cst_23 : f32 to vector<4x1xf32>
    %55 = vector.extract_strided_slice %53 {offsets = [0, 0], sizes = [4, 15], strides = [1, 1]} : vector<4x16xf32> to vector<4x15xf32>
    %56 = tpu.concatenate %54, %55 in 1 : vector<4x1xf32>, vector<4x15xf32> -> vector<4x16xf32>
    %57 = vector.extract_strided_slice %53 {offsets = [0, 1], sizes = [4, 15], strides = [1, 1]} : vector<4x16xf32> to vector<4x15xf32>
    %58 = tpu.concatenate %57, %54 in 1 : vector<4x15xf32>, vector<4x1xf32> -> vector<4x16xf32>
    %59 = tpu.concatenate %56, %53, %58 in 0 : vector<4x16xf32>, vector<4x16xf32>, vector<4x16xf32> -> vector<12x16xf32>
    %60 = arith.truncf %59 : vector<12x16xf32> to vector<12x16xbf16>
    %c0_24 = arith.constant 0 : index
    %c0_25 = arith.constant 0 : index
    %c0_26 = arith.constant 0 : index
    %61 = vector.load %arg11[%c0_24, %c0_25, %c0_26] : memref<6x4x12xbf16, #tpu.memory_space<vmem>>, vector<1x4x12xbf16>
    %62 = vector.shape_cast %61 : vector<1x4x12xbf16> to vector<4x12xbf16>
    %cst_27 = arith.constant dense<0.000000e+00> : vector<4x16xf32>
    %63 = tpu.matmul %62, %60, %cst_27 {dimension_numbers = #tpu.dot_dimension_numbers<[1], [0], [0], [1], [0, 0, 1, 1], [], []>} : vector<4x12xbf16>, vector<12x16xbf16>, vector<4x16xf32> -> vector<4x16xf32>
    %c0_28 = arith.constant 0 : index
    %c0_29 = arith.constant 0 : index
    %c0_30 = arith.constant 0 : index
    %64 = vector.load %arg12[%c0_28, %c0_29, %c0_30] : memref<6x4x1xf32, #tpu.memory_space<vmem>>, vector<1x4x1xf32>
    %65 = vector.shape_cast %64 : vector<1x4x1xf32> to vector<4x1xf32>
    %66 = vector.broadcast %65 : vector<4x1xf32> to vector<4x16xf32>
    %67 = arith.addf %63, %66 : vector<4x16xf32>
    %68 = arith.negf %67 : vector<4x16xf32>
    %69 = math.exp %68 : vector<4x16xf32>
    %cst_31 = arith.constant 1.000000e+00 : f32
    %70 = vector.broadcast %cst_31 : f32 to vector<4x16xf32>
    %71 = arith.addf %70, %69 : vector<4x16xf32>
    %72 = arith.divf %70, %71 : vector<4x16xf32>
    %73 = arith.mulf %67, %72 : vector<4x16xf32>
    %c0_32 = arith.constant 0 : index
    %c0_33 = arith.constant 0 : index
    %c0_34 = arith.constant 0 : index
    %74 = vector.load %arg27[%c0_32, %c0_33, %c0_34] : memref<1x4x16xf32, #tpu.memory_space<vmem>>, vector<1x4x16xf32>
    %75 = vector.shape_cast %74 : vector<1x4x16xf32> to vector<4x16xf32>
    %76 = vector.shape_cast %73 : vector<4x16xf32> to vector<1x4x16xf32>
    tpu.vector_store %arg27[%c0_32, %c0_33, %c0_34], %76 {strides = array<i32>} : memref<1x4x16xf32, #tpu.memory_space<vmem>>, vector<1x4x16xf32>,
    %cst_35 = arith.constant 0.000000e+00 : f32
    %77 = vector.broadcast %cst_35 : f32 to vector<4x1xf32>
    %78 = vector.extract_strided_slice %73 {offsets = [0, 0], sizes = [4, 15], strides = [1, 1]} : vector<4x16xf32> to vector<4x15xf32>
    %79 = tpu.concatenate %77, %78 in 1 : vector<4x1xf32>, vector<4x15xf32> -> vector<4x16xf32>
    %80 = vector.extract_strided_slice %73 {offsets = [0, 1], sizes = [4, 15], strides = [1, 1]} : vector<4x16xf32> to vector<4x15xf32>
    %81 = tpu.concatenate %80, %77 in 1 : vector<4x15xf32>, vector<4x1xf32> -> vector<4x16xf32>
    %82 = tpu.concatenate %79, %73, %81 in 0 : vector<4x16xf32>, vector<4x16xf32>, vector<4x16xf32> -> vector<12x16xf32>
    %83 = arith.truncf %82 : vector<12x16xf32> to vector<12x16xbf16>
    %c0_36 = arith.constant 0 : index
    %c0_37 = arith.constant 0 : index
    %c0_38 = arith.constant 0 : index
    %84 = vector.load %arg13[%c0_36, %c0_37, %c0_38] : memref<5x8x12xbf16, #tpu.memory_space<vmem>>, vector<1x8x12xbf16>
    %85 = vector.shape_cast %84 : vector<1x8x12xbf16> to vector<8x12xbf16>
    %cst_39 = arith.constant dense<0.000000e+00> : vector<8x16xf32>
    %86 = tpu.matmul %85, %83, %cst_39 {dimension_numbers = #tpu.dot_dimension_numbers<[1], [0], [0], [1], [0, 0, 1, 1], [], []>} : vector<8x12xbf16>, vector<12x16xbf16>, vector<8x16xf32> -> vector<8x16xf32>
    %c0_40 = arith.constant 0 : index
    %c0_41 = arith.constant 0 : index
    %c0_42 = arith.constant 0 : index
    %87 = vector.load %arg14[%c0_40, %c0_41, %c0_42] : memref<5x8x1xf32, #tpu.memory_space<vmem>>, vector<1x8x1xf32>
    %88 = vector.shape_cast %87 : vector<1x8x1xf32> to vector<8x1xf32>
    %89 = vector.broadcast %88 : vector<8x1xf32> to vector<8x16xf32>
    %90 = arith.addf %86, %89 : vector<8x16xf32>
    %91 = arith.negf %90 : vector<8x16xf32>
    %92 = math.exp %91 : vector<8x16xf32>
    %cst_43 = arith.constant 1.000000e+00 : f32
    %93 = vector.broadcast %cst_43 : f32 to vector<8x16xf32>
    %94 = arith.addf %93, %92 : vector<8x16xf32>
    %95 = arith.divf %93, %94 : vector<8x16xf32>
    %96 = arith.mulf %90, %95 : vector<8x16xf32>
    %cst_44 = arith.constant 0.000000e+00 : f32
    %97 = vector.broadcast %cst_44 : f32 to vector<8x1xf32>
    %98 = vector.extract_strided_slice %96 {offsets = [0, 0], sizes = [8, 15], strides = [1, 1]} : vector<8x16xf32> to vector<8x15xf32>
    %99 = tpu.concatenate %97, %98 in 1 : vector<8x1xf32>, vector<8x15xf32> -> vector<8x16xf32>
    %100 = vector.extract_strided_slice %96 {offsets = [0, 1], sizes = [8, 15], strides = [1, 1]} : vector<8x16xf32> to vector<8x15xf32>
    %101 = tpu.concatenate %100, %97 in 1 : vector<8x15xf32>, vector<8x1xf32> -> vector<8x16xf32>
    %102 = tpu.concatenate %99, %96, %101 in 0 : vector<8x16xf32>, vector<8x16xf32>, vector<8x16xf32> -> vector<24x16xf32>
    %103 = arith.truncf %102 : vector<24x16xf32> to vector<24x16xbf16>
    %c0_45 = arith.constant 0 : index
    %c0_46 = arith.constant 0 : index
    %c0_47 = arith.constant 0 : index
    %104 = vector.load %arg15[%c0_45, %c0_46, %c0_47] : memref<5x8x24xbf16, #tpu.memory_space<vmem>>, vector<1x8x24xbf16>
    %105 = vector.shape_cast %104 : vector<1x8x24xbf16> to vector<8x24xbf16>
    %cst_48 = arith.constant dense<0.000000e+00> : vector<8x16xf32>
    %106 = tpu.matmul %105, %103, %cst_48 {dimension_numbers = #tpu.dot_dimension_numbers<[1], [0], [0], [1], [0, 0, 1, 1], [], []>} : vector<8x24xbf16>, vector<24x16xbf16>, vector<8x16xf32> -> vector<8x16xf32>
    %c0_49 = arith.constant 0 : index
    %c0_50 = arith.constant 0 : index
    %c0_51 = arith.constant 0 : index
    %107 = vector.load %arg16[%c0_49, %c0_50, %c0_51] : memref<5x8x1xf32, #tpu.memory_space<vmem>>, vector<1x8x1xf32>
    %108 = vector.shape_cast %107 : vector<1x8x1xf32> to vector<8x1xf32>
    %109 = vector.broadcast %108 : vector<8x1xf32> to vector<8x16xf32>
    %110 = arith.addf %106, %109 : vector<8x16xf32>
    %111 = vector.extract_strided_slice %110 {offsets = [0, 0], sizes = [4, 16], strides = [1, 1]} : vector<8x16xf32> to vector<4x16xf32>
    %112 = arith.addf %73, %111 : vector<4x16xf32>
    %113 = arith.negf %112 : vector<4x16xf32>
    %114 = math.exp %113 : vector<4x16xf32>
    %cst_52 = arith.constant 1.000000e+00 : f32
    %115 = vector.broadcast %cst_52 : f32 to vector<4x16xf32>
    %116 = arith.addf %115, %114 : vector<4x16xf32>
    %117 = arith.divf %115, %116 : vector<4x16xf32>
    %118 = arith.mulf %112, %117 : vector<4x16xf32>
    %119 = vector.extract_strided_slice %110 {offsets = [4, 0], sizes = [4, 16], strides = [1, 1]} : vector<8x16xf32> to vector<4x16xf32>
    %120 = arith.addf %73, %119 : vector<4x16xf32>
    %121 = arith.negf %120 : vector<4x16xf32>
    %122 = math.exp %121 : vector<4x16xf32>
    %cst_53 = arith.constant 1.000000e+00 : f32
    %123 = vector.broadcast %cst_53 : f32 to vector<4x16xf32>
    %124 = arith.addf %123, %122 : vector<4x16xf32>
    %125 = arith.divf %123, %124 : vector<4x16xf32>
    %126 = arith.mulf %120, %125 : vector<4x16xf32>
    %c0_54 = arith.constant 0 : index
    %c0_55 = arith.constant 0 : index
    %c0_56 = arith.constant 0 : index
    %127 = vector.load %arg17[%c0_54, %c0_55, %c0_56] : memref<5x4x4xbf16, #tpu.memory_space<vmem>>, vector<1x4x4xbf16>
    %128 = vector.shape_cast %127 : vector<1x4x4xbf16> to vector<4x4xbf16>
    %129 = arith.truncf %118 : vector<4x16xf32> to vector<4x16xbf16>
    %cst_57 = arith.constant dense<0.000000e+00> : vector<4x16xf32>
    %130 = tpu.matmul %128, %129, %cst_57 {dimension_numbers = #tpu.dot_dimension_numbers<[1], [0], [0], [1], [0, 0, 1, 1], [], []>} : vector<4x4xbf16>, vector<4x16xbf16>, vector<4x16xf32> -> vector<4x16xf32>
    %c0_58 = arith.constant 0 : index
    %c0_59 = arith.constant 0 : index
    %c0_60 = arith.constant 0 : index
    %131 = vector.load %arg18[%c0_58, %c0_59, %c0_60] : memref<5x4x1xf32, #tpu.memory_space<vmem>>, vector<1x4x1xf32>
    %132 = vector.shape_cast %131 : vector<1x4x1xf32> to vector<4x1xf32>
    %133 = vector.broadcast %132 : vector<4x1xf32> to vector<4x16xf32>
    %134 = arith.addf %130, %133 : vector<4x16xf32>
    %c0_61 = arith.constant 0 : index
    %c0_62 = arith.constant 0 : index
    %c0_63 = arith.constant 0 : index
    %135 = vector.load %arg19[%c0_61, %c0_62, %c0_63] : memref<5x4x4xbf16, #tpu.memory_space<vmem>>, vector<1x4x4xbf16>
    %136 = vector.shape_cast %135 : vector<1x4x4xbf16> to vector<4x4xbf16>
    %137 = arith.truncf %126 : vector<4x16xf32> to vector<4x16xbf16>
    %cst_64 = arith.constant dense<0.000000e+00> : vector<4x16xf32>
    %138 = tpu.matmul %136, %137, %cst_64 {dimension_numbers = #tpu.dot_dimension_numbers<[1], [0], [0], [1], [0, 0, 1, 1], [], []>} : vector<4x4xbf16>, vector<4x16xbf16>, vector<4x16xf32> -> vector<4x16xf32>
    %c0_65 = arith.constant 0 : index
    %c0_66 = arith.constant 0 : index
    %c0_67 = arith.constant 0 : index
    %139 = vector.load %arg20[%c0_65, %c0_66, %c0_67] : memref<5x4x1xf32, #tpu.memory_space<vmem>>, vector<1x4x1xf32>
    %140 = vector.shape_cast %139 : vector<1x4x1xf32> to vector<4x1xf32>
    %141 = vector.broadcast %140 : vector<4x1xf32> to vector<4x16xf32>
    %142 = arith.addf %138, %141 : vector<4x16xf32>
    %cst_68 = arith.constant 5.000000e-01 : f32
    %143 = vector.broadcast %cst_68 : f32 to vector<4x16xf32>
    %144 = arith.mulf %143, %142 : vector<4x16xf32>
    %145 = math.exp %144 : vector<4x16xf32>
    %c0_69 = arith.constant 0 : index
    %c0_70 = arith.constant 0 : index
    %c0_71 = arith.constant 0 : index
    %146 = vector.load %arg2[%c0_69, %c0_70, %c0_71] : memref<1x4x16xf32, #tpu.memory_space<vmem>>, vector<1x4x16xf32>
    %147 = vector.shape_cast %146 : vector<1x4x16xf32> to vector<4x16xf32>
    %148 = arith.mulf %145, %147 : vector<4x16xf32>
    %149 = arith.addf %134, %148 : vector<4x16xf32>
    %150 = tpu.concatenate %73, %149 in 0 : vector<4x16xf32>, vector<4x16xf32> -> vector<8x16xf32>
    %151 = vector.extract_strided_slice %13 {offsets = [0, 0], sizes = [16, 32], strides = [1, 1]} : vector<64x128xf32> to vector<16x32xf32>
    %cst_72 = arith.constant dense<0.000000e+00> : vector<8x32xf32>
    %152 = tpu.matmul %150, %151, %cst_72 {dimension_numbers = #tpu.dot_dimension_numbers<[1], [0], [0], [1], [0, 0, 1, 1], [], []>} : vector<8x16xf32>, vector<16x32xf32>, vector<8x32xf32> -> vector<8x32xf32>
    %cst_73 = arith.constant 0.000000e+00 : f32
    %153 = vector.broadcast %cst_73 : f32 to vector<8x1xf32>
    %154 = vector.extract_strided_slice %152 {offsets = [0, 0], sizes = [8, 31], strides = [1, 1]} : vector<8x32xf32> to vector<8x31xf32>
    %155 = tpu.concatenate %153, %154 in 1 : vector<8x1xf32>, vector<8x31xf32> -> vector<8x32xf32>
    %156 = vector.extract_strided_slice %152 {offsets = [0, 1], sizes = [8, 31], strides = [1, 1]} : vector<8x32xf32> to vector<8x31xf32>
    %157 = tpu.concatenate %156, %153 in 1 : vector<8x31xf32>, vector<8x1xf32> -> vector<8x32xf32>
    %158 = tpu.concatenate %155, %152, %157 in 0 : vector<8x32xf32>, vector<8x32xf32>, vector<8x32xf32> -> vector<24x32xf32>
    %159 = arith.truncf %158 : vector<24x32xf32> to vector<24x32xbf16>
    %c1 = arith.constant 1 : index
    %c0_74 = arith.constant 0 : index
    %c0_75 = arith.constant 0 : index
    %160 = vector.load %arg7[%c1, %c0_74, %c0_75] : memref<6x8x24xbf16, #tpu.memory_space<vmem>>, vector<1x8x24xbf16>
    %161 = vector.shape_cast %160 : vector<1x8x24xbf16> to vector<8x24xbf16>
    %cst_76 = arith.constant dense<0.000000e+00> : vector<8x32xf32>
    %162 = tpu.matmul %161, %159, %cst_76 {dimension_numbers = #tpu.dot_dimension_numbers<[1], [0], [0], [1], [0, 0, 1, 1], [], []>} : vector<8x24xbf16>, vector<24x32xbf16>, vector<8x32xf32> -> vector<8x32xf32>
    %c1_77 = arith.constant 1 : index
    %c0_78 = arith.constant 0 : index
    %c0_79 = arith.constant 0 : index
    %163 = vector.load %arg8[%c1_77, %c0_78, %c0_79] : memref<6x8x1xf32, #tpu.memory_space<vmem>>, vector<1x8x1xf32>
    %164 = vector.shape_cast %163 : vector<1x8x1xf32> to vector<8x1xf32>
    %165 = vector.broadcast %164 : vector<8x1xf32> to vector<8x32xf32>
    %166 = arith.addf %162, %165 : vector<8x32xf32>
    %167 = arith.negf %166 : vector<8x32xf32>
    %168 = math.exp %167 : vector<8x32xf32>
    %cst_80 = arith.constant 1.000000e+00 : f32
    %169 = vector.broadcast %cst_80 : f32 to vector<8x32xf32>
    %170 = arith.addf %169, %168 : vector<8x32xf32>
    %171 = arith.divf %169, %170 : vector<8x32xf32>
    %172 = arith.mulf %166, %171 : vector<8x32xf32>
    %c1_81 = arith.constant 1 : index
    %c0_82 = arith.constant 0 : index
    %c0_83 = arith.constant 0 : index
    %173 = vector.load %arg9[%c1_81, %c0_82, %c0_83] : memref<6x4x8xbf16, #tpu.memory_space<vmem>>, vector<1x4x8xbf16>
    %174 = vector.shape_cast %173 : vector<1x4x8xbf16> to vector<4x8xbf16>
    %175 = arith.truncf %172 : vector<8x32xf32> to vector<8x32xbf16>
    %cst_84 = arith.constant dense<0.000000e+00> : vector<4x32xf32>
    %176 = tpu.matmul %174, %175, %cst_84 {dimension_numbers = #tpu.dot_dimension_numbers<[1], [0], [0], [1], [0, 0, 1, 1], [], []>} : vector<4x8xbf16>, vector<8x32xbf16>, vector<4x32xf32> -> vector<4x32xf32>
    %c1_85 = arith.constant 1 : index
    %c0_86 = arith.constant 0 : index
    %c0_87 = arith.constant 0 : index
    %177 = vector.load %arg10[%c1_85, %c0_86, %c0_87] : memref<6x4x1xf32, #tpu.memory_space<vmem>>, vector<1x4x1xf32>
    %178 = vector.shape_cast %177 : vector<1x4x1xf32> to vector<4x1xf32>
    %179 = vector.broadcast %178 : vector<4x1xf32> to vector<4x32xf32>
    %180 = arith.addf %176, %179 : vector<4x32xf32>
    %181 = arith.negf %180 : vector<4x32xf32>
    %182 = math.exp %181 : vector<4x32xf32>
    %cst_88 = arith.constant 1.000000e+00 : f32
    %183 = vector.broadcast %cst_88 : f32 to vector<4x32xf32>
    %184 = arith.addf %183, %182 : vector<4x32xf32>
    %185 = arith.divf %183, %184 : vector<4x32xf32>
    %186 = arith.mulf %180, %185 : vector<4x32xf32>
    %cst_89 = arith.constant 0.000000e+00 : f32
    %187 = vector.broadcast %cst_89 : f32 to vector<4x1xf32>
    %188 = vector.extract_strided_slice %186 {offsets = [0, 0], sizes = [4, 31], strides = [1, 1]} : vector<4x32xf32> to vector<4x31xf32>
    %189 = tpu.concatenate %187, %188 in 1 : vector<4x1xf32>, vector<4x31xf32> -> vector<4x32xf32>
    %190 = vector.extract_strided_slice %186 {offsets = [0, 1], sizes = [4, 31], strides = [1, 1]} : vector<4x32xf32> to vector<4x31xf32>
    %191 = tpu.concatenate %190, %187 in 1 : vector<4x31xf32>, vector<4x1xf32> -> vector<4x32xf32>
    %192 = tpu.concatenate %189, %186, %191 in 0 : vector<4x32xf32>, vector<4x32xf32>, vector<4x32xf32> -> vector<12x32xf32>
    %193 = arith.truncf %192 : vector<12x32xf32> to vector<12x32xbf16>
    %c1_90 = arith.constant 1 : index
    %c0_91 = arith.constant 0 : index
    %c0_92 = arith.constant 0 : index
    %194 = vector.load %arg11[%c1_90, %c0_91, %c0_92] : memref<6x4x12xbf16, #tpu.memory_space<vmem>>, vector<1x4x12xbf16>
    %195 = vector.shape_cast %194 : vector<1x4x12xbf16> to vector<4x12xbf16>
    %cst_93 = arith.constant dense<0.000000e+00> : vector<4x32xf32>
    %196 = tpu.matmul %195, %193, %cst_93 {dimension_numbers = #tpu.dot_dimension_numbers<[1], [0], [0], [1], [0, 0, 1, 1], [], []>} : vector<4x12xbf16>, vector<12x32xbf16>, vector<4x32xf32> -> vector<4x32xf32>
    %c1_94 = arith.constant 1 : index
    %c0_95 = arith.constant 0 : index
    %c0_96 = arith.constant 0 : index
    %197 = vector.load %arg12[%c1_94, %c0_95, %c0_96] : memref<6x4x1xf32, #tpu.memory_space<vmem>>, vector<1x4x1xf32>
    %198 = vector.shape_cast %197 : vector<1x4x1xf32> to vector<4x1xf32>
    %199 = vector.broadcast %198 : vector<4x1xf32> to vector<4x32xf32>
    %200 = arith.addf %196, %199 : vector<4x32xf32>
    %201 = arith.negf %200 : vector<4x32xf32>
    %202 = math.exp %201 : vector<4x32xf32>
    %cst_97 = arith.constant 1.000000e+00 : f32
    %203 = vector.broadcast %cst_97 : f32 to vector<4x32xf32>
    %204 = arith.addf %203, %202 : vector<4x32xf32>
    %205 = arith.divf %203, %204 : vector<4x32xf32>
    %206 = arith.mulf %200, %205 : vector<4x32xf32>
    %c0_98 = arith.constant 0 : index
    %c0_99 = arith.constant 0 : index
    %c0_100 = arith.constant 0 : index
    %207 = vector.load %arg28[%c0_98, %c0_99, %c0_100] : memref<1x4x32xf32, #tpu.memory_space<vmem>>, vector<1x4x32xf32>
    %208 = vector.shape_cast %207 : vector<1x4x32xf32> to vector<4x32xf32>
    %209 = vector.shape_cast %206 : vector<4x32xf32> to vector<1x4x32xf32>
    tpu.vector_store %arg28[%c0_98, %c0_99, %c0_100], %209 {strides = array<i32>} : memref<1x4x32xf32, #tpu.memory_space<vmem>>, vector<1x4x32xf32>,
    %cst_101 = arith.constant 0.000000e+00 : f32
    %210 = vector.broadcast %cst_101 : f32 to vector<4x1xf32>
    %211 = vector.extract_strided_slice %206 {offsets = [0, 0], sizes = [4, 31], strides = [1, 1]} : vector<4x32xf32> to vector<4x31xf32>
    %212 = tpu.concatenate %210, %211 in 1 : vector<4x1xf32>, vector<4x31xf32> -> vector<4x32xf32>
    %213 = vector.extract_strided_slice %206 {offsets = [0, 1], sizes = [4, 31], strides = [1, 1]} : vector<4x32xf32> to vector<4x31xf32>
    %214 = tpu.concatenate %213, %210 in 1 : vector<4x31xf32>, vector<4x1xf32> -> vector<4x32xf32>
    %215 = tpu.concatenate %212, %206, %214 in 0 : vector<4x32xf32>, vector<4x32xf32>, vector<4x32xf32> -> vector<12x32xf32>
    %216 = arith.truncf %215 : vector<12x32xf32> to vector<12x32xbf16>
    %c1_102 = arith.constant 1 : index
    %c0_103 = arith.constant 0 : index
    %c0_104 = arith.constant 0 : index
    %217 = vector.load %arg13[%c1_102, %c0_103, %c0_104] : memref<5x8x12xbf16, #tpu.memory_space<vmem>>, vector<1x8x12xbf16>
    %218 = vector.shape_cast %217 : vector<1x8x12xbf16> to vector<8x12xbf16>
    %cst_105 = arith.constant dense<0.000000e+00> : vector<8x32xf32>
    %219 = tpu.matmul %218, %216, %cst_105 {dimension_numbers = #tpu.dot_dimension_numbers<[1], [0], [0], [1], [0, 0, 1, 1], [], []>} : vector<8x12xbf16>, vector<12x32xbf16>, vector<8x32xf32> -> vector<8x32xf32>
    %c1_106 = arith.constant 1 : index
    %c0_107 = arith.constant 0 : index
    %c0_108 = arith.constant 0 : index
    %220 = vector.load %arg14[%c1_106, %c0_107, %c0_108] : memref<5x8x1xf32, #tpu.memory_space<vmem>>, vector<1x8x1xf32>
    %221 = vector.shape_cast %220 : vector<1x8x1xf32> to vector<8x1xf32>
    %222 = vector.broadcast %221 : vector<8x1xf32> to vector<8x32xf32>
    %223 = arith.addf %219, %222 : vector<8x32xf32>
    %224 = arith.negf %223 : vector<8x32xf32>
    %225 = math.exp %224 : vector<8x32xf32>
    %cst_109 = arith.constant 1.000000e+00 : f32
    %226 = vector.broadcast %cst_109 : f32 to vector<8x32xf32>
    %227 = arith.addf %226, %225 : vector<8x32xf32>
    %228 = arith.divf %226, %227 : vector<8x32xf32>
    %229 = arith.mulf %223, %228 : vector<8x32xf32>
    %cst_110 = arith.constant 0.000000e+00 : f32
    %230 = vector.broadcast %cst_110 : f32 to vector<8x1xf32>
    %231 = vector.extract_strided_slice %229 {offsets = [0, 0], sizes = [8, 31], strides = [1, 1]} : vector<8x32xf32> to vector<8x31xf32>
    %232 = tpu.concatenate %230, %231 in 1 : vector<8x1xf32>, vector<8x31xf32> -> vector<8x32xf32>
    %233 = vector.extract_strided_slice %229 {offsets = [0, 1], sizes = [8, 31], strides = [1, 1]} : vector<8x32xf32> to vector<8x31xf32>
    %234 = tpu.concatenate %233, %230 in 1 : vector<8x31xf32>, vector<8x1xf32> -> vector<8x32xf32>
    %235 = tpu.concatenate %232, %229, %234 in 0 : vector<8x32xf32>, vector<8x32xf32>, vector<8x32xf32> -> vector<24x32xf32>
    %236 = arith.truncf %235 : vector<24x32xf32> to vector<24x32xbf16>
    %c1_111 = arith.constant 1 : index
    %c0_112 = arith.constant 0 : index
    %c0_113 = arith.constant 0 : index
    %237 = vector.load %arg15[%c1_111, %c0_112, %c0_113] : memref<5x8x24xbf16, #tpu.memory_space<vmem>>, vector<1x8x24xbf16>
    %238 = vector.shape_cast %237 : vector<1x8x24xbf16> to vector<8x24xbf16>
    %cst_114 = arith.constant dense<0.000000e+00> : vector<8x32xf32>
    %239 = tpu.matmul %238, %236, %cst_114 {dimension_numbers = #tpu.dot_dimension_numbers<[1], [0], [0], [1], [0, 0, 1, 1], [], []>} : vector<8x24xbf16>, vector<24x32xbf16>, vector<8x32xf32> -> vector<8x32xf32>
    %c1_115 = arith.constant 1 : index
    %c0_116 = arith.constant 0 : index
    %c0_117 = arith.constant 0 : index
    %240 = vector.load %arg16[%c1_115, %c0_116, %c0_117] : memref<5x8x1xf32, #tpu.memory_space<vmem>>, vector<1x8x1xf32>
    %241 = vector.shape_cast %240 : vector<1x8x1xf32> to vector<8x1xf32>
    %242 = vector.broadcast %241 : vector<8x1xf32> to vector<8x32xf32>
    %243 = arith.addf %239, %242 : vector<8x32xf32>
    %244 = vector.extract_strided_slice %243 {offsets = [0, 0], sizes = [4, 32], strides = [1, 1]} : vector<8x32xf32> to vector<4x32xf32>
    %245 = arith.addf %206, %244 : vector<4x32xf32>
    %246 = arith.negf %245 : vector<4x32xf32>
    %247 = math.exp %246 : vector<4x32xf32>
    %cst_118 = arith.constant 1.000000e+00 : f32
    %248 = vector.broadcast %cst_118 : f32 to vector<4x32xf32>
    %249 = arith.addf %248, %247 : vector<4x32xf32>
    %250 = arith.divf %248, %249 : vector<4x32xf32>
    %251 = arith.mulf %245, %250 : vector<4x32xf32>
    %252 = vector.extract_strided_slice %243 {offsets = [4, 0], sizes = [4, 32], strides = [1, 1]} : vector<8x32xf32> to vector<4x32xf32>
    %253 = arith.addf %206, %252 : vector<4x32xf32>
    %254 = arith.negf %253 : vector<4x32xf32>
    %255 = math.exp %254 : vector<4x32xf32>
    %cst_119 = arith.constant 1.000000e+00 : f32
    %256 = vector.broadcast %cst_119 : f32 to vector<4x32xf32>
    %257 = arith.addf %256, %255 : vector<4x32xf32>
    %258 = arith.divf %256, %257 : vector<4x32xf32>
    %259 = arith.mulf %253, %258 : vector<4x32xf32>
    %c1_120 = arith.constant 1 : index
    %c0_121 = arith.constant 0 : index
    %c0_122 = arith.constant 0 : index
    %260 = vector.load %arg17[%c1_120, %c0_121, %c0_122] : memref<5x4x4xbf16, #tpu.memory_space<vmem>>, vector<1x4x4xbf16>
    %261 = vector.shape_cast %260 : vector<1x4x4xbf16> to vector<4x4xbf16>
    %262 = arith.truncf %251 : vector<4x32xf32> to vector<4x32xbf16>
    %cst_123 = arith.constant dense<0.000000e+00> : vector<4x32xf32>
    %263 = tpu.matmul %261, %262, %cst_123 {dimension_numbers = #tpu.dot_dimension_numbers<[1], [0], [0], [1], [0, 0, 1, 1], [], []>} : vector<4x4xbf16>, vector<4x32xbf16>, vector<4x32xf32> -> vector<4x32xf32>
    %c1_124 = arith.constant 1 : index
    %c0_125 = arith.constant 0 : index
    %c0_126 = arith.constant 0 : index
    %264 = vector.load %arg18[%c1_124, %c0_125, %c0_126] : memref<5x4x1xf32, #tpu.memory_space<vmem>>, vector<1x4x1xf32>
    %265 = vector.shape_cast %264 : vector<1x4x1xf32> to vector<4x1xf32>
    %266 = vector.broadcast %265 : vector<4x1xf32> to vector<4x32xf32>
    %267 = arith.addf %263, %266 : vector<4x32xf32>
    %c1_127 = arith.constant 1 : index
    %c0_128 = arith.constant 0 : index
    %c0_129 = arith.constant 0 : index
    %268 = vector.load %arg19[%c1_127, %c0_128, %c0_129] : memref<5x4x4xbf16, #tpu.memory_space<vmem>>, vector<1x4x4xbf16>
    %269 = vector.shape_cast %268 : vector<1x4x4xbf16> to vector<4x4xbf16>
    %270 = arith.truncf %259 : vector<4x32xf32> to vector<4x32xbf16>
    %cst_130 = arith.constant dense<0.000000e+00> : vector<4x32xf32>
    %271 = tpu.matmul %269, %270, %cst_130 {dimension_numbers = #tpu.dot_dimension_numbers<[1], [0], [0], [1], [0, 0, 1, 1], [], []>} : vector<4x4xbf16>, vector<4x32xbf16>, vector<4x32xf32> -> vector<4x32xf32>
    %c1_131 = arith.constant 1 : index
    %c0_132 = arith.constant 0 : index
    %c0_133 = arith.constant 0 : index
    %272 = vector.load %arg20[%c1_131, %c0_132, %c0_133] : memref<5x4x1xf32, #tpu.memory_space<vmem>>, vector<1x4x1xf32>
    %273 = vector.shape_cast %272 : vector<1x4x1xf32> to vector<4x1xf32>
    %274 = vector.broadcast %273 : vector<4x1xf32> to vector<4x32xf32>
    %275 = arith.addf %271, %274 : vector<4x32xf32>
    %cst_134 = arith.constant 5.000000e-01 : f32
    %276 = vector.broadcast %cst_134 : f32 to vector<4x32xf32>
    %277 = arith.mulf %276, %275 : vector<4x32xf32>
    %278 = math.exp %277 : vector<4x32xf32>
    %c0_135 = arith.constant 0 : index
    %c0_136 = arith.constant 0 : index
    %c0_137 = arith.constant 0 : index
    %279 = vector.load %arg3[%c0_135, %c0_136, %c0_137] : memref<1x4x32xf32, #tpu.memory_space<vmem>>, vector<1x4x32xf32>
    %280 = vector.shape_cast %279 : vector<1x4x32xf32> to vector<4x32xf32>
    %281 = arith.mulf %278, %280 : vector<4x32xf32>
    %282 = arith.addf %267, %281 : vector<4x32xf32>
    %283 = tpu.concatenate %206, %282 in 0 : vector<4x32xf32>, vector<4x32xf32> -> vector<8x32xf32>
    %284 = vector.extract_strided_slice %13 {offsets = [0, 0], sizes = [32, 64], strides = [1, 1]} : vector<64x128xf32> to vector<32x64xf32>
    %cst_138 = arith.constant dense<0.000000e+00> : vector<8x64xf32>
    %285 = tpu.matmul %283, %284, %cst_138 {dimension_numbers = #tpu.dot_dimension_numbers<[1], [0], [0], [1], [0, 0, 1, 1], [], []>} : vector<8x32xf32>, vector<32x64xf32>, vector<8x64xf32> -> vector<8x64xf32>
    %cst_139 = arith.constant 0.000000e+00 : f32
    %286 = vector.broadcast %cst_139 : f32 to vector<8x1xf32>
    %287 = vector.extract_strided_slice %285 {offsets = [0, 0], sizes = [8, 63], strides = [1, 1]} : vector<8x64xf32> to vector<8x63xf32>
    %288 = tpu.concatenate %286, %287 in 1 : vector<8x1xf32>, vector<8x63xf32> -> vector<8x64xf32>
    %289 = vector.extract_strided_slice %285 {offsets = [0, 1], sizes = [8, 63], strides = [1, 1]} : vector<8x64xf32> to vector<8x63xf32>
    %290 = tpu.concatenate %289, %286 in 1 : vector<8x63xf32>, vector<8x1xf32> -> vector<8x64xf32>
    %291 = tpu.concatenate %288, %285, %290 in 0 : vector<8x64xf32>, vector<8x64xf32>, vector<8x64xf32> -> vector<24x64xf32>
    %292 = arith.truncf %291 : vector<24x64xf32> to vector<24x64xbf16>
    %c2 = arith.constant 2 : index
    %c0_140 = arith.constant 0 : index
    %c0_141 = arith.constant 0 : index
    %293 = vector.load %arg7[%c2, %c0_140, %c0_141] : memref<6x8x24xbf16, #tpu.memory_space<vmem>>, vector<1x8x24xbf16>
    %294 = vector.shape_cast %293 : vector<1x8x24xbf16> to vector<8x24xbf16>
    %cst_142 = arith.constant dense<0.000000e+00> : vector<8x64xf32>
    %295 = tpu.matmul %294, %292, %cst_142 {dimension_numbers = #tpu.dot_dimension_numbers<[1], [0], [0], [1], [0, 0, 1, 1], [], []>} : vector<8x24xbf16>, vector<24x64xbf16>, vector<8x64xf32> -> vector<8x64xf32>
    %c2_143 = arith.constant 2 : index
    %c0_144 = arith.constant 0 : index
    %c0_145 = arith.constant 0 : index
    %296 = vector.load %arg8[%c2_143, %c0_144, %c0_145] : memref<6x8x1xf32, #tpu.memory_space<vmem>>, vector<1x8x1xf32>
    %297 = vector.shape_cast %296 : vector<1x8x1xf32> to vector<8x1xf32>
    %298 = vector.broadcast %297 : vector<8x1xf32> to vector<8x64xf32>
    %299 = arith.addf %295, %298 : vector<8x64xf32>
    %300 = arith.negf %299 : vector<8x64xf32>
    %301 = math.exp %300 : vector<8x64xf32>
    %cst_146 = arith.constant 1.000000e+00 : f32
    %302 = vector.broadcast %cst_146 : f32 to vector<8x64xf32>
    %303 = arith.addf %302, %301 : vector<8x64xf32>
    %304 = arith.divf %302, %303 : vector<8x64xf32>
    %305 = arith.mulf %299, %304 : vector<8x64xf32>
    %c2_147 = arith.constant 2 : index
    %c0_148 = arith.constant 0 : index
    %c0_149 = arith.constant 0 : index
    %306 = vector.load %arg9[%c2_147, %c0_148, %c0_149] : memref<6x4x8xbf16, #tpu.memory_space<vmem>>, vector<1x4x8xbf16>
    %307 = vector.shape_cast %306 : vector<1x4x8xbf16> to vector<4x8xbf16>
    %308 = arith.truncf %305 : vector<8x64xf32> to vector<8x64xbf16>
    %cst_150 = arith.constant dense<0.000000e+00> : vector<4x64xf32>
    %309 = tpu.matmul %307, %308, %cst_150 {dimension_numbers = #tpu.dot_dimension_numbers<[1], [0], [0], [1], [0, 0, 1, 1], [], []>} : vector<4x8xbf16>, vector<8x64xbf16>, vector<4x64xf32> -> vector<4x64xf32>
    %c2_151 = arith.constant 2 : index
    %c0_152 = arith.constant 0 : index
    %c0_153 = arith.constant 0 : index
    %310 = vector.load %arg10[%c2_151, %c0_152, %c0_153] : memref<6x4x1xf32, #tpu.memory_space<vmem>>, vector<1x4x1xf32>
    %311 = vector.shape_cast %310 : vector<1x4x1xf32> to vector<4x1xf32>
    %312 = vector.broadcast %311 : vector<4x1xf32> to vector<4x64xf32>
    %313 = arith.addf %309, %312 : vector<4x64xf32>
    %314 = arith.negf %313 : vector<4x64xf32>
    %315 = math.exp %314 : vector<4x64xf32>
    %cst_154 = arith.constant 1.000000e+00 : f32
    %316 = vector.broadcast %cst_154 : f32 to vector<4x64xf32>
    %317 = arith.addf %316, %315 : vector<4x64xf32>
    %318 = arith.divf %316, %317 : vector<4x64xf32>
    %319 = arith.mulf %313, %318 : vector<4x64xf32>
    %cst_155 = arith.constant 0.000000e+00 : f32
    %320 = vector.broadcast %cst_155 : f32 to vector<4x1xf32>
    %321 = vector.extract_strided_slice %319 {offsets = [0, 0], sizes = [4, 63], strides = [1, 1]} : vector<4x64xf32> to vector<4x63xf32>
    %322 = tpu.concatenate %320, %321 in 1 : vector<4x1xf32>, vector<4x63xf32> -> vector<4x64xf32>
    %323 = vector.extract_strided_slice %319 {offsets = [0, 1], sizes = [4, 63], strides = [1, 1]} : vector<4x64xf32> to vector<4x63xf32>
    %324 = tpu.concatenate %323, %320 in 1 : vector<4x63xf32>, vector<4x1xf32> -> vector<4x64xf32>
    %325 = tpu.concatenate %322, %319, %324 in 0 : vector<4x64xf32>, vector<4x64xf32>, vector<4x64xf32> -> vector<12x64xf32>
    %326 = arith.truncf %325 : vector<12x64xf32> to vector<12x64xbf16>
    %c2_156 = arith.constant 2 : index
    %c0_157 = arith.constant 0 : index
    %c0_158 = arith.constant 0 : index
    %327 = vector.load %arg11[%c2_156, %c0_157, %c0_158] : memref<6x4x12xbf16, #tpu.memory_space<vmem>>, vector<1x4x12xbf16>
    %328 = vector.shape_cast %327 : vector<1x4x12xbf16> to vector<4x12xbf16>
    %cst_159 = arith.constant dense<0.000000e+00> : vector<4x64xf32>
    %329 = tpu.matmul %328, %326, %cst_159 {dimension_numbers = #tpu.dot_dimension_numbers<[1], [0], [0], [1], [0, 0, 1, 1], [], []>} : vector<4x12xbf16>, vector<12x64xbf16>, vector<4x64xf32> -> vector<4x64xf32>
    %c2_160 = arith.constant 2 : index
    %c0_161 = arith.constant 0 : index
    %c0_162 = arith.constant 0 : index
    %330 = vector.load %arg12[%c2_160, %c0_161, %c0_162] : memref<6x4x1xf32, #tpu.memory_space<vmem>>, vector<1x4x1xf32>
    %331 = vector.shape_cast %330 : vector<1x4x1xf32> to vector<4x1xf32>
    %332 = vector.broadcast %331 : vector<4x1xf32> to vector<4x64xf32>
    %333 = arith.addf %329, %332 : vector<4x64xf32>
    %334 = arith.negf %333 : vector<4x64xf32>
    %335 = math.exp %334 : vector<4x64xf32>
    %cst_163 = arith.constant 1.000000e+00 : f32
    %336 = vector.broadcast %cst_163 : f32 to vector<4x64xf32>
    %337 = arith.addf %336, %335 : vector<4x64xf32>
    %338 = arith.divf %336, %337 : vector<4x64xf32>
    %339 = arith.mulf %333, %338 : vector<4x64xf32>
    %c0_164 = arith.constant 0 : index
    %c0_165 = arith.constant 0 : index
    %c0_166 = arith.constant 0 : index
    %340 = vector.load %arg29[%c0_164, %c0_165, %c0_166] : memref<1x4x64xf32, #tpu.memory_space<vmem>>, vector<1x4x64xf32>
    %341 = vector.shape_cast %340 : vector<1x4x64xf32> to vector<4x64xf32>
    %342 = vector.shape_cast %339 : vector<4x64xf32> to vector<1x4x64xf32>
    tpu.vector_store %arg29[%c0_164, %c0_165, %c0_166], %342 {strides = array<i32>} : memref<1x4x64xf32, #tpu.memory_space<vmem>>, vector<1x4x64xf32>,
    %cst_167 = arith.constant 0.000000e+00 : f32
    %343 = vector.broadcast %cst_167 : f32 to vector<4x1xf32>
    %344 = vector.extract_strided_slice %339 {offsets = [0, 0], sizes = [4, 63], strides = [1, 1]} : vector<4x64xf32> to vector<4x63xf32>
    %345 = tpu.concatenate %343, %344 in 1 : vector<4x1xf32>, vector<4x63xf32> -> vector<4x64xf32>
    %346 = vector.extract_strided_slice %339 {offsets = [0, 1], sizes = [4, 63], strides = [1, 1]} : vector<4x64xf32> to vector<4x63xf32>
    %347 = tpu.concatenate %346, %343 in 1 : vector<4x63xf32>, vector<4x1xf32> -> vector<4x64xf32>
    %348 = tpu.concatenate %345, %339, %347 in 0 : vector<4x64xf32>, vector<4x64xf32>, vector<4x64xf32> -> vector<12x64xf32>
    %349 = arith.truncf %348 : vector<12x64xf32> to vector<12x64xbf16>
    %c2_168 = arith.constant 2 : index
    %c0_169 = arith.constant 0 : index
    %c0_170 = arith.constant 0 : index
    %350 = vector.load %arg13[%c2_168, %c0_169, %c0_170] : memref<5x8x12xbf16, #tpu.memory_space<vmem>>, vector<1x8x12xbf16>
    %351 = vector.shape_cast %350 : vector<1x8x12xbf16> to vector<8x12xbf16>
    %cst_171 = arith.constant dense<0.000000e+00> : vector<8x64xf32>
    %352 = tpu.matmul %351, %349, %cst_171 {dimension_numbers = #tpu.dot_dimension_numbers<[1], [0], [0], [1], [0, 0, 1, 1], [], []>} : vector<8x12xbf16>, vector<12x64xbf16>, vector<8x64xf32> -> vector<8x64xf32>
    %c2_172 = arith.constant 2 : index
    %c0_173 = arith.constant 0 : index
    %c0_174 = arith.constant 0 : index
    %353 = vector.load %arg14[%c2_172, %c0_173, %c0_174] : memref<5x8x1xf32, #tpu.memory_space<vmem>>, vector<1x8x1xf32>
    %354 = vector.shape_cast %353 : vector<1x8x1xf32> to vector<8x1xf32>
    %355 = vector.broadcast %354 : vector<8x1xf32> to vector<8x64xf32>
    %356 = arith.addf %352, %355 : vector<8x64xf32>
    %357 = arith.negf %356 : vector<8x64xf32>
    %358 = math.exp %357 : vector<8x64xf32>
    %cst_175 = arith.constant 1.000000e+00 : f32
    %359 = vector.broadcast %cst_175 : f32 to vector<8x64xf32>
    %360 = arith.addf %359, %358 : vector<8x64xf32>
    %361 = arith.divf %359, %360 : vector<8x64xf32>
    %362 = arith.mulf %356, %361 : vector<8x64xf32>
    %cst_176 = arith.constant 0.000000e+00 : f32
    %363 = vector.broadcast %cst_176 : f32 to vector<8x1xf32>
    %364 = vector.extract_strided_slice %362 {offsets = [0, 0], sizes = [8, 63], strides = [1, 1]} : vector<8x64xf32> to vector<8x63xf32>
    %365 = tpu.concatenate %363, %364 in 1 : vector<8x1xf32>, vector<8x63xf32> -> vector<8x64xf32>
    %366 = vector.extract_strided_slice %362 {offsets = [0, 1], sizes = [8, 63], strides = [1, 1]} : vector<8x64xf32> to vector<8x63xf32>
    %367 = tpu.concatenate %366, %363 in 1 : vector<8x63xf32>, vector<8x1xf32> -> vector<8x64xf32>
    %368 = tpu.concatenate %365, %362, %367 in 0 : vector<8x64xf32>, vector<8x64xf32>, vector<8x64xf32> -> vector<24x64xf32>
    %369 = arith.truncf %368 : vector<24x64xf32> to vector<24x64xbf16>
    %c2_177 = arith.constant 2 : index
    %c0_178 = arith.constant 0 : index
    %c0_179 = arith.constant 0 : index
    %370 = vector.load %arg15[%c2_177, %c0_178, %c0_179] : memref<5x8x24xbf16, #tpu.memory_space<vmem>>, vector<1x8x24xbf16>
    %371 = vector.shape_cast %370 : vector<1x8x24xbf16> to vector<8x24xbf16>
    %cst_180 = arith.constant dense<0.000000e+00> : vector<8x64xf32>
    %372 = tpu.matmul %371, %369, %cst_180 {dimension_numbers = #tpu.dot_dimension_numbers<[1], [0], [0], [1], [0, 0, 1, 1], [], []>} : vector<8x24xbf16>, vector<24x64xbf16>, vector<8x64xf32> -> vector<8x64xf32>
    %c2_181 = arith.constant 2 : index
    %c0_182 = arith.constant 0 : index
    %c0_183 = arith.constant 0 : index
    %373 = vector.load %arg16[%c2_181, %c0_182, %c0_183] : memref<5x8x1xf32, #tpu.memory_space<vmem>>, vector<1x8x1xf32>
    %374 = vector.shape_cast %373 : vector<1x8x1xf32> to vector<8x1xf32>
    %375 = vector.broadcast %374 : vector<8x1xf32> to vector<8x64xf32>
    %376 = arith.addf %372, %375 : vector<8x64xf32>
    %377 = vector.extract_strided_slice %376 {offsets = [0, 0], sizes = [4, 64], strides = [1, 1]} : vector<8x64xf32> to vector<4x64xf32>
    %378 = arith.addf %339, %377 : vector<4x64xf32>
    %379 = arith.negf %378 : vector<4x64xf32>
    %380 = math.exp %379 : vector<4x64xf32>
    %cst_184 = arith.constant 1.000000e+00 : f32
    %381 = vector.broadcast %cst_184 : f32 to vector<4x64xf32>
    %382 = arith.addf %381, %380 : vector<4x64xf32>
    %383 = arith.divf %381, %382 : vector<4x64xf32>
    %384 = arith.mulf %378, %383 : vector<4x64xf32>
    %385 = vector.extract_strided_slice %376 {offsets = [4, 0], sizes = [4, 64], strides = [1, 1]} : vector<8x64xf32> to vector<4x64xf32>
    %386 = arith.addf %339, %385 : vector<4x64xf32>
    %387 = arith.negf %386 : vector<4x64xf32>
    %388 = math.exp %387 : vector<4x64xf32>
    %cst_185 = arith.constant 1.000000e+00 : f32
    %389 = vector.broadcast %cst_185 : f32 to vector<4x64xf32>
    %390 = arith.addf %389, %388 : vector<4x64xf32>
    %391 = arith.divf %389, %390 : vector<4x64xf32>
    %392 = arith.mulf %386, %391 : vector<4x64xf32>
    %c2_186 = arith.constant 2 : index
    %c0_187 = arith.constant 0 : index
    %c0_188 = arith.constant 0 : index
    %393 = vector.load %arg17[%c2_186, %c0_187, %c0_188] : memref<5x4x4xbf16, #tpu.memory_space<vmem>>, vector<1x4x4xbf16>
    %394 = vector.shape_cast %393 : vector<1x4x4xbf16> to vector<4x4xbf16>
    %395 = arith.truncf %384 : vector<4x64xf32> to vector<4x64xbf16>
    %cst_189 = arith.constant dense<0.000000e+00> : vector<4x64xf32>
    %396 = tpu.matmul %394, %395, %cst_189 {dimension_numbers = #tpu.dot_dimension_numbers<[1], [0], [0], [1], [0, 0, 1, 1], [], []>} : vector<4x4xbf16>, vector<4x64xbf16>, vector<4x64xf32> -> vector<4x64xf32>
    %c2_190 = arith.constant 2 : index
    %c0_191 = arith.constant 0 : index
    %c0_192 = arith.constant 0 : index
    %397 = vector.load %arg18[%c2_190, %c0_191, %c0_192] : memref<5x4x1xf32, #tpu.memory_space<vmem>>, vector<1x4x1xf32>
    %398 = vector.shape_cast %397 : vector<1x4x1xf32> to vector<4x1xf32>
    %399 = vector.broadcast %398 : vector<4x1xf32> to vector<4x64xf32>
    %400 = arith.addf %396, %399 : vector<4x64xf32>
    %c2_193 = arith.constant 2 : index
    %c0_194 = arith.constant 0 : index
    %c0_195 = arith.constant 0 : index
    %401 = vector.load %arg19[%c2_193, %c0_194, %c0_195] : memref<5x4x4xbf16, #tpu.memory_space<vmem>>, vector<1x4x4xbf16>
    %402 = vector.shape_cast %401 : vector<1x4x4xbf16> to vector<4x4xbf16>
    %403 = arith.truncf %392 : vector<4x64xf32> to vector<4x64xbf16>
    %cst_196 = arith.constant dense<0.000000e+00> : vector<4x64xf32>
    %404 = tpu.matmul %402, %403, %cst_196 {dimension_numbers = #tpu.dot_dimension_numbers<[1], [0], [0], [1], [0, 0, 1, 1], [], []>} : vector<4x4xbf16>, vector<4x64xbf16>, vector<4x64xf32> -> vector<4x64xf32>
    %c2_197 = arith.constant 2 : index
    %c0_198 = arith.constant 0 : index
    %c0_199 = arith.constant 0 : index
    %405 = vector.load %arg20[%c2_197, %c0_198, %c0_199] : memref<5x4x1xf32, #tpu.memory_space<vmem>>, vector<1x4x1xf32>
    %406 = vector.shape_cast %405 : vector<1x4x1xf32> to vector<4x1xf32>
    %407 = vector.broadcast %406 : vector<4x1xf32> to vector<4x64xf32>
    %408 = arith.addf %404, %407 : vector<4x64xf32>
    %cst_200 = arith.constant 5.000000e-01 : f32
    %409 = vector.broadcast %cst_200 : f32 to vector<4x64xf32>
    %410 = arith.mulf %409, %408 : vector<4x64xf32>
    %411 = math.exp %410 : vector<4x64xf32>
    %c0_201 = arith.constant 0 : index
    %c0_202 = arith.constant 0 : index
    %c0_203 = arith.constant 0 : index
    %412 = vector.load %arg4[%c0_201, %c0_202, %c0_203] : memref<1x4x64xf32, #tpu.memory_space<vmem>>, vector<1x4x64xf32>
    %413 = vector.shape_cast %412 : vector<1x4x64xf32> to vector<4x64xf32>
    %414 = arith.mulf %411, %413 : vector<4x64xf32>
    %415 = arith.addf %400, %414 : vector<4x64xf32>
    %416 = tpu.concatenate %339, %415 in 0 : vector<4x64xf32>, vector<4x64xf32> -> vector<8x64xf32>
    %cst_204 = arith.constant dense<0.000000e+00> : vector<8x128xf32>
    %417 = tpu.matmul %416, %13, %cst_204 {dimension_numbers = #tpu.dot_dimension_numbers<[1], [0], [0], [1], [0, 0, 1, 1], [], []>} : vector<8x64xf32>, vector<64x128xf32>, vector<8x128xf32> -> vector<8x128xf32>
    %cst_205 = arith.constant 0.000000e+00 : f32
    %418 = vector.broadcast %cst_205 : f32 to vector<8x1xf32>
    %419 = vector.extract_strided_slice %417 {offsets = [0, 0], sizes = [8, 127], strides = [1, 1]} : vector<8x128xf32> to vector<8x127xf32>
    %420 = tpu.concatenate %418, %419 in 1 : vector<8x1xf32>, vector<8x127xf32> -> vector<8x128xf32>
    %421 = vector.extract_strided_slice %417 {offsets = [0, 1], sizes = [8, 127], strides = [1, 1]} : vector<8x128xf32> to vector<8x127xf32>
    %422 = tpu.concatenate %421, %418 in 1 : vector<8x127xf32>, vector<8x1xf32> -> vector<8x128xf32>
    %423 = tpu.concatenate %420, %417, %422 in 0 : vector<8x128xf32>, vector<8x128xf32>, vector<8x128xf32> -> vector<24x128xf32>
    %424 = arith.truncf %423 : vector<24x128xf32> to vector<24x128xbf16>
    %c3 = arith.constant 3 : index
    %c0_206 = arith.constant 0 : index
    %c0_207 = arith.constant 0 : index
    %425 = vector.load %arg7[%c3, %c0_206, %c0_207] : memref<6x8x24xbf16, #tpu.memory_space<vmem>>, vector<1x8x24xbf16>
    %426 = vector.shape_cast %425 : vector<1x8x24xbf16> to vector<8x24xbf16>
    %cst_208 = arith.constant dense<0.000000e+00> : vector<8x128xf32>
    %427 = tpu.matmul %426, %424, %cst_208 {dimension_numbers = #tpu.dot_dimension_numbers<[1], [0], [0], [1], [0, 0, 1, 1], [], []>} : vector<8x24xbf16>, vector<24x128xbf16>, vector<8x128xf32> -> vector<8x128xf32>
    %c3_209 = arith.constant 3 : index
    %c0_210 = arith.constant 0 : index
    %c0_211 = arith.constant 0 : index
    %428 = vector.load %arg8[%c3_209, %c0_210, %c0_211] : memref<6x8x1xf32, #tpu.memory_space<vmem>>, vector<1x8x1xf32>
    %429 = vector.shape_cast %428 : vector<1x8x1xf32> to vector<8x1xf32>
    %430 = vector.broadcast %429 : vector<8x1xf32> to vector<8x128xf32>
    %431 = arith.addf %427, %430 : vector<8x128xf32>
    %432 = arith.negf %431 : vector<8x128xf32>
    %433 = math.exp %432 : vector<8x128xf32>
    %cst_212 = arith.constant 1.000000e+00 : f32
    %434 = vector.broadcast %cst_212 : f32 to vector<8x128xf32>
    %435 = arith.addf %434, %433 : vector<8x128xf32>
    %436 = arith.divf %434, %435 : vector<8x128xf32>
    %437 = arith.mulf %431, %436 : vector<8x128xf32>
    %c3_213 = arith.constant 3 : index
    %c0_214 = arith.constant 0 : index
    %c0_215 = arith.constant 0 : index
    %438 = vector.load %arg9[%c3_213, %c0_214, %c0_215] : memref<6x4x8xbf16, #tpu.memory_space<vmem>>, vector<1x4x8xbf16>
    %439 = vector.shape_cast %438 : vector<1x4x8xbf16> to vector<4x8xbf16>
    %440 = arith.truncf %437 : vector<8x128xf32> to vector<8x128xbf16>
    %cst_216 = arith.constant dense<0.000000e+00> : vector<4x128xf32>
    %441 = tpu.matmul %439, %440, %cst_216 {dimension_numbers = #tpu.dot_dimension_numbers<[1], [0], [0], [1], [0, 0, 1, 1], [], []>} : vector<4x8xbf16>, vector<8x128xbf16>, vector<4x128xf32> -> vector<4x128xf32>
    %c3_217 = arith.constant 3 : index
    %c0_218 = arith.constant 0 : index
    %c0_219 = arith.constant 0 : index
    %442 = vector.load %arg10[%c3_217, %c0_218, %c0_219] : memref<6x4x1xf32, #tpu.memory_space<vmem>>, vector<1x4x1xf32>
    %443 = vector.shape_cast %442 : vector<1x4x1xf32> to vector<4x1xf32>
    %444 = vector.broadcast %443 : vector<4x1xf32> to vector<4x128xf32>
    %445 = arith.addf %441, %444 : vector<4x128xf32>
    %446 = arith.negf %445 : vector<4x128xf32>
    %447 = math.exp %446 : vector<4x128xf32>
    %cst_220 = arith.constant 1.000000e+00 : f32
    %448 = vector.broadcast %cst_220 : f32 to vector<4x128xf32>
    %449 = arith.addf %448, %447 : vector<4x128xf32>
    %450 = arith.divf %448, %449 : vector<4x128xf32>
    %451 = arith.mulf %445, %450 : vector<4x128xf32>
    %cst_221 = arith.constant 0.000000e+00 : f32
    %452 = vector.broadcast %cst_221 : f32 to vector<4x1xf32>
    %453 = vector.extract_strided_slice %451 {offsets = [0, 0], sizes = [4, 127], strides = [1, 1]} : vector<4x128xf32> to vector<4x127xf32>
    %454 = tpu.concatenate %452, %453 in 1 : vector<4x1xf32>, vector<4x127xf32> -> vector<4x128xf32>
    %455 = vector.extract_strided_slice %451 {offsets = [0, 1], sizes = [4, 127], strides = [1, 1]} : vector<4x128xf32> to vector<4x127xf32>
    %456 = tpu.concatenate %455, %452 in 1 : vector<4x127xf32>, vector<4x1xf32> -> vector<4x128xf32>
    %457 = tpu.concatenate %454, %451, %456 in 0 : vector<4x128xf32>, vector<4x128xf32>, vector<4x128xf32> -> vector<12x128xf32>
    %458 = arith.truncf %457 : vector<12x128xf32> to vector<12x128xbf16>
    %c3_222 = arith.constant 3 : index
    %c0_223 = arith.constant 0 : index
    %c0_224 = arith.constant 0 : index
    %459 = vector.load %arg11[%c3_222, %c0_223, %c0_224] : memref<6x4x12xbf16, #tpu.memory_space<vmem>>, vector<1x4x12xbf16>
    %460 = vector.shape_cast %459 : vector<1x4x12xbf16> to vector<4x12xbf16>
    %cst_225 = arith.constant dense<0.000000e+00> : vector<4x128xf32>
    %461 = tpu.matmul %460, %458, %cst_225 {dimension_numbers = #tpu.dot_dimension_numbers<[1], [0], [0], [1], [0, 0, 1, 1], [], []>} : vector<4x12xbf16>, vector<12x128xbf16>, vector<4x128xf32> -> vector<4x128xf32>
    %c3_226 = arith.constant 3 : index
    %c0_227 = arith.constant 0 : index
    %c0_228 = arith.constant 0 : index
    %462 = vector.load %arg12[%c3_226, %c0_227, %c0_228] : memref<6x4x1xf32, #tpu.memory_space<vmem>>, vector<1x4x1xf32>
    %463 = vector.shape_cast %462 : vector<1x4x1xf32> to vector<4x1xf32>
    %464 = vector.broadcast %463 : vector<4x1xf32> to vector<4x128xf32>
    %465 = arith.addf %461, %464 : vector<4x128xf32>
    %466 = arith.negf %465 : vector<4x128xf32>
    %467 = math.exp %466 : vector<4x128xf32>
    %cst_229 = arith.constant 1.000000e+00 : f32
    %468 = vector.broadcast %cst_229 : f32 to vector<4x128xf32>
    %469 = arith.addf %468, %467 : vector<4x128xf32>
    %470 = arith.divf %468, %469 : vector<4x128xf32>
    %471 = arith.mulf %465, %470 : vector<4x128xf32>
    %c0_230 = arith.constant 0 : index
    %c0_231 = arith.constant 0 : index
    %c0_232 = arith.constant 0 : index
    %472 = vector.load %arg30[%c0_230, %c0_231, %c0_232] : memref<1x4x128xf32, #tpu.memory_space<vmem>>, vector<1x4x128xf32>
    %473 = vector.shape_cast %472 : vector<1x4x128xf32> to vector<4x128xf32>
    %474 = vector.shape_cast %471 : vector<4x128xf32> to vector<1x4x128xf32>
    tpu.vector_store %arg30[%c0_230, %c0_231, %c0_232], %474 {strides = array<i32>} : memref<1x4x128xf32, #tpu.memory_space<vmem>>, vector<1x4x128xf32>,
    %cst_233 = arith.constant 0.000000e+00 : f32
    %475 = vector.broadcast %cst_233 : f32 to vector<4x1xf32>
    %476 = vector.extract_strided_slice %471 {offsets = [0, 0], sizes = [4, 127], strides = [1, 1]} : vector<4x128xf32> to vector<4x127xf32>
    %477 = tpu.concatenate %475, %476 in 1 : vector<4x1xf32>, vector<4x127xf32> -> vector<4x128xf32>
    %478 = vector.extract_strided_slice %471 {offsets = [0, 1], sizes = [4, 127], strides = [1, 1]} : vector<4x128xf32> to vector<4x127xf32>
    %479 = tpu.concatenate %478, %475 in 1 : vector<4x127xf32>, vector<4x1xf32> -> vector<4x128xf32>
    %480 = tpu.concatenate %477, %471, %479 in 0 : vector<4x128xf32>, vector<4x128xf32>, vector<4x128xf32> -> vector<12x128xf32>
    %481 = arith.truncf %480 : vector<12x128xf32> to vector<12x128xbf16>
    %c3_234 = arith.constant 3 : index
    %c0_235 = arith.constant 0 : index
    %c0_236 = arith.constant 0 : index
    %482 = vector.load %arg13[%c3_234, %c0_235, %c0_236] : memref<5x8x12xbf16, #tpu.memory_space<vmem>>, vector<1x8x12xbf16>
    %483 = vector.shape_cast %482 : vector<1x8x12xbf16> to vector<8x12xbf16>
    %cst_237 = arith.constant dense<0.000000e+00> : vector<8x128xf32>
    %484 = tpu.matmul %483, %481, %cst_237 {dimension_numbers = #tpu.dot_dimension_numbers<[1], [0], [0], [1], [0, 0, 1, 1], [], []>} : vector<8x12xbf16>, vector<12x128xbf16>, vector<8x128xf32> -> vector<8x128xf32>
    %c3_238 = arith.constant 3 : index
    %c0_239 = arith.constant 0 : index
    %c0_240 = arith.constant 0 : index
    %485 = vector.load %arg14[%c3_238, %c0_239, %c0_240] : memref<5x8x1xf32, #tpu.memory_space<vmem>>, vector<1x8x1xf32>
    %486 = vector.shape_cast %485 : vector<1x8x1xf32> to vector<8x1xf32>
    %487 = vector.broadcast %486 : vector<8x1xf32> to vector<8x128xf32>
    %488 = arith.addf %484, %487 : vector<8x128xf32>
    %489 = arith.negf %488 : vector<8x128xf32>
    %490 = math.exp %489 : vector<8x128xf32>
    %cst_241 = arith.constant 1.000000e+00 : f32
    %491 = vector.broadcast %cst_241 : f32 to vector<8x128xf32>
    %492 = arith.addf %491, %490 : vector<8x128xf32>
    %493 = arith.divf %491, %492 : vector<8x128xf32>
    %494 = arith.mulf %488, %493 : vector<8x128xf32>
    %cst_242 = arith.constant 0.000000e+00 : f32
    %495 = vector.broadcast %cst_242 : f32 to vector<8x1xf32>
    %496 = vector.extract_strided_slice %494 {offsets = [0, 0], sizes = [8, 127], strides = [1, 1]} : vector<8x128xf32> to vector<8x127xf32>
    %497 = tpu.concatenate %495, %496 in 1 : vector<8x1xf32>, vector<8x127xf32> -> vector<8x128xf32>
    %498 = vector.extract_strided_slice %494 {offsets = [0, 1], sizes = [8, 127], strides = [1, 1]} : vector<8x128xf32> to vector<8x127xf32>
    %499 = tpu.concatenate %498, %495 in 1 : vector<8x127xf32>, vector<8x1xf32> -> vector<8x128xf32>
    %500 = tpu.concatenate %497, %494, %499 in 0 : vector<8x128xf32>, vector<8x128xf32>, vector<8x128xf32> -> vector<24x128xf32>
    %501 = arith.truncf %500 : vector<24x128xf32> to vector<24x128xbf16>
    %c3_243 = arith.constant 3 : index
    %c0_244 = arith.constant 0 : index
    %c0_245 = arith.constant 0 : index
    %502 = vector.load %arg15[%c3_243, %c0_244, %c0_245] : memref<5x8x24xbf16, #tpu.memory_space<vmem>>, vector<1x8x24xbf16>
    %503 = vector.shape_cast %502 : vector<1x8x24xbf16> to vector<8x24xbf16>
    %cst_246 = arith.constant dense<0.000000e+00> : vector<8x128xf32>
    %504 = tpu.matmul %503, %501, %cst_246 {dimension_numbers = #tpu.dot_dimension_numbers<[1], [0], [0], [1], [0, 0, 1, 1], [], []>} : vector<8x24xbf16>, vector<24x128xbf16>, vector<8x128xf32> -> vector<8x128xf32>
    %c3_247 = arith.constant 3 : index
    %c0_248 = arith.constant 0 : index
    %c0_249 = arith.constant 0 : index
    %505 = vector.load %arg16[%c3_247, %c0_248, %c0_249] : memref<5x8x1xf32, #tpu.memory_space<vmem>>, vector<1x8x1xf32>
    %506 = vector.shape_cast %505 : vector<1x8x1xf32> to vector<8x1xf32>
    %507 = vector.broadcast %506 : vector<8x1xf32> to vector<8x128xf32>
    %508 = arith.addf %504, %507 : vector<8x128xf32>
    %509 = vector.extract_strided_slice %508 {offsets = [0, 0], sizes = [4, 128], strides = [1, 1]} : vector<8x128xf32> to vector<4x128xf32>
    %510 = arith.addf %471, %509 : vector<4x128xf32>
    %511 = arith.negf %510 : vector<4x128xf32>
    %512 = math.exp %511 : vector<4x128xf32>
    %cst_250 = arith.constant 1.000000e+00 : f32
    %513 = vector.broadcast %cst_250 : f32 to vector<4x128xf32>
    %514 = arith.addf %513, %512 : vector<4x128xf32>
    %515 = arith.divf %513, %514 : vector<4x128xf32>
    %516 = arith.mulf %510, %515 : vector<4x128xf32>
    %517 = vector.extract_strided_slice %508 {offsets = [4, 0], sizes = [4, 128], strides = [1, 1]} : vector<8x128xf32> to vector<4x128xf32>
    %518 = arith.addf %471, %517 : vector<4x128xf32>
    %519 = arith.negf %518 : vector<4x128xf32>
    %520 = math.exp %519 : vector<4x128xf32>
    %cst_251 = arith.constant 1.000000e+00 : f32
    %521 = vector.broadcast %cst_251 : f32 to vector<4x128xf32>
    %522 = arith.addf %521, %520 : vector<4x128xf32>
    %523 = arith.divf %521, %522 : vector<4x128xf32>
    %524 = arith.mulf %518, %523 : vector<4x128xf32>
    %c3_252 = arith.constant 3 : index
    %c0_253 = arith.constant 0 : index
    %c0_254 = arith.constant 0 : index
    %525 = vector.load %arg17[%c3_252, %c0_253, %c0_254] : memref<5x4x4xbf16, #tpu.memory_space<vmem>>, vector<1x4x4xbf16>
    %526 = vector.shape_cast %525 : vector<1x4x4xbf16> to vector<4x4xbf16>
    %527 = arith.truncf %516 : vector<4x128xf32> to vector<4x128xbf16>
    %cst_255 = arith.constant dense<0.000000e+00> : vector<4x128xf32>
    %528 = tpu.matmul %526, %527, %cst_255 {dimension_numbers = #tpu.dot_dimension_numbers<[1], [0], [0], [1], [0, 0, 1, 1], [], []>} : vector<4x4xbf16>, vector<4x128xbf16>, vector<4x128xf32> -> vector<4x128xf32>
    %c3_256 = arith.constant 3 : index
    %c0_257 = arith.constant 0 : index
    %c0_258 = arith.constant 0 : index
    %529 = vector.load %arg18[%c3_256, %c0_257, %c0_258] : memref<5x4x1xf32, #tpu.memory_space<vmem>>, vector<1x4x1xf32>
    %530 = vector.shape_cast %529 : vector<1x4x1xf32> to vector<4x1xf32>
    %531 = vector.broadcast %530 : vector<4x1xf32> to vector<4x128xf32>
    %532 = arith.addf %528, %531 : vector<4x128xf32>
    %c3_259 = arith.constant 3 : index
    %c0_260 = arith.constant 0 : index
    %c0_261 = arith.constant 0 : index
    %533 = vector.load %arg19[%c3_259, %c0_260, %c0_261] : memref<5x4x4xbf16, #tpu.memory_space<vmem>>, vector<1x4x4xbf16>
    %534 = vector.shape_cast %533 : vector<1x4x4xbf16> to vector<4x4xbf16>
    %535 = arith.truncf %524 : vector<4x128xf32> to vector<4x128xbf16>
    %cst_262 = arith.constant dense<0.000000e+00> : vector<4x128xf32>
    %536 = tpu.matmul %534, %535, %cst_262 {dimension_numbers = #tpu.dot_dimension_numbers<[1], [0], [0], [1], [0, 0, 1, 1], [], []>} : vector<4x4xbf16>, vector<4x128xbf16>, vector<4x128xf32> -> vector<4x128xf32>
    %c3_263 = arith.constant 3 : index
    %c0_264 = arith.constant 0 : index
    %c0_265 = arith.constant 0 : index
    %537 = vector.load %arg20[%c3_263, %c0_264, %c0_265] : memref<5x4x1xf32, #tpu.memory_space<vmem>>, vector<1x4x1xf32>
    %538 = vector.shape_cast %537 : vector<1x4x1xf32> to vector<4x1xf32>
    %539 = vector.broadcast %538 : vector<4x1xf32> to vector<4x128xf32>
    %540 = arith.addf %536, %539 : vector<4x128xf32>
    %cst_266 = arith.constant 5.000000e-01 : f32
    %541 = vector.broadcast %cst_266 : f32 to vector<4x128xf32>
    %542 = arith.mulf %541, %540 : vector<4x128xf32>
    %543 = math.exp %542 : vector<4x128xf32>
    %c0_267 = arith.constant 0 : index
    %c0_268 = arith.constant 0 : index
    %c0_269 = arith.constant 0 : index
    %544 = vector.load %arg5[%c0_267, %c0_268, %c0_269] : memref<1x4x128xf32, #tpu.memory_space<vmem>>, vector<1x4x128xf32>
    %545 = vector.shape_cast %544 : vector<1x4x128xf32> to vector<4x128xf32>
    %546 = arith.mulf %543, %545 : vector<4x128xf32>
    %547 = arith.addf %532, %546 : vector<4x128xf32>
    %548 = tpu.concatenate %471, %547 in 0 : vector<4x128xf32>, vector<4x128xf32> -> vector<8x128xf32>
    %549 = vector.extract_strided_slice %548 {offsets = [0, 0], sizes = [8, 64], strides = [1, 1]} : vector<8x128xf32> to vector<8x64xf32>
    %cst_270 = arith.constant dense<0.000000e+00> : vector<8x128xf32>
    %550 = tpu.matmul %549, %13, %cst_270 {dimension_numbers = #tpu.dot_dimension_numbers<[1], [0], [0], [1], [0, 0, 1, 1], [], []>} : vector<8x64xf32>, vector<64x128xf32>, vector<8x128xf32> -> vector<8x128xf32>
    %551 = vector.extract_strided_slice %548 {offsets = [0, 64], sizes = [8, 64], strides = [1, 1]} : vector<8x128xf32> to vector<8x64xf32>
    %cst_271 = arith.constant dense<0.000000e+00> : vector<8x128xf32>
    %552 = tpu.matmul %551, %13, %cst_271 {dimension_numbers = #tpu.dot_dimension_numbers<[1], [0], [0], [1], [0, 0, 1, 1], [], []>} : vector<8x64xf32>, vector<64x128xf32>, vector<8x128xf32> -> vector<8x128xf32>
    %553 = tpu.concatenate %550, %552 in 1 : vector<8x128xf32>, vector<8x128xf32> -> vector<8x256xf32>
    %cst_272 = arith.constant 0.000000e+00 : f32
    %554 = vector.broadcast %cst_272 : f32 to vector<8x1xf32>
    %555 = vector.extract_strided_slice %553 {offsets = [0, 0], sizes = [8, 255], strides = [1, 1]} : vector<8x256xf32> to vector<8x255xf32>
    %556 = tpu.concatenate %554, %555 in 1 : vector<8x1xf32>, vector<8x255xf32> -> vector<8x256xf32>
    %557 = vector.extract_strided_slice %553 {offsets = [0, 1], sizes = [8, 255], strides = [1, 1]} : vector<8x256xf32> to vector<8x255xf32>
    %558 = tpu.concatenate %557, %554 in 1 : vector<8x255xf32>, vector<8x1xf32> -> vector<8x256xf32>
    %559 = tpu.concatenate %556, %553, %558 in 0 : vector<8x256xf32>, vector<8x256xf32>, vector<8x256xf32> -> vector<24x256xf32>
    %560 = arith.truncf %559 : vector<24x256xf32> to vector<24x256xbf16>
    %c4 = arith.constant 4 : index
    %c0_273 = arith.constant 0 : index
    %c0_274 = arith.constant 0 : index
    %561 = vector.load %arg7[%c4, %c0_273, %c0_274] : memref<6x8x24xbf16, #tpu.memory_space<vmem>>, vector<1x8x24xbf16>
    %562 = vector.shape_cast %561 : vector<1x8x24xbf16> to vector<8x24xbf16>
    %cst_275 = arith.constant dense<0.000000e+00> : vector<8x256xf32>
    %563 = tpu.matmul %562, %560, %cst_275 {dimension_numbers = #tpu.dot_dimension_numbers<[1], [0], [0], [1], [0, 0, 1, 1], [], []>} : vector<8x24xbf16>, vector<24x256xbf16>, vector<8x256xf32> -> vector<8x256xf32>
    %c4_276 = arith.constant 4 : index
    %c0_277 = arith.constant 0 : index
    %c0_278 = arith.constant 0 : index
    %564 = vector.load %arg8[%c4_276, %c0_277, %c0_278] : memref<6x8x1xf32, #tpu.memory_space<vmem>>, vector<1x8x1xf32>
    %565 = vector.shape_cast %564 : vector<1x8x1xf32> to vector<8x1xf32>
    %566 = vector.broadcast %565 : vector<8x1xf32> to vector<8x256xf32>
    %567 = arith.addf %563, %566 : vector<8x256xf32>
    %568 = arith.negf %567 : vector<8x256xf32>
    %569 = math.exp %568 : vector<8x256xf32>
    %cst_279 = arith.constant 1.000000e+00 : f32
    %570 = vector.broadcast %cst_279 : f32 to vector<8x256xf32>
    %571 = arith.addf %570, %569 : vector<8x256xf32>
    %572 = arith.divf %570, %571 : vector<8x256xf32>
    %573 = arith.mulf %567, %572 : vector<8x256xf32>
    %c4_280 = arith.constant 4 : index
    %c0_281 = arith.constant 0 : index
    %c0_282 = arith.constant 0 : index
    %574 = vector.load %arg9[%c4_280, %c0_281, %c0_282] : memref<6x4x8xbf16, #tpu.memory_space<vmem>>, vector<1x4x8xbf16>
    %575 = vector.shape_cast %574 : vector<1x4x8xbf16> to vector<4x8xbf16>
    %576 = arith.truncf %573 : vector<8x256xf32> to vector<8x256xbf16>
    %cst_283 = arith.constant dense<0.000000e+00> : vector<4x256xf32>
    %577 = tpu.matmul %575, %576, %cst_283 {dimension_numbers = #tpu.dot_dimension_numbers<[1], [0], [0], [1], [0, 0, 1, 1], [], []>} : vector<4x8xbf16>, vector<8x256xbf16>, vector<4x256xf32> -> vector<4x256xf32>
    %c4_284 = arith.constant 4 : index
    %c0_285 = arith.constant 0 : index
    %c0_286 = arith.constant 0 : index
    %578 = vector.load %arg10[%c4_284, %c0_285, %c0_286] : memref<6x4x1xf32, #tpu.memory_space<vmem>>, vector<1x4x1xf32>
    %579 = vector.shape_cast %578 : vector<1x4x1xf32> to vector<4x1xf32>
    %580 = vector.broadcast %579 : vector<4x1xf32> to vector<4x256xf32>
    %581 = arith.addf %577, %580 : vector<4x256xf32>
    %582 = arith.negf %581 : vector<4x256xf32>
    %583 = math.exp %582 : vector<4x256xf32>
    %cst_287 = arith.constant 1.000000e+00 : f32
    %584 = vector.broadcast %cst_287 : f32 to vector<4x256xf32>
    %585 = arith.addf %584, %583 : vector<4x256xf32>
    %586 = arith.divf %584, %585 : vector<4x256xf32>
    %587 = arith.mulf %581, %586 : vector<4x256xf32>
    %cst_288 = arith.constant 0.000000e+00 : f32
    %588 = vector.broadcast %cst_288 : f32 to vector<4x1xf32>
    %589 = vector.extract_strided_slice %587 {offsets = [0, 0], sizes = [4, 255], strides = [1, 1]} : vector<4x256xf32> to vector<4x255xf32>
    %590 = tpu.concatenate %588, %589 in 1 : vector<4x1xf32>, vector<4x255xf32> -> vector<4x256xf32>
    %591 = vector.extract_strided_slice %587 {offsets = [0, 1], sizes = [4, 255], strides = [1, 1]} : vector<4x256xf32> to vector<4x255xf32>
    %592 = tpu.concatenate %591, %588 in 1 : vector<4x255xf32>, vector<4x1xf32> -> vector<4x256xf32>
    %593 = tpu.concatenate %590, %587, %592 in 0 : vector<4x256xf32>, vector<4x256xf32>, vector<4x256xf32> -> vector<12x256xf32>
    %594 = arith.truncf %593 : vector<12x256xf32> to vector<12x256xbf16>
    %c4_289 = arith.constant 4 : index
    %c0_290 = arith.constant 0 : index
    %c0_291 = arith.constant 0 : index
    %595 = vector.load %arg11[%c4_289, %c0_290, %c0_291] : memref<6x4x12xbf16, #tpu.memory_space<vmem>>, vector<1x4x12xbf16>
    %596 = vector.shape_cast %595 : vector<1x4x12xbf16> to vector<4x12xbf16>
    %cst_292 = arith.constant dense<0.000000e+00> : vector<4x256xf32>
    %597 = tpu.matmul %596, %594, %cst_292 {dimension_numbers = #tpu.dot_dimension_numbers<[1], [0], [0], [1], [0, 0, 1, 1], [], []>} : vector<4x12xbf16>, vector<12x256xbf16>, vector<4x256xf32> -> vector<4x256xf32>
    %c4_293 = arith.constant 4 : index
    %c0_294 = arith.constant 0 : index
    %c0_295 = arith.constant 0 : index
    %598 = vector.load %arg12[%c4_293, %c0_294, %c0_295] : memref<6x4x1xf32, #tpu.memory_space<vmem>>, vector<1x4x1xf32>
    %599 = vector.shape_cast %598 : vector<1x4x1xf32> to vector<4x1xf32>
    %600 = vector.broadcast %599 : vector<4x1xf32> to vector<4x256xf32>
    %601 = arith.addf %597, %600 : vector<4x256xf32>
    %602 = arith.negf %601 : vector<4x256xf32>
    %603 = math.exp %602 : vector<4x256xf32>
    %cst_296 = arith.constant 1.000000e+00 : f32
    %604 = vector.broadcast %cst_296 : f32 to vector<4x256xf32>
    %605 = arith.addf %604, %603 : vector<4x256xf32>
    %606 = arith.divf %604, %605 : vector<4x256xf32>
    %607 = arith.mulf %601, %606 : vector<4x256xf32>
    %c0_297 = arith.constant 0 : index
    %c0_298 = arith.constant 0 : index
    %c0_299 = arith.constant 0 : index
    %608 = vector.load %arg31[%c0_297, %c0_298, %c0_299] : memref<1x4x256xf32, #tpu.memory_space<vmem>>, vector<1x4x256xf32>
    %609 = vector.shape_cast %608 : vector<1x4x256xf32> to vector<4x256xf32>
    %610 = vector.shape_cast %607 : vector<4x256xf32> to vector<1x4x256xf32>
    tpu.vector_store %arg31[%c0_297, %c0_298, %c0_299], %610 {strides = array<i32>} : memref<1x4x256xf32, #tpu.memory_space<vmem>>, vector<1x4x256xf32>,
    %cst_300 = arith.constant 0.000000e+00 : f32
    %611 = vector.broadcast %cst_300 : f32 to vector<4x1xf32>
    %612 = vector.extract_strided_slice %607 {offsets = [0, 0], sizes = [4, 255], strides = [1, 1]} : vector<4x256xf32> to vector<4x255xf32>
    %613 = tpu.concatenate %611, %612 in 1 : vector<4x1xf32>, vector<4x255xf32> -> vector<4x256xf32>
    %614 = vector.extract_strided_slice %607 {offsets = [0, 1], sizes = [4, 255], strides = [1, 1]} : vector<4x256xf32> to vector<4x255xf32>
    %615 = tpu.concatenate %614, %611 in 1 : vector<4x255xf32>, vector<4x1xf32> -> vector<4x256xf32>
    %616 = tpu.concatenate %613, %607, %615 in 0 : vector<4x256xf32>, vector<4x256xf32>, vector<4x256xf32> -> vector<12x256xf32>
    %617 = arith.truncf %616 : vector<12x256xf32> to vector<12x256xbf16>
    %c4_301 = arith.constant 4 : index
    %c0_302 = arith.constant 0 : index
    %c0_303 = arith.constant 0 : index
    %618 = vector.load %arg13[%c4_301, %c0_302, %c0_303] : memref<5x8x12xbf16, #tpu.memory_space<vmem>>, vector<1x8x12xbf16>
    %619 = vector.shape_cast %618 : vector<1x8x12xbf16> to vector<8x12xbf16>
    %cst_304 = arith.constant dense<0.000000e+00> : vector<8x256xf32>
    %620 = tpu.matmul %619, %617, %cst_304 {dimension_numbers = #tpu.dot_dimension_numbers<[1], [0], [0], [1], [0, 0, 1, 1], [], []>} : vector<8x12xbf16>, vector<12x256xbf16>, vector<8x256xf32> -> vector<8x256xf32>
    %c4_305 = arith.constant 4 : index
    %c0_306 = arith.constant 0 : index
    %c0_307 = arith.constant 0 : index
    %621 = vector.load %arg14[%c4_305, %c0_306, %c0_307] : memref<5x8x1xf32, #tpu.memory_space<vmem>>, vector<1x8x1xf32>
    %622 = vector.shape_cast %621 : vector<1x8x1xf32> to vector<8x1xf32>
    %623 = vector.broadcast %622 : vector<8x1xf32> to vector<8x256xf32>
    %624 = arith.addf %620, %623 : vector<8x256xf32>
    %625 = arith.negf %624 : vector<8x256xf32>
    %626 = math.exp %625 : vector<8x256xf32>
    %cst_308 = arith.constant 1.000000e+00 : f32
    %627 = vector.broadcast %cst_308 : f32 to vector<8x256xf32>
    %628 = arith.addf %627, %626 : vector<8x256xf32>
    %629 = arith.divf %627, %628 : vector<8x256xf32>
    %630 = arith.mulf %624, %629 : vector<8x256xf32>
    %cst_309 = arith.constant 0.000000e+00 : f32
    %631 = vector.broadcast %cst_309 : f32 to vector<8x1xf32>
    %632 = vector.extract_strided_slice %630 {offsets = [0, 0], sizes = [8, 255], strides = [1, 1]} : vector<8x256xf32> to vector<8x255xf32>
    %633 = tpu.concatenate %631, %632 in 1 : vector<8x1xf32>, vector<8x255xf32> -> vector<8x256xf32>
    %634 = vector.extract_strided_slice %630 {offsets = [0, 1], sizes = [8, 255], strides = [1, 1]} : vector<8x256xf32> to vector<8x255xf32>
    %635 = tpu.concatenate %634, %631 in 1 : vector<8x255xf32>, vector<8x1xf32> -> vector<8x256xf32>
    %636 = tpu.concatenate %633, %630, %635 in 0 : vector<8x256xf32>, vector<8x256xf32>, vector<8x256xf32> -> vector<24x256xf32>
    %637 = arith.truncf %636 : vector<24x256xf32> to vector<24x256xbf16>
    %c4_310 = arith.constant 4 : index
    %c0_311 = arith.constant 0 : index
    %c0_312 = arith.constant 0 : index
    %638 = vector.load %arg15[%c4_310, %c0_311, %c0_312] : memref<5x8x24xbf16, #tpu.memory_space<vmem>>, vector<1x8x24xbf16>
    %639 = vector.shape_cast %638 : vector<1x8x24xbf16> to vector<8x24xbf16>
    %cst_313 = arith.constant dense<0.000000e+00> : vector<8x256xf32>
    %640 = tpu.matmul %639, %637, %cst_313 {dimension_numbers = #tpu.dot_dimension_numbers<[1], [0], [0], [1], [0, 0, 1, 1], [], []>} : vector<8x24xbf16>, vector<24x256xbf16>, vector<8x256xf32> -> vector<8x256xf32>
    %c4_314 = arith.constant 4 : index
    %c0_315 = arith.constant 0 : index
    %c0_316 = arith.constant 0 : index
    %641 = vector.load %arg16[%c4_314, %c0_315, %c0_316] : memref<5x8x1xf32, #tpu.memory_space<vmem>>, vector<1x8x1xf32>
    %642 = vector.shape_cast %641 : vector<1x8x1xf32> to vector<8x1xf32>
    %643 = vector.broadcast %642 : vector<8x1xf32> to vector<8x256xf32>
    %644 = arith.addf %640, %643 : vector<8x256xf32>
    %645 = vector.extract_strided_slice %644 {offsets = [0, 0], sizes = [4, 256], strides = [1, 1]} : vector<8x256xf32> to vector<4x256xf32>
    %646 = arith.addf %607, %645 : vector<4x256xf32>
    %647 = arith.negf %646 : vector<4x256xf32>
    %648 = math.exp %647 : vector<4x256xf32>
    %cst_317 = arith.constant 1.000000e+00 : f32
    %649 = vector.broadcast %cst_317 : f32 to vector<4x256xf32>
    %650 = arith.addf %649, %648 : vector<4x256xf32>
    %651 = arith.divf %649, %650 : vector<4x256xf32>
    %652 = arith.mulf %646, %651 : vector<4x256xf32>
    %653 = vector.extract_strided_slice %644 {offsets = [4, 0], sizes = [4, 256], strides = [1, 1]} : vector<8x256xf32> to vector<4x256xf32>
    %654 = arith.addf %607, %653 : vector<4x256xf32>
    %655 = arith.negf %654 : vector<4x256xf32>
    %656 = math.exp %655 : vector<4x256xf32>
    %cst_318 = arith.constant 1.000000e+00 : f32
    %657 = vector.broadcast %cst_318 : f32 to vector<4x256xf32>
    %658 = arith.addf %657, %656 : vector<4x256xf32>
    %659 = arith.divf %657, %658 : vector<4x256xf32>
    %660 = arith.mulf %654, %659 : vector<4x256xf32>
    %c4_319 = arith.constant 4 : index
    %c0_320 = arith.constant 0 : index
    %c0_321 = arith.constant 0 : index
    %661 = vector.load %arg17[%c4_319, %c0_320, %c0_321] : memref<5x4x4xbf16, #tpu.memory_space<vmem>>, vector<1x4x4xbf16>
    %662 = vector.shape_cast %661 : vector<1x4x4xbf16> to vector<4x4xbf16>
    %663 = arith.truncf %652 : vector<4x256xf32> to vector<4x256xbf16>
    %cst_322 = arith.constant dense<0.000000e+00> : vector<4x256xf32>
    %664 = tpu.matmul %662, %663, %cst_322 {dimension_numbers = #tpu.dot_dimension_numbers<[1], [0], [0], [1], [0, 0, 1, 1], [], []>} : vector<4x4xbf16>, vector<4x256xbf16>, vector<4x256xf32> -> vector<4x256xf32>
    %c4_323 = arith.constant 4 : index
    %c0_324 = arith.constant 0 : index
    %c0_325 = arith.constant 0 : index
    %665 = vector.load %arg18[%c4_323, %c0_324, %c0_325] : memref<5x4x1xf32, #tpu.memory_space<vmem>>, vector<1x4x1xf32>
    %666 = vector.shape_cast %665 : vector<1x4x1xf32> to vector<4x1xf32>
    %667 = vector.broadcast %666 : vector<4x1xf32> to vector<4x256xf32>
    %668 = arith.addf %664, %667 : vector<4x256xf32>
    %c4_326 = arith.constant 4 : index
    %c0_327 = arith.constant 0 : index
    %c0_328 = arith.constant 0 : index
    %669 = vector.load %arg19[%c4_326, %c0_327, %c0_328] : memref<5x4x4xbf16, #tpu.memory_space<vmem>>, vector<1x4x4xbf16>
    %670 = vector.shape_cast %669 : vector<1x4x4xbf16> to vector<4x4xbf16>
    %671 = arith.truncf %660 : vector<4x256xf32> to vector<4x256xbf16>
    %cst_329 = arith.constant dense<0.000000e+00> : vector<4x256xf32>
    %672 = tpu.matmul %670, %671, %cst_329 {dimension_numbers = #tpu.dot_dimension_numbers<[1], [0], [0], [1], [0, 0, 1, 1], [], []>} : vector<4x4xbf16>, vector<4x256xbf16>, vector<4x256xf32> -> vector<4x256xf32>
    %c4_330 = arith.constant 4 : index
    %c0_331 = arith.constant 0 : index
    %c0_332 = arith.constant 0 : index
    %673 = vector.load %arg20[%c4_330, %c0_331, %c0_332] : memref<5x4x1xf32, #tpu.memory_space<vmem>>, vector<1x4x1xf32>
    %674 = vector.shape_cast %673 : vector<1x4x1xf32> to vector<4x1xf32>
    %675 = vector.broadcast %674 : vector<4x1xf32> to vector<4x256xf32>
    %676 = arith.addf %672, %675 : vector<4x256xf32>
    %cst_333 = arith.constant 5.000000e-01 : f32
    %677 = vector.broadcast %cst_333 : f32 to vector<4x256xf32>
    %678 = arith.mulf %677, %676 : vector<4x256xf32>
    %679 = math.exp %678 : vector<4x256xf32>
    %c0_334 = arith.constant 0 : index
    %c0_335 = arith.constant 0 : index
    %c0_336 = arith.constant 0 : index
    %680 = vector.load %arg6[%c0_334, %c0_335, %c0_336] : memref<1x4x256xf32, #tpu.memory_space<vmem>>, vector<1x4x256xf32>
    %681 = vector.shape_cast %680 : vector<1x4x256xf32> to vector<4x256xf32>
    %682 = arith.mulf %679, %681 : vector<4x256xf32>
    %683 = arith.addf %668, %682 : vector<4x256xf32>
    %684 = tpu.concatenate %607, %683 in 0 : vector<4x256xf32>, vector<4x256xf32> -> vector<8x256xf32>
    %685 = vector.extract_strided_slice %684 {offsets = [0, 0], sizes = [8, 64], strides = [1, 1]} : vector<8x256xf32> to vector<8x64xf32>
    %cst_337 = arith.constant dense<0.000000e+00> : vector<8x128xf32>
    %686 = tpu.matmul %685, %13, %cst_337 {dimension_numbers = #tpu.dot_dimension_numbers<[1], [0], [0], [1], [0, 0, 1, 1], [], []>} : vector<8x64xf32>, vector<64x128xf32>, vector<8x128xf32> -> vector<8x128xf32>
    %687 = vector.extract_strided_slice %684 {offsets = [0, 64], sizes = [8, 64], strides = [1, 1]} : vector<8x256xf32> to vector<8x64xf32>
    %cst_338 = arith.constant dense<0.000000e+00> : vector<8x128xf32>
    %688 = tpu.matmul %687, %13, %cst_338 {dimension_numbers = #tpu.dot_dimension_numbers<[1], [0], [0], [1], [0, 0, 1, 1], [], []>} : vector<8x64xf32>, vector<64x128xf32>, vector<8x128xf32> -> vector<8x128xf32>
    %689 = vector.extract_strided_slice %684 {offsets = [0, 128], sizes = [8, 64], strides = [1, 1]} : vector<8x256xf32> to vector<8x64xf32>
    %cst_339 = arith.constant dense<0.000000e+00> : vector<8x128xf32>
    %690 = tpu.matmul %689, %13, %cst_339 {dimension_numbers = #tpu.dot_dimension_numbers<[1], [0], [0], [1], [0, 0, 1, 1], [], []>} : vector<8x64xf32>, vector<64x128xf32>, vector<8x128xf32> -> vector<8x128xf32>
    %691 = vector.extract_strided_slice %684 {offsets = [0, 192], sizes = [8, 64], strides = [1, 1]} : vector<8x256xf32> to vector<8x64xf32>
    %cst_340 = arith.constant dense<0.000000e+00> : vector<8x128xf32>
    %692 = tpu.matmul %691, %13, %cst_340 {dimension_numbers = #tpu.dot_dimension_numbers<[1], [0], [0], [1], [0, 0, 1, 1], [], []>} : vector<8x64xf32>, vector<64x128xf32>, vector<8x128xf32> -> vector<8x128xf32>
    %693 = tpu.concatenate %686, %688, %690, %692 in 1 : vector<8x128xf32>, vector<8x128xf32>, vector<8x128xf32>, vector<8x128xf32> -> vector<8x512xf32>
    %cst_341 = arith.constant 0.000000e+00 : f32
    %694 = vector.broadcast %cst_341 : f32 to vector<8x1xf32>
    %695 = vector.extract_strided_slice %693 {offsets = [0, 0], sizes = [8, 511], strides = [1, 1]} : vector<8x512xf32> to vector<8x511xf32>
    %696 = tpu.concatenate %694, %695 in 1 : vector<8x1xf32>, vector<8x511xf32> -> vector<8x512xf32>
    %697 = vector.extract_strided_slice %693 {offsets = [0, 1], sizes = [8, 511], strides = [1, 1]} : vector<8x512xf32> to vector<8x511xf32>
    %698 = tpu.concatenate %697, %694 in 1 : vector<8x511xf32>, vector<8x1xf32> -> vector<8x512xf32>
    %699 = tpu.concatenate %696, %693, %698 in 0 : vector<8x512xf32>, vector<8x512xf32>, vector<8x512xf32> -> vector<24x512xf32>
    %700 = arith.truncf %699 : vector<24x512xf32> to vector<24x512xbf16>
    %c5 = arith.constant 5 : index
    %c0_342 = arith.constant 0 : index
    %c0_343 = arith.constant 0 : index
    %701 = vector.load %arg7[%c5, %c0_342, %c0_343] : memref<6x8x24xbf16, #tpu.memory_space<vmem>>, vector<1x8x24xbf16>
    %702 = vector.shape_cast %701 : vector<1x8x24xbf16> to vector<8x24xbf16>
    %cst_344 = arith.constant dense<0.000000e+00> : vector<8x512xf32>
    %703 = tpu.matmul %702, %700, %cst_344 {dimension_numbers = #tpu.dot_dimension_numbers<[1], [0], [0], [1], [0, 0, 1, 1], [], []>} : vector<8x24xbf16>, vector<24x512xbf16>, vector<8x512xf32> -> vector<8x512xf32>
    %c5_345 = arith.constant 5 : index
    %c0_346 = arith.constant 0 : index
    %c0_347 = arith.constant 0 : index
    %704 = vector.load %arg8[%c5_345, %c0_346, %c0_347] : memref<6x8x1xf32, #tpu.memory_space<vmem>>, vector<1x8x1xf32>
    %705 = vector.shape_cast %704 : vector<1x8x1xf32> to vector<8x1xf32>
    %706 = vector.broadcast %705 : vector<8x1xf32> to vector<8x512xf32>
    %707 = arith.addf %703, %706 : vector<8x512xf32>
    %708 = arith.negf %707 : vector<8x512xf32>
    %709 = math.exp %708 : vector<8x512xf32>
    %cst_348 = arith.constant 1.000000e+00 : f32
    %710 = vector.broadcast %cst_348 : f32 to vector<8x512xf32>
    %711 = arith.addf %710, %709 : vector<8x512xf32>
    %712 = arith.divf %710, %711 : vector<8x512xf32>
    %713 = arith.mulf %707, %712 : vector<8x512xf32>
    %c5_349 = arith.constant 5 : index
    %c0_350 = arith.constant 0 : index
    %c0_351 = arith.constant 0 : index
    %714 = vector.load %arg9[%c5_349, %c0_350, %c0_351] : memref<6x4x8xbf16, #tpu.memory_space<vmem>>, vector<1x4x8xbf16>
    %715 = vector.shape_cast %714 : vector<1x4x8xbf16> to vector<4x8xbf16>
    %716 = arith.truncf %713 : vector<8x512xf32> to vector<8x512xbf16>
    %cst_352 = arith.constant dense<0.000000e+00> : vector<4x512xf32>
    %717 = tpu.matmul %715, %716, %cst_352 {dimension_numbers = #tpu.dot_dimension_numbers<[1], [0], [0], [1], [0, 0, 1, 1], [], []>} : vector<4x8xbf16>, vector<8x512xbf16>, vector<4x512xf32> -> vector<4x512xf32>
    %c5_353 = arith.constant 5 : index
    %c0_354 = arith.constant 0 : index
    %c0_355 = arith.constant 0 : index
    %718 = vector.load %arg10[%c5_353, %c0_354, %c0_355] : memref<6x4x1xf32, #tpu.memory_space<vmem>>, vector<1x4x1xf32>
    %719 = vector.shape_cast %718 : vector<1x4x1xf32> to vector<4x1xf32>
    %720 = vector.broadcast %719 : vector<4x1xf32> to vector<4x512xf32>
    %721 = arith.addf %717, %720 : vector<4x512xf32>
    %722 = arith.negf %721 : vector<4x512xf32>
    %723 = math.exp %722 : vector<4x512xf32>
    %cst_356 = arith.constant 1.000000e+00 : f32
    %724 = vector.broadcast %cst_356 : f32 to vector<4x512xf32>
    %725 = arith.addf %724, %723 : vector<4x512xf32>
    %726 = arith.divf %724, %725 : vector<4x512xf32>
    %727 = arith.mulf %721, %726 : vector<4x512xf32>
    %cst_357 = arith.constant 0.000000e+00 : f32
    %728 = vector.broadcast %cst_357 : f32 to vector<4x1xf32>
    %729 = vector.extract_strided_slice %727 {offsets = [0, 0], sizes = [4, 511], strides = [1, 1]} : vector<4x512xf32> to vector<4x511xf32>
    %730 = tpu.concatenate %728, %729 in 1 : vector<4x1xf32>, vector<4x511xf32> -> vector<4x512xf32>
    %731 = vector.extract_strided_slice %727 {offsets = [0, 1], sizes = [4, 511], strides = [1, 1]} : vector<4x512xf32> to vector<4x511xf32>
    %732 = tpu.concatenate %731, %728 in 1 : vector<4x511xf32>, vector<4x1xf32> -> vector<4x512xf32>
    %733 = tpu.concatenate %730, %727, %732 in 0 : vector<4x512xf32>, vector<4x512xf32>, vector<4x512xf32> -> vector<12x512xf32>
    %734 = arith.truncf %733 : vector<12x512xf32> to vector<12x512xbf16>
    %c5_358 = arith.constant 5 : index
    %c0_359 = arith.constant 0 : index
    %c0_360 = arith.constant 0 : index
    %735 = vector.load %arg11[%c5_358, %c0_359, %c0_360] : memref<6x4x12xbf16, #tpu.memory_space<vmem>>, vector<1x4x12xbf16>
    %736 = vector.shape_cast %735 : vector<1x4x12xbf16> to vector<4x12xbf16>
    %cst_361 = arith.constant dense<0.000000e+00> : vector<4x512xf32>
    %737 = tpu.matmul %736, %734, %cst_361 {dimension_numbers = #tpu.dot_dimension_numbers<[1], [0], [0], [1], [0, 0, 1, 1], [], []>} : vector<4x12xbf16>, vector<12x512xbf16>, vector<4x512xf32> -> vector<4x512xf32>
    %c5_362 = arith.constant 5 : index
    %c0_363 = arith.constant 0 : index
    %c0_364 = arith.constant 0 : index
    %738 = vector.load %arg12[%c5_362, %c0_363, %c0_364] : memref<6x4x1xf32, #tpu.memory_space<vmem>>, vector<1x4x1xf32>
    %739 = vector.shape_cast %738 : vector<1x4x1xf32> to vector<4x1xf32>
    %740 = vector.broadcast %739 : vector<4x1xf32> to vector<4x512xf32>
    %741 = arith.addf %737, %740 : vector<4x512xf32>
    %742 = arith.negf %741 : vector<4x512xf32>
    %743 = math.exp %742 : vector<4x512xf32>
    %cst_365 = arith.constant 1.000000e+00 : f32
    %744 = vector.broadcast %cst_365 : f32 to vector<4x512xf32>
    %745 = arith.addf %744, %743 : vector<4x512xf32>
    %746 = arith.divf %744, %745 : vector<4x512xf32>
    %747 = arith.mulf %741, %746 : vector<4x512xf32>
    %c0_366 = arith.constant 0 : index
    %c0_367 = arith.constant 0 : index
    %c0_368 = arith.constant 0 : index
    %748 = vector.load %arg32[%c0_366, %c0_367, %c0_368] : memref<1x4x512xf32, #tpu.memory_space<vmem>>, vector<1x4x512xf32>
    %749 = vector.shape_cast %748 : vector<1x4x512xf32> to vector<4x512xf32>
    %750 = vector.shape_cast %747 : vector<4x512xf32> to vector<1x4x512xf32>
    tpu.vector_store %arg32[%c0_366, %c0_367, %c0_368], %750 {strides = array<i32>} : memref<1x4x512xf32, #tpu.memory_space<vmem>>, vector<1x4x512xf32>,
    %cst_369 = arith.constant 0.000000e+00 : f32
    %751 = vector.broadcast %cst_369 : f32 to vector<4x1xf32>
    %752 = vector.extract_strided_slice %747 {offsets = [0, 0], sizes = [4, 511], strides = [1, 1]} : vector<4x512xf32> to vector<4x511xf32>
    %753 = tpu.concatenate %751, %752 in 1 : vector<4x1xf32>, vector<4x511xf32> -> vector<4x512xf32>
    %754 = vector.extract_strided_slice %747 {offsets = [0, 1], sizes = [4, 511], strides = [1, 1]} : vector<4x512xf32> to vector<4x511xf32>
    %755 = tpu.concatenate %754, %751 in 1 : vector<4x511xf32>, vector<4x1xf32> -> vector<4x512xf32>
    %756 = tpu.concatenate %753, %747, %755 in 0 : vector<4x512xf32>, vector<4x512xf32>, vector<4x512xf32> -> vector<12x512xf32>
    %757 = arith.truncf %756 : vector<12x512xf32> to vector<12x512xbf16>
    %c0_370 = arith.constant 0 : index
    %c0_371 = arith.constant 0 : index
    %c0_372 = arith.constant 0 : index
    %758 = vector.load %arg21[%c0_370, %c0_371, %c0_372] : memref<1x4x12xbf16, #tpu.memory_space<vmem>>, vector<1x4x12xbf16>
    %759 = vector.shape_cast %758 : vector<1x4x12xbf16> to vector<4x12xbf16>
    %cst_373 = arith.constant dense<0.000000e+00> : vector<4x512xf32>
    %760 = tpu.matmul %759, %757, %cst_373 {dimension_numbers = #tpu.dot_dimension_numbers<[1], [0], [0], [1], [0, 0, 1, 1], [], []>} : vector<4x12xbf16>, vector<12x512xbf16>, vector<4x512xf32> -> vector<4x512xf32>
    %c0_374 = arith.constant 0 : index
    %c0_375 = arith.constant 0 : index
    %c0_376 = arith.constant 0 : index
    %761 = vector.load %arg22[%c0_374, %c0_375, %c0_376] : memref<1x4x1xf32, #tpu.memory_space<vmem>>, vector<1x4x1xf32>
    %762 = vector.shape_cast %761 : vector<1x4x1xf32> to vector<4x1xf32>
    %763 = vector.broadcast %762 : vector<4x1xf32> to vector<4x512xf32>
    %764 = arith.addf %760, %763 : vector<4x512xf32>
    %765 = arith.negf %764 : vector<4x512xf32>
    %766 = math.exp %765 : vector<4x512xf32>
    %cst_377 = arith.constant 1.000000e+00 : f32
    %767 = vector.broadcast %cst_377 : f32 to vector<4x512xf32>
    %768 = arith.addf %767, %766 : vector<4x512xf32>
    %769 = arith.divf %767, %768 : vector<4x512xf32>
    %770 = arith.mulf %764, %769 : vector<4x512xf32>
    %cst_378 = arith.constant 0.000000e+00 : f32
    %771 = vector.broadcast %cst_378 : f32 to vector<4x1xf32>
    %772 = vector.extract_strided_slice %770 {offsets = [0, 0], sizes = [4, 511], strides = [1, 1]} : vector<4x512xf32> to vector<4x511xf32>
    %773 = tpu.concatenate %771, %772 in 1 : vector<4x1xf32>, vector<4x511xf32> -> vector<4x512xf32>
    %774 = vector.extract_strided_slice %770 {offsets = [0, 1], sizes = [4, 511], strides = [1, 1]} : vector<4x512xf32> to vector<4x511xf32>
    %775 = tpu.concatenate %774, %771 in 1 : vector<4x511xf32>, vector<4x1xf32> -> vector<4x512xf32>
    %776 = tpu.concatenate %773, %770, %775 in 0 : vector<4x512xf32>, vector<4x512xf32>, vector<4x512xf32> -> vector<12x512xf32>
    %777 = arith.truncf %776 : vector<12x512xf32> to vector<12x512xbf16>
    %c0_379 = arith.constant 0 : index
    %c0_380 = arith.constant 0 : index
    %c0_381 = arith.constant 0 : index
    %778 = vector.load %arg23[%c0_379, %c0_380, %c0_381] : memref<1x4x12xbf16, #tpu.memory_space<vmem>>, vector<1x4x12xbf16>
    %779 = vector.shape_cast %778 : vector<1x4x12xbf16> to vector<4x12xbf16>
    %cst_382 = arith.constant dense<0.000000e+00> : vector<4x512xf32>
    %780 = tpu.matmul %779, %777, %cst_382 {dimension_numbers = #tpu.dot_dimension_numbers<[1], [0], [0], [1], [0, 0, 1, 1], [], []>} : vector<4x12xbf16>, vector<12x512xbf16>, vector<4x512xf32> -> vector<4x512xf32>
    %c0_383 = arith.constant 0 : index
    %c0_384 = arith.constant 0 : index
    %c0_385 = arith.constant 0 : index
    %781 = vector.load %arg24[%c0_383, %c0_384, %c0_385] : memref<1x4x1xf32, #tpu.memory_space<vmem>>, vector<1x4x1xf32>
    %782 = vector.shape_cast %781 : vector<1x4x1xf32> to vector<4x1xf32>
    %783 = vector.broadcast %782 : vector<4x1xf32> to vector<4x512xf32>
    %784 = arith.addf %780, %783 : vector<4x512xf32>
    %785 = arith.addf %747, %784 : vector<4x512xf32>
    %c0_386 = arith.constant 0 : index
    %c0_387 = arith.constant 0 : index
    %c0_388 = arith.constant 0 : index
    %786 = vector.load %arg25[%c0_386, %c0_387, %c0_388] : memref<1x4x4xbf16, #tpu.memory_space<vmem>>, vector<1x4x4xbf16>
    %787 = vector.shape_cast %786 : vector<1x4x4xbf16> to vector<4x4xbf16>
    %788 = arith.truncf %785 : vector<4x512xf32> to vector<4x512xbf16>
    %cst_389 = arith.constant dense<0.000000e+00> : vector<4x512xf32>
    %789 = tpu.matmul %787, %788, %cst_389 {dimension_numbers = #tpu.dot_dimension_numbers<[1], [0], [0], [1], [0, 0, 1, 1], [], []>} : vector<4x4xbf16>, vector<4x512xbf16>, vector<4x512xf32> -> vector<4x512xf32>
    %c0_390 = arith.constant 0 : index
    %c0_391 = arith.constant 0 : index
    %c0_392 = arith.constant 0 : index
    %790 = vector.load %arg26[%c0_390, %c0_391, %c0_392] : memref<1x4x1xf32, #tpu.memory_space<vmem>>, vector<1x4x1xf32>
    %791 = vector.shape_cast %790 : vector<1x4x1xf32> to vector<4x1xf32>
    %792 = vector.broadcast %791 : vector<4x1xf32> to vector<4x512xf32>
    %793 = arith.addf %789, %792 : vector<4x512xf32>
    %c0_393 = arith.constant 0 : index
    %c0_394 = arith.constant 0 : index
    %c0_395 = arith.constant 0 : index
    %794 = vector.load %arg33[%c0_393, %c0_394, %c0_395] : memref<1x4x512xf32, #tpu.memory_space<vmem>>, vector<1x4x512xf32>
    %795 = vector.shape_cast %794 : vector<1x4x512xf32> to vector<4x512xf32>
    %796 = vector.shape_cast %793 : vector<4x512xf32> to vector<1x4x512xf32>
    tpu.vector_store %arg33[%c0_393, %c0_394, %c0_395], %796 {strides = array<i32>} : memref<1x4x512xf32, #tpu.memory_space<vmem>>, vector<1x4x512xf32>,
    %797 = arith.negf %793 : vector<4x512xf32>
    %798 = math.exp %797 : vector<4x512xf32>
    %cst_396 = arith.constant 1.000000e+00 : f32
    %799 = vector.broadcast %cst_396 : f32 to vector<4x512xf32>
    %800 = arith.addf %799, %798 : vector<4x512xf32>
    %801 = arith.divf %799, %800 : vector<4x512xf32>
    %c0_397 = arith.constant 0 : index
    %c0_398 = arith.constant 0 : index
    %c0_399 = arith.constant 0 : index
    %802 = vector.load %arg34[%c0_397, %c0_398, %c0_399] : memref<1x4x512xf32, #tpu.memory_space<vmem>>, vector<1x4x512xf32>
    %803 = vector.shape_cast %802 : vector<1x4x512xf32> to vector<4x512xf32>
    %804 = vector.shape_cast %801 : vector<4x512xf32> to vector<1x4x512xf32>
    tpu.vector_store %arg34[%c0_397, %c0_398, %c0_399], %804 {strides = array<i32>} : memref<1x4x512xf32, #tpu.memory_space<vmem>>, vector<1x4x512xf32>,
    return
  }
  func.func @transform_0(%arg0: i32) -> (i32, i32, i32) {
    %c0_i32 = arith.constant 0 : i32
    %c0_i32_0 = arith.constant 0 : i32
    %c0_i32_1 = arith.constant 0 : i32
    return %arg0, %c0_i32, %c0_i32_0 : i32, i32, i32
  }
  func.func @transform_1(%arg0: i32) -> (i32, i32, i32) {
    %c0_i32 = arith.constant 0 : i32
    %c0_i32_0 = arith.constant 0 : i32
    %c0_i32_1 = arith.constant 0 : i32
    return %arg0, %c0_i32, %c0_i32_0 : i32, i32, i32
  }
  func.func @transform_2(%arg0: i32) -> (i32, i32, i32) {
    %c0_i32 = arith.constant 0 : i32
    %c0_i32_0 = arith.constant 0 : i32
    %c0_i32_1 = arith.constant 0 : i32
    return %arg0, %c0_i32, %c0_i32_0 : i32, i32, i32
  }
  func.func @transform_3(%arg0: i32) -> (i32, i32, i32) {
    %c0_i32 = arith.constant 0 : i32
    %c0_i32_0 = arith.constant 0 : i32
    %c0_i32_1 = arith.constant 0 : i32
    return %arg0, %c0_i32, %c0_i32_0 : i32, i32, i32
  }
  func.func @transform_4(%arg0: i32) -> (i32, i32, i32) {
    %c0_i32 = arith.constant 0 : i32
    %c0_i32_0 = arith.constant 0 : i32
    %c0_i32_1 = arith.constant 0 : i32
    return %arg0, %c0_i32, %c0_i32_0 : i32, i32, i32
  }
  func.func @transform_5(%arg0: i32) -> (i32, i32, i32) {
    %c0_i32 = arith.constant 0 : i32
    %c0_i32_0 = arith.constant 0 : i32
    %c0_i32_1 = arith.constant 0 : i32
    return %arg0, %c0_i32, %c0_i32_0 : i32, i32, i32
  }
  func.func @transform_6(%arg0: i32) -> (i32, i32, i32) {
    %c0_i32 = arith.constant 0 : i32
    %c0_i32_0 = arith.constant 0 : i32
    %c0_i32_1 = arith.constant 0 : i32
    %c0_i32_2 = arith.constant 0 : i32
    return %c0_i32, %c0_i32_0, %c0_i32_1 : i32, i32, i32
  }
  func.func @transform_7(%arg0: i32) -> (i32, i32, i32) {
    %c0_i32 = arith.constant 0 : i32
    %c0_i32_0 = arith.constant 0 : i32
    %c0_i32_1 = arith.constant 0 : i32
    %c0_i32_2 = arith.constant 0 : i32
    return %c0_i32, %c0_i32_0, %c0_i32_1 : i32, i32, i32
  }
  func.func @transform_8(%arg0: i32) -> (i32, i32, i32) {
    %c0_i32 = arith.constant 0 : i32
    %c0_i32_0 = arith.constant 0 : i32
    %c0_i32_1 = arith.constant 0 : i32
    %c0_i32_2 = arith.constant 0 : i32
    return %c0_i32, %c0_i32_0, %c0_i32_1 : i32, i32, i32
  }
  func.func @transform_9(%arg0: i32) -> (i32, i32, i32) {
    %c0_i32 = arith.constant 0 : i32
    %c0_i32_0 = arith.constant 0 : i32
    %c0_i32_1 = arith.constant 0 : i32
    %c0_i32_2 = arith.constant 0 : i32
    return %c0_i32, %c0_i32_0, %c0_i32_1 : i32, i32, i32
  }
  func.func @transform_10(%arg0: i32) -> (i32, i32, i32) {
    %c0_i32 = arith.constant 0 : i32
    %c0_i32_0 = arith.constant 0 : i32
    %c0_i32_1 = arith.constant 0 : i32
    %c0_i32_2 = arith.constant 0 : i32
    return %c0_i32, %c0_i32_0, %c0_i32_1 : i32, i32, i32
  }
  func.func @transform_11(%arg0: i32) -> (i32, i32, i32) {
    %c0_i32 = arith.constant 0 : i32
    %c0_i32_0 = arith.constant 0 : i32
    %c0_i32_1 = arith.constant 0 : i32
    %c0_i32_2 = arith.constant 0 : i32
    return %c0_i32, %c0_i32_0, %c0_i32_1 : i32, i32, i32
  }
  func.func @transform_12(%arg0: i32) -> (i32, i32, i32) {
    %c0_i32 = arith.constant 0 : i32
    %c0_i32_0 = arith.constant 0 : i32
    %c0_i32_1 = arith.constant 0 : i32
    %c0_i32_2 = arith.constant 0 : i32
    return %c0_i32, %c0_i32_0, %c0_i32_1 : i32, i32, i32
  }
  func.func @transform_13(%arg0: i32) -> (i32, i32, i32) {
    %c0_i32 = arith.constant 0 : i32
    %c0_i32_0 = arith.constant 0 : i32
    %c0_i32_1 = arith.constant 0 : i32
    %c0_i32_2 = arith.constant 0 : i32
    return %c0_i32, %c0_i32_0, %c0_i32_1 : i32, i32, i32
  }
  func.func @transform_14(%arg0: i32) -> (i32, i32, i32) {
    %c0_i32 = arith.constant 0 : i32
    %c0_i32_0 = arith.constant 0 : i32
    %c0_i32_1 = arith.constant 0 : i32
    %c0_i32_2 = arith.constant 0 : i32
    return %c0_i32, %c0_i32_0, %c0_i32_1 : i32, i32, i32
  }
  func.func @transform_15(%arg0: i32) -> (i32, i32, i32) {
    %c0_i32 = arith.constant 0 : i32
    %c0_i32_0 = arith.constant 0 : i32
    %c0_i32_1 = arith.constant 0 : i32
    %c0_i32_2 = arith.constant 0 : i32
    return %c0_i32, %c0_i32_0, %c0_i32_1 : i32, i32, i32
  }
  func.func @transform_16(%arg0: i32) -> (i32, i32, i32) {
    %c0_i32 = arith.constant 0 : i32
    %c0_i32_0 = arith.constant 0 : i32
    %c0_i32_1 = arith.constant 0 : i32
    %c0_i32_2 = arith.constant 0 : i32
    return %c0_i32, %c0_i32_0, %c0_i32_1 : i32, i32, i32
  }
  func.func @transform_17(%arg0: i32) -> (i32, i32, i32) {
    %c0_i32 = arith.constant 0 : i32
    %c0_i32_0 = arith.constant 0 : i32
    %c0_i32_1 = arith.constant 0 : i32
    %c0_i32_2 = arith.constant 0 : i32
    return %c0_i32, %c0_i32_0, %c0_i32_1 : i32, i32, i32
  }
  func.func @transform_18(%arg0: i32) -> (i32, i32, i32) {
    %c0_i32 = arith.constant 0 : i32
    %c0_i32_0 = arith.constant 0 : i32
    %c0_i32_1 = arith.constant 0 : i32
    %c0_i32_2 = arith.constant 0 : i32
    return %c0_i32, %c0_i32_0, %c0_i32_1 : i32, i32, i32
  }
  func.func @transform_19(%arg0: i32) -> (i32, i32, i32) {
    %c0_i32 = arith.constant 0 : i32
    %c0_i32_0 = arith.constant 0 : i32
    %c0_i32_1 = arith.constant 0 : i32
    %c0_i32_2 = arith.constant 0 : i32
    return %c0_i32, %c0_i32_0, %c0_i32_1 : i32, i32, i32
  }
  func.func @transform_20(%arg0: i32) -> (i32, i32, i32) {
    %c0_i32 = arith.constant 0 : i32
    %c0_i32_0 = arith.constant 0 : i32
    %c0_i32_1 = arith.constant 0 : i32
    %c0_i32_2 = arith.constant 0 : i32
    return %c0_i32, %c0_i32_0, %c0_i32_1 : i32, i32, i32
  }
  func.func @transform_21(%arg0: i32) -> (i32, i32, i32) {
    %c0_i32 = arith.constant 0 : i32
    %c0_i32_0 = arith.constant 0 : i32
    %c0_i32_1 = arith.constant 0 : i32
    %c0_i32_2 = arith.constant 0 : i32
    return %c0_i32, %c0_i32_0, %c0_i32_1 : i32, i32, i32
  }
  func.func @transform_22(%arg0: i32) -> (i32, i32, i32) {
    %c0_i32 = arith.constant 0 : i32
    %c0_i32_0 = arith.constant 0 : i32
    %c0_i32_1 = arith.constant 0 : i32
    %c0_i32_2 = arith.constant 0 : i32
    return %c0_i32, %c0_i32_0, %c0_i32_1 : i32, i32, i32
  }
  func.func @transform_23(%arg0: i32) -> (i32, i32, i32) {
    %c0_i32 = arith.constant 0 : i32
    %c0_i32_0 = arith.constant 0 : i32
    %c0_i32_1 = arith.constant 0 : i32
    %c0_i32_2 = arith.constant 0 : i32
    return %c0_i32, %c0_i32_0, %c0_i32_1 : i32, i32, i32
  }
  func.func @transform_24(%arg0: i32) -> (i32, i32, i32) {
    %c0_i32 = arith.constant 0 : i32
    %c0_i32_0 = arith.constant 0 : i32
    %c0_i32_1 = arith.constant 0 : i32
    %c0_i32_2 = arith.constant 0 : i32
    return %c0_i32, %c0_i32_0, %c0_i32_1 : i32, i32, i32
  }
  func.func @transform_25(%arg0: i32) -> (i32, i32, i32) {
    %c0_i32 = arith.constant 0 : i32
    %c0_i32_0 = arith.constant 0 : i32
    %c0_i32_1 = arith.constant 0 : i32
    %c0_i32_2 = arith.constant 0 : i32
    return %c0_i32, %c0_i32_0, %c0_i32_1 : i32, i32, i32
  }
  func.func @transform_26(%arg0: i32) -> (i32, i32, i32) {
    %c0_i32 = arith.constant 0 : i32
    %c0_i32_0 = arith.constant 0 : i32
    %c0_i32_1 = arith.constant 0 : i32
    return %arg0, %c0_i32, %c0_i32_0 : i32, i32, i32
  }
  func.func @transform_27(%arg0: i32) -> (i32, i32, i32) {
    %c0_i32 = arith.constant 0 : i32
    %c0_i32_0 = arith.constant 0 : i32
    %c0_i32_1 = arith.constant 0 : i32
    return %arg0, %c0_i32, %c0_i32_0 : i32, i32, i32
  }
  func.func @transform_28(%arg0: i32) -> (i32, i32, i32) {
    %c0_i32 = arith.constant 0 : i32
    %c0_i32_0 = arith.constant 0 : i32
    %c0_i32_1 = arith.constant 0 : i32
    return %arg0, %c0_i32, %c0_i32_0 : i32, i32, i32
  }
  func.func @transform_29(%arg0: i32) -> (i32, i32, i32) {
    %c0_i32 = arith.constant 0 : i32
    %c0_i32_0 = arith.constant 0 : i32
    %c0_i32_1 = arith.constant 0 : i32
    return %arg0, %c0_i32, %c0_i32_0 : i32, i32, i32
  }
  func.func @transform_30(%arg0: i32) -> (i32, i32, i32) {
    %c0_i32 = arith.constant 0 : i32
    %c0_i32_0 = arith.constant 0 : i32
    %c0_i32_1 = arith.constant 0 : i32
    return %arg0, %c0_i32, %c0_i32_0 : i32, i32, i32
  }
  func.func @transform_31(%arg0: i32) -> (i32, i32, i32) {
    %c0_i32 = arith.constant 0 : i32
    %c0_i32_0 = arith.constant 0 : i32
    %c0_i32_1 = arith.constant 0 : i32
    return %arg0, %c0_i32, %c0_i32_0 : i32, i32, i32
  }
  func.func @transform_32(%arg0: i32) -> (i32, i32, i32) {
    %c0_i32 = arith.constant 0 : i32
    %c0_i32_0 = arith.constant 0 : i32
    %c0_i32_1 = arith.constant 0 : i32
    return %arg0, %c0_i32, %c0_i32_0 : i32, i32, i32
  }
  func.func @transform_33(%arg0: i32) -> (i32, i32, i32) {
    %c0_i32 = arith.constant 0 : i32
    %c0_i32_0 = arith.constant 0 : i32
    %c0_i32_1 = arith.constant 0 : i32
    return %arg0, %c0_i32, %c0_i32_0 : i32, i32, i32
  }
}

</mosaic_0001>

<bundles_post_ra>
// kernel: decoder_forward.1
= control target key start
LH: loop header
LB: loop body
LE: loop exit
PB: predicated region body
PF: predicated region fallthrough
CT: control target
= control target key end

     0   :  { %s7645_s6 = smov 1   ;;  %s7646_s10 = smov 2   ;;  %s9087_s0 = inlined_call_operand.smem [shape: u32[34], index: -1, kind: input, shape index: {}] }
   0x1   :  { %s7702_s5 = sld [smem:[%s9087_s0]]   ;;  %s7647_s14 = smov 3  }
   0x2   :  { %s7707_s9 = sld [smem:[%s9087_s0 + %s7645_s6]]   ;;  %s7648_s18 = smov 4  }
   0x3   :  { %s7712_s13 = sld [smem:[%s9087_s0 + %s7646_s10]]   ;;  %s7649_s22 = smov 5  }
   0x4   :  { %s7717_s17 = sld [smem:[%s9087_s0 + %s7647_s14]]   ;;  %s7650_s26 = smov 6  }
   0x5   :  { %s7722_s21 = sld [smem:[%s9087_s0 + %s7648_s18]]   ;;  %s7651_s30 = smov 7  }
   0x6   :  { %s7727_s25 = sld [smem:[%s9087_s0 + %s7649_s22]]   ;;  %s7652_s4 = smov 8  }
   0x7   :  { %9137 = sst [smem:[#allocation20_spill]] %s7702_s5  ;;  %s7653_s10 = smov 9  }
   0x8   :  { %9138 = sst [smem:[#allocation21_spill]] %s7707_s9  ;;  %s7654_s15 = smov 10  }
   0x9   :  { %9139 = sst [smem:[#allocation22_spill]] %s7712_s13  ;;  %s7655_s20 = smov 11  }
   0xa   :  { %9140 = sst [smem:[#allocation23_spill]] %s7717_s17  ;;  %s7657_s1 = smov 13  }
   0xb   :  { %9141 = sst [smem:[#allocation24_spill]] %s7722_s21  ;;  %s7658_s7 = smov 14  }
   0xc   :  { %9142 = sst [smem:[#allocation25_spill]] %s7727_s25  ;;  %s7660_s22 = smov 16  }
   0xd   :  { %s7732_s29 = sld [smem:[%s9087_s0 + %s7650_s26]]   ;;  %s7656_s26 = smov 12  }
   0xe   :  { %s7737_s3 = sld [smem:[%s9087_s0 + %s7651_s30]]   ;;  %s7661_s28 = smov 17  }
   0xf   :  { %s7742_s8 = sld [smem:[%s9087_s0 + %s7652_s4]]  }
  0x10   :  { %s7747_s14 = sld [smem:[%s9087_s0 + %s7653_s10]]  }
  0x11   :  { %s7752_s19 = sld [smem:[%s9087_s0 + %s7654_s15]]   ;;  %s7659_s15 = smov 15  }
  0x12   :  { %s7757_s24 = sld [smem:[%s9087_s0 + %s7655_s20]]  }
  0x13   :  { %s7762_s30 = sld [smem:[%s9087_s0 + %s7656_s26]]  }
  0x14   :  { %9143 = sst [smem:[#allocation26_spill]] %s7737_s3 }
  0x15   :  { %9144 = sst [smem:[#allocation27_spill]] %s7742_s8 }
  0x16   :  { %9145 = sst [smem:[#allocation28_spill]] %s7747_s14 }
  0x17   :  { %9146 = sst [smem:[#allocation29_spill]] %s7752_s19 }
  0x18   :  { %9147 = sst [smem:[#allocation30_spill]] %s7757_s24 }
  0x19   :  { %s7767_s6 = sld [smem:[%s9087_s0 + %s7657_s1]]  }
  0x1a   :  { %s7772_s12 = sld [smem:[%s9087_s0 + %s7658_s7]]   ;;  %s7662_s7 = smov 18  }
  0x1b   :  { %s7777_s20 = sld [smem:[%s9087_s0 + %s7659_s15]]   ;;  %s7663_s15 = smov 19  }
  0x1c   :  { %s7782_s27 = sld [smem:[%s9087_s0 + %s7660_s22]]   ;;  %s7664_s22 = smov 20  }
  0x1d   :  { %s7787_s4 = sld [smem:[%s9087_s0 + %s7661_s28]]   ;;  %s7665_s28 = smov 21  }
  0x1e   :  { %s7792_s25 = sld [smem:[%s9087_s0 + %s7662_s7]]   ;;  %s7666_s7 = smov 22  }
  0x1f   :  { %9148 = sst [smem:[#allocation31_spill]] %s7767_s6 }
  0x20   :  { %9149 = sst [smem:[#allocation32_spill]] %s7772_s12 }
  0x21   :  { %9150 = sst [smem:[#allocation33_spill]] %s7777_s20 }
  0x22   :  { %s7797_s21 = sld [smem:[%s9087_s0 + %s7663_s15]]   ;;  %s7667_s15 = smov 23  }
  0x23   :  { %9151 = sst [smem:[#allocation34_spill]] %s7787_s4 }
  0x24   :  { %9152 = sst [smem:[#allocation35_spill]] %s7792_s25 }
  0x25   :  { %s7802_s17 = sld [smem:[%s9087_s0 + %s7664_s22]]   ;;  %s7668_s22 = smov 24  }
  0x26   :  { %s7807_s13 = sld [smem:[%s9087_s0 + %s7665_s28]]   ;;  %s7669_s28 = smov 25  }
  0x27   :  { %s7812_s9 = sld [smem:[%s9087_s0 + %s7666_s7]]   ;;  %s7670_s7 = smov 26  }
  0x28   :  { %9153 = sst [smem:[#allocation36_spill]] %s7797_s21 }
  0x29   :  { %s7817_s25 = sld [smem:[%s9087_s0 + %s7667_s15]]   ;;  %s7671_s15 = smov 27  }
  0x2b   :  { %9154 = sst [smem:[#allocation37_spill]] %s7802_s17 }
  0x2c   :  { %9155 = sst [smem:[#allocation38_spill]] %s7807_s13 }
  0x2d   :  { %9156 = sst [smem:[#allocation39_spill]] %s7812_s9 }
  0x2e   :  { %s7822_s17 = sld [smem:[%s9087_s0 + %s7668_s22]]   ;;  %s7672_s22 = smov 28  }
  0x2f   :  { %9157 = sst [smem:[#allocation40_spill]] %s7817_s25 }
  0x30   :  { %s7827_s13 = sld [smem:[%s9087_s0 + %s7669_s28]]   ;;  %s7673_s28 = smov 29  }
  0x31   :  { %s7832_s9 = sld [smem:[%s9087_s0 + %s7670_s7]]   ;;  %s7674_s7 = smov 30  }
  0x32   :  { %s7837_s25 = sld [smem:[%s9087_s0 + %s7671_s15]]   ;;  %s7675_s15 = smov 31  }
  0x34   :  { %9158 = sst [smem:[#allocation41_spill]] %s7822_s17 }
  0x35   :  { %s7842_s17 = sld [smem:[%s9087_s0 + %s7672_s22]]   ;;  %s7676_s22 = smov 32  }
  0x36   :  { %9159 = sst [smem:[#allocation42_spill]] %s7827_s13 }
  0x37   :  { %9160 = sst [smem:[#allocation43_spill]] %s7832_s9 }
  0x38   :  { %9161 = sst [smem:[#allocation44_spill]] %s7837_s25 }
  0x39   :  { %s7847_s13 = sld [smem:[%s9087_s0 + %s7673_s28]]   ;;  %s7677_s28 = smov 33  }
  0x3a   :  { %s7852_s9 = sld [smem:[%s9087_s0 + %s7674_s7]]  }
  0x3b   :  { %9162 = sst [smem:[#allocation45_spill]] %s7842_s17 }
  0x3c   :  { %s7857_s25 = sld [smem:[%s9087_s0 + %s7675_s15]]  }
  0x3d   :  { %s7862_s17 = sld [smem:[%s9087_s0 + %s7676_s22]]  }
  0x3f   :  { %9163 = sst [smem:[#allocation46_spill]] %s7847_s13 }
  0x40   :  { %s7867_s13 = sld [smem:[%s9087_s0 + %s7677_s28]]  }
  0x42   :  { %9164 = sst [smem:[#allocation47_spill]] %s7857_s25 }
  0x43   :  { %73 = vsyncpa [#allocation3], 0 }
  0x44   :  { %75 = vsyncpa [#allocation3 + $0x1], 0 }
  0x45   :  { %76 = vsyncpa [#allocation5], 0 }
  0x46   :  { %78 = vsyncpa [#allocation5 + $0x1], 0 }
  0x47   :  { %79 = vsyncpa [#allocation8], 0 }
  0x48   :  { %81 = vsyncpa [#allocation8 + $0x1], 0 }
  0x49   :  { %82 = vsyncpa [#allocation11], 0 }
  0x4a   :  { %84 = vsyncpa [#allocation11 + $0x1], 0 }
  0x4b   :  { %85 = vsyncpa [#allocation14], 0 }
  0x4c   :  { %87 = vsyncpa [#allocation14 + $0x1], 0  ;;  %s7869_s7 = smov 0   ;;  %s7871_s10 = smov 0  }
  0x4d   :  { %s7873_s11 = smov 0   ;;  %s7875_s15 = smov 0  }
  0x4e LB: > { %s9165_s25 = sld [smem:[#allocation47_spill]]  ;;  %s7890_s0 = sadd.s32 4294967295, %s7643_s15   ;;  %s7639_s11 = sphi %s7873_s11, %s9328_s11   ;;  %s7635_s10 = sphi %s7871_s10, %s9327_s10   ;;  %s7631_s7 = sphi %s7869_s7, %s9326_s7   ;;  %s7643_s15 = sphi %s7875_s15, %s9325_s15  }
  0x4f   : > { %s9166_s24 = sld [smem:[#allocation30_spill]]  ;;  %s9093_s16 = sadd.s32 4294967294, %s7643_s15  }
  0x50   : > { %s9167_s21 = sld [smem:[#allocation36_spill]]  ;;  %s7894_s18 = sadd.s32 1, %s7643_s15  }
  0x51   : > { %s9168_s20 = sld [smem:[#allocation33_spill]]  ;;  %s676_s22 = sadd.s32 1, %s7639_s11 }
  0x52   : > { %s9169_s19 = sld [smem:[#allocation29_spill]]  ;;  %s673_s23 = ssub.s32 %s7643_s15, %s7894_s18 }
  0x53   : > { %s9170_s14 = sld [smem:[#allocation28_spill]]  ;;  %p686_p0 = scmp.ne.s32.totalorder %s7639_s11, %s7635_s10 }
  0x54   : > { %s9171_s12 = sld [smem:[#allocation32_spill]]  ;;  %p674_p1 = scmp.eq.s32.totalorder %s673_s23, 0 }
  0x55   : > { %s9172_s8 = sld [smem:[#allocation27_spill]]  ;;  %p687_p2 = scmp.eq.s32.totalorder %s7890_s0, 1 }
  0x56   : > { %s9173_s6 = sld [smem:[#allocation31_spill]]  ;;  %p692_p3 = scmp.ne.s32.totalorder %s7635_s10, %s7631_s7 }
  0x57   : > { %s9174_s3 = sld [smem:[#allocation26_spill]]  ;;  %p693_p4 = scmp.eq.s32.totalorder %s9093_s16, 1 }
  0x58   : > { %s9175_s4 = sld [smem:[#allocation34_spill]]  ;;  %p7909_p5 = por %p687_p2, %p686_p0 }
  0x59   : > { %9176 = sst [smem:[#allocation48_spill]] %s7635_s10  ;;  %p7913_p6 = por %p693_p4, %p692_p3 }
  0x5a   : > { %9177 = sst [smem:[#allocation49_spill]] %s7639_s11  ;;  %p6090_p7 = scmp.ge.s32.totalorder %s7643_s15, 1 }
  0x5b   : > { %9178 = sst [smem:[#allocation50_spill]] %s7894_s18  ;;  %p996_p8 = scmp.lt.s32.totalorder %s7643_s15, 3 }
  0x5c   : > { %s7907_s26 = scalar_select %p674_p1, %s7639_s11, %s676_s22  }
  0x5d   : > { %s9181_s1 = scalar_select %p7913_p6, 1, 0 }
  0x5e   : > { %9179 = sst [smem:[#allocation51_spill]] %s7907_s26  ;;  %p997_p9 = pnand %p6090_p7, %p996_p8 }
  0x5f   : > { %9182 = sst [smem:[#allocation52_spill]] %s9181_s1  ;;  %p1135_p10 = scmp.lt.s32.totalorder (!%p997_p9), %s7890_s0, 1 }
  0x60   : > { %1000 = sbr.rel (%p997_p9) target bundleno = 12845 (0x322d), region = 124  ;;  %s9183_s5 = sld [smem:[#allocation20_spill]] (!%p997_p9) }
  0x61   : > { %s9096_s16 = smov (!%p997_p9), 1   ;;  %s9189_s11 = smov (!%p997_p9), 127  }
  0x62   : > { %s9120_s1 = smov (!%p997_p9), 64  }
  0x65   : > { %v1161_v0 = vlaneseq  ;;  %v7678_v1 = vmov 0.0   ;;  %vm9111_vm0 = vmmov 0   ;;  %s7928_s2 = scalar_select %p1135_p10, %s7890_s0, 1  ;;  %vm1224_vm2 = vcmask 1043456   ;;  %v1314_v11 = vld [vmem:[%s9174_s3] sm:$0xff] }
  0x66   : > { %6571 = vmatprep.subr.mxu1 %v7678_v1  ;;  %6573 = vmatprep.mubr.msk.f32.mxu1 %vm9111_vm0, %v7678_v1  ;;  %vm9109_vm4 = vcmask 64512   ;;  %v9184_v8 = vmov 0  ;;  %v7680_v10 = vmov 1.0   ;;  %v7681_v13 = vmov 0   ;;  %v1376_v15 = vld [vmem:[%s9170_s14] sm:$0xf] }
  0x67   : > { %v7923_v2 = vshrl.u32 %v1161_v0, 7  ;;  %v7925_v3 = vand.u32 127, %v1161_v0  ;;  %6584 = vmatprep.subr.bf16.mxu0 %v7678_v1  ;;  %6586 = vmatprep.mubr.msk.bf16.mxu0 %vm9111_vm0, %v7678_v1  ;;  %s7935_s22 = sshll.u32 %s7928_s2, 2  ;;  %vm1309_vm6 = vcmask 121856   ;;  %vm9108_vm7 = vcmask 7168   ;;  %v1526_v50 = vld [vmem:[%s9173_s6] sm:$0xff] }
  0x68   : > { %s1138_s23 = scalar_lea.vmem %s9183_s5, %s7935_s22  ;;  %7026 = vset.pattern.permute.xlu1 %v7681_v13  ;;  %7027 = vset.pattern.permute.xlu0 %v7681_v13  ;;  %vm6108_vm8 = vmneg %vm9108_vm7  ;;  %vm7684_vm9 = vmmov 1   ;;  %v1313_v23 = vld [vmem:[%s7732_s29] sm:$0xf]  ;;  %vm9110_vm11 = vcmask 195584   ;;  %vm9107_vm12 = vcmask 1045504   ;;  %vm9106_vm13 = vcmask 97280  }
  0x69   : > { %v1172_v4 = vmul.u32 2, %v7923_v2  ;;  %v1220_v6 = vld [vmem:[%s1138_s23] sm:$0xf]  ;;  %s9094_s23 = smov 127   ;;  %1317 = vperm.xlu1 %7026, %v1314_v11   ;;  %vm7963_vm10 = vmpackc.low %vm7684_vm9, %vm6108_vm8  ;;  %vm1510_vm14 = vcmask 125952   ;;  %s9188_s5 = smov 1  }
  0x6a   : > { %v1222_v7 = vrot.slane %v1220_v6, 4  ;;  %v1374_v37 = vld [vmem:[%s9172_s8] sm:$0x3]  ;;  %vm9104_vm15 = vcmask 1041408   ;;  %vm1788_vm9 = vcmask 130048  }
  0x6b   : > { %vm1180_vm1 = vcmp.eq.s32.totalorder %v7925_v3, %v1172_v4  ;;  %v1188_v5 = vadd.s32 1, %v1172_v4  ;;  %v1449_v49 = vld [vmem:[%s9166_s24] sm:$0xf] }
  0x6c   : > { %v1225_v9 = vsel %vm1224_vm2, 0.0, %v1222_v7  ;;  %v1448_v59 = vld [vmem:[%s9169_s19] sm:$0x3] }
  0x6d   : > { %vm1196_vm3 = vcmp.eq.s32.totalorder %v7925_v3, %v1188_v5  ;;  %1379 = vperm.xlu1 %7026, %v1376_v15  }
  0x6e   : > { %vm7941_vm5 = vmor %vm1180_vm1, %vm1196_vm3  ;;  %vm9103_vm1 = vcmask 31744  }
  0x6f   : > { %v9185_v8 = vsel %vm7941_vm5, 4294967295, %v9184_v8  ;;  %6572 = vmatpush3.msk.msra.mxu1 %vm7941_vm5, %v7680_v10 }
  0x70   : > { %6574 = vmatmul.mubr.msk.f32.vlgmr.msra.gmra.mxu1 %vm9109_vm4, %v1225_v9  ;;  %6576 = vmatprep.subr.bf16.mxu1 %v7678_v1 }
  0x71   : > { %6580 = vmatprep.mubr.msk.bf16.mxu1 %vm9111_vm0, %v7678_v1 }
  0xe4   : > { %v1318_v24 = vpop.permute.xlu1 %1317 }
  0xe8   : > { %v1380_v38 = vpop.permute.xlu1 %1379 }
 0x130   : > { %v1296_v12 = vpop.f32.mrf.mxu1 }
 0x131   : > { %1306 = vrot.lane.b32.xlu0 %v1296_v12, %s9094_s23 }
 0x132   : > { %v6575_v14 = vpop.f32.mrf.mxu1 }
 0x135   : > { %1301 = vrot.lane.b32.xlu0 %v1296_v12, %s9096_s16 }
 0x1a3   : > { %v1307_v16 = vpop.permute.xlu0 %1306 }
 0x1a4   : > { %v1310_v17 = vsel %vm1309_vm6, %v1307_v16, 0.0 }
 0x1a5   : > { %v1312_v18 = vpack.c.bf16 %v1310_v17, %v1310_v17 }
 0x1a7   : > { %v1302_v19 = vpop.permute.xlu0 %1301  ;;  %v1325_v20 = vsel %vm1224_vm2, %v1312_v18, 0 }
 0x1a8   : > { %6577 = vmatpush3.bf16.msra.mxu1 %v1325_v20  ;;  %v6110_v22 = vpack.c.bf16 %v1296_v12, %v1302_v19 }
 0x1a9   : > { %6578 = vmatprep.subr.bf16.mxu1 %v7678_v1 }
 0x1ac   : > { %6579 = vmatpush3.bf16.msk.msra.mxu1 %vm7963_vm10, %v6110_v22  ;;  %v1525_v22 = vld [vmem:[%s7762_s30] sm:$0xf] }
 0x1ad   : > { %6596 = vmatprep.subr.bf16.mxu1 %v7678_v1 }
 0x1af   : > { %6581 = vmatmul.mubr.msk.bf16.vlgmr.msra.gmra.mxu1 %vm9110_vm11, %v1313_v23 }
 0x1b0   : > { %6598 = vmatprep.mubr.msk.bf16.mxu1 %vm9111_vm0, %v7678_v1 }
 0x26f   : > { %v1361_v25 = vpop.f32.mrf.mxu1 }
 0x270   : > { %v1362_v26 = vadd.f32 %v1361_v25, %v1318_v24 }
 0x271   : > { %v6582_v27 = vpop.f32.mrf.mxu1 }
 0x272   : > { %v6113_v28 = vmul.f32 -1.442695, %v1362_v26 }
 0x273   : > { %v1364_v29 = vpop.f32.mrf.mxu1 }
 0x274   : > { %7149 = vpow2.f32 %v6113_v28 }
 0x275   : > { %v6583_v30 = vpop.f32.mrf.mxu1 }
 0x281   : > { %v7150_v31 = vpop.eup %7149 }
 0x282   : > { %v1370_v32 = vadd.f32 1.0, %v7150_v31 }
 0x284   : > { %7151 = vrcp.f32 %v1370_v32 }
 0x291   : > { %v7152_v33 = vpop.eup %7151 }
 0x292   : > { %v1373_v34 = vmul.f32 %v7152_v33, %v1362_v26 }
 0x294   : > { %v1375_v35 = vpack.c.bf16 %v1373_v34, %v1373_v34  ;;  %v1726_v34 = vld [vmem:[%s9167_s21] sm:$0xf] }
 0x296   : > { %v1386_v36 = vsel %vm1224_vm2, %v1375_v35, 0  ;;  %v1597_v35 = vld [vmem:[%s9168_s20] sm:$0xff] }
 0x297   : > { %6585 = vmatpush3.bf16.msra.mxu0 %v1386_v36  ;;  %v1670_v36 = vld [vmem:[%s9175_s4] sm:$0xf] }
 0x298   : > { %6590 = vmatprep.subr.bf16.mxu0 %v7678_v1 }
 0x29a   : > { %6587 = vmatmul.mubr.msk.bf16.vlgmr.msra.gmra.mxu0 %vm9109_vm4, %v1374_v37 }
 0x29b   : > { %6592 = vmatprep.mubr.msk.bf16.mxu0 %vm9111_vm0, %v7678_v1 }
 0x35a   : > { %v1422_v39 = vpop.f32.mrf.mxu0 }
 0x35b   : > { %v1423_v40 = vadd.f32 %v1422_v39, %v1380_v38 }
 0x35c   : > { %v6588_v41 = vpop.f32.mrf.mxu0 }
 0x35d   : > { %v6115_v42 = vmul.f32 -1.442695, %v1423_v40 }
 0x35e   : > { %v1425_v43 = vpop.f32.mrf.mxu0 }
 0x35f   : > { %7153 = vpow2.f32 %v6115_v42  ;;  %v1596_v43 = vld [vmem:[%s9171_s12] sm:$0xf] }
 0x360   : > { %v6589_v44 = vpop.f32.mrf.mxu0 }
 0x36c   : > { %v7154_v45 = vpop.eup %7153 }
 0x36d   : > { %v1431_v46 = vadd.f32 1.0, %v7154_v45 }
 0x36f   : > { %7155 = vrcp.f32 %v1431_v46 }
 0x37c   : > { %v7156_v47 = vpop.eup %7155 }
 0x37d   : > { %v1434_v48 = vmul.f32 %v7156_v47, %v1423_v40 }
 0x37f   : > { %1440 = vrot.lane.b32.xlu1 %v1434_v48, %s9094_s23  ;;  %1436 = vrot.lane.b32.xlu0 %v1434_v48, %s9096_s16  ;;  %v1444_v51 = vrot.slane %v1434_v48, 4  ;;  %s7994_s23 = sand.u32 1, %s7635_s10   ;;  %s9193_s10 = sld [smem:[#allocation21_spill]] }
 0x380   : > { %s7997_s16 = sshll.u32 %s7994_s23, 2 }
 0x381   : > { %s9099_s26 = scalar_lea.vmem [#allocation2], %s7997_s16 }
 0x383   : > { %1452 = vperm.xlu0 %7027, %v1449_v49  }
 0x385   : > { %s1142_s18 = scalar_lea.vmem %s9193_s10, %s7935_s22  ;;  %s9105_s10 = scalar_lea.vmem [#allocation4], %s7997_s16 }
 0x387   : > { %1529 = vperm.xlu0 %7027, %v1526_v50  }
 0x3f1   : > { %v1441_v52 = vpop.permute.xlu1 %1440  ;;  %v1437_v53 = vpop.permute.xlu0 %1436 }
 0x3f2   : > { %v1443_v54 = vsel %vm1309_vm6, %v1441_v52, 0.0  ;;  %v1439_v55 = vsel %vm9108_vm7, 0.0, %v1437_v53 }
 0x3f3   : > { %v1446_v56 = vsel %vm1224_vm2, %v1439_v55, %v1444_v51 }
 0x3f4   : > { %v1447_v57 = vpack.c.bf16 %v1443_v54, %v1446_v56 }
 0x3f6   : > { %v1461_v58 = vsel %vm9107_vm12, %v1447_v57, 0 }
 0x3f7   : > { %6591 = vmatpush3.bf16.msra.mxu0 %v1461_v58 }
 0x3f8   : > { %6602 = vmatprep.subr.bf16.mxu0 %v7678_v1 }
 0x3fa   : > { %6593 = vmatmul.mubr.msk.bf16.vlgmr.msra.gmra.mxu0 %vm9106_vm13, %v1448_v59 }
 0x3fb   : > { %6606 = vmatprep.mubr.msk.bf16.mxu0 %vm9111_vm0, %v7678_v1 }
 0x3fe   : > { %v1453_v60 = vpop.permute.xlu0 %1452 }
 0x402   : > { %v1530_v23 = vpop.permute.xlu0 %1529 }
 0x4ba   : > { %v1497_v61 = vpop.f32.mrf.mxu0 }
 0x4bb   : > { %v1498_v62 = vadd.f32 %v1497_v61, %v1453_v60 }
 0x4bc   : > { %v6594_v63 = vpop.f32.mrf.mxu0 }
 0x4bd   : > { %v6117_v0 = vmul.f32 -1.442695, %v1498_v62 }
 0x4be   : > { %v1500_v4 = vpop.f32.mrf.mxu0 }
 0x4bf   : > { %7157 = vpow2.f32 %v6117_v0 }
 0x4c0   : > { %v6595_v5 = vpop.f32.mrf.mxu0 }
 0x4c1   : > { %v1668_v5 = vld [vmem:[%s7782_s27] sm:$0x3] }
 0x4cc   : > { %v7158_v6 = vpop.eup %7157 }
 0x4cd   : > { %v1506_v7 = vadd.f32 1.0, %v7158_v6 }
 0x4cf   : > { %7159 = vrcp.f32 %v1506_v7 }
 0x4dc   : > { %v7160_v9 = vpop.eup %7159 }
 0x4dd   : > { %v7999_v11 = vmul.f32 %v7160_v9, %v1498_v62  ;;  %v1163_v9 = vadd.s32 8, %v7923_v2 }
 0x4df   : > { %1513 = vrot.lane.b32.xlu1 %v7999_v11, %s9188_s5  ;;  %1511 = vst.msk [vmem:[%s9099_s26] sm:$0xf] %vm1510_vm14, %v7999_v11  ;;  %v1521_v15 = vrot.slane %v7999_v11, 4  ;;  %s9190_s26 = sld [smem:[#allocation35_spill]]  ;;  %vm1870_vm14 = vcmask 252928  }
 0x4e3   : > { %1517 = vrot.lane.b32.xlu1 %v7999_v11, %s9189_s11 }
 0x4e5   : > { %v1724_v7 = vld [vmem:[%s9190_s26] sm:$0x3] }
 0x551   : > { %v1514_v12 = vpop.permute.xlu1 %1513 }
 0x552   : > { %v1516_v14 = vsel %vm9108_vm7, 0.0, %v1514_v12  ;;  %v1173_v12 = vmul.u32 2, %v1163_v9 }
 0x553   : > { %v1523_v18 = vsel %vm1224_vm2, %v1516_v14, %v1521_v15 }
 0x554   : > { %vm1181_vm3 = vcmp.eq.s32.totalorder %v7925_v3, %v1173_v12  ;;  %v1189_v14 = vadd.s32 1, %v1173_v12 }
 0x555   : > { %v1518_v16 = vpop.permute.xlu1 %1517 }
 0x556   : > { %v1520_v17 = vsel %vm1309_vm6, %v1518_v16, 0.0 }
 0x557   : > { %v1524_v19 = vpack.c.bf16 %v1520_v17, %v1523_v18 }
 0x559   : > { %v1536_v20 = vsel %vm9107_vm12, %v1524_v19, 0 }
 0x55a   : > { %6597 = vmatpush3.bf16.msra.mxu1 %v1536_v20 }
 0x55b   : > { %6610 = vmatprep.subr.bf16.mxu1 %v7678_v1 }
 0x55d   : > { %6599 = vmatmul.mubr.msk.bf16.vlgmr.msra.gmra.mxu1 %vm9106_vm13, %v1525_v22 }
 0x55e   : > { %6612 = vmatprep.mubr.msk.bf16.mxu1 %vm9111_vm0, %v7678_v1 }
 0x61d   : > { %v1572_v24 = vpop.f32.mrf.mxu1 }
 0x61e   : > { %v1573_v25 = vadd.f32 %v1572_v24, %v1530_v23 }
 0x61f   : > { %v6600_v26 = vpop.f32.mrf.mxu1 }
 0x620   : > { %v6119_v27 = vmul.f32 -1.442695, %v1573_v25 }
 0x621   : > { %v1575_v28 = vpop.f32.mrf.mxu1 }
 0x622   : > { %7161 = vpow2.f32 %v6119_v27 }
 0x623   : > { %v6601_v29 = vpop.f32.mrf.mxu1 }
 0x624   : > { %v1781_v29 = vld [vmem:[%s1142_s18] sm:$0xf]  ;;  %s9198_s18 = sld [smem:[#allocation22_spill]] }
 0x62f   : > { %v7162_v30 = vpop.eup %7161 }
 0x630   : > { %v1581_v31 = vadd.f32 1.0, %v7162_v30 }
 0x632   : > { %7163 = vrcp.f32 %v1581_v31 }
 0x63f   : > { %v7164_v32 = vpop.eup %7163 }
 0x640   : > { %v1584_v33 = vmul.f32 %v7164_v32, %v1573_v25 }
 0x642   : > { %1586 = vrot.lane.b32.xlu0 %v1584_v33, %s9188_s5  ;;  %1590 = vrot.lane.b32.xlu1 %v1584_v33, %s9189_s11 }
 0x646   : > { %1729 = vperm.xlu0 %7027, %v1726_v34   ;;  %1600 = vperm.xlu1 %7026, %v1597_v35  }
 0x64a   : > { %1673 = vperm.xlu1 %7026, %v1670_v36  }
 0x6b4   : > { %v1591_v37 = vpop.permute.xlu1 %1590  ;;  %v1587_v40 = vpop.permute.xlu0 %1586 }
 0x6b5   : > { %v1593_v38 = vsel %vm1309_vm6, %v1591_v37, 0.0  ;;  %v6122_v42 = vpack.c.bf16 %v1584_v33, %v1587_v40  ;;  %vm1197_vm6 = vcmp.eq.s32.totalorder %v7925_v3, %v1189_v14  ;;  %v6133_v40 = vld [vmem:[%s9174_s3 + $0x8] sm:$0xff] }
 0x6b6   : > { %v1595_v39 = vpack.c.bf16 %v1593_v38, %v1593_v38  ;;  %vm8051_vm8 = vmor %vm1181_vm3, %vm1197_vm6  ;;  %vm2074_vm3 = vcmask 257024  }
 0x6b8   : > { %v1607_v41 = vsel %vm1224_vm2, %v1595_v39, 0  ;;  %v6141_v39 = vld [vmem:[%s9170_s14 + $0x4] sm:$0xf] }
 0x6b9   : > { %6603 = vmatpush3.bf16.msra.mxu0 %v1607_v41 }
 0x6ba   : > { %6604 = vmatprep.subr.bf16.mxu0 %v7678_v1 }
 0x6bd   : > { %6605 = vmatpush3.bf16.msk.msra.mxu0 %vm7963_vm10, %v6122_v42 }
 0x6be   : > { %6616 = vmatprep.subr.bf16.mxu0 %v7678_v1 }
 0x6c0   : > { %6607 = vmatmul.mubr.msk.bf16.vlgmr.msra.gmra.mxu0 %vm9110_vm11, %v1596_v43 }
 0x6c1   : > { %6618 = vmatprep.mubr.msk.bf16.mxu0 %vm9111_vm0, %v7678_v1  ;;  %v1601_v44 = vpop.permute.xlu1 %1600  ;;  %v1730_v17 = vpop.permute.xlu0 %1729 }
 0x6c5   : > { %v1674_v31 = vpop.permute.xlu1 %1673 }
 0x780   : > { %v1643_v45 = vpop.f32.mrf.mxu0 }
 0x781   : > { %v1644_v46 = vadd.f32 %v1643_v45, %v1601_v44 }
 0x782   : > { %v6608_v47 = vpop.f32.mrf.mxu0 }
 0x783   : > { %v1649_v48 = vadd.f32 %v1644_v46, %v7999_v11  ;;  %v1658_v49 = vrot.slane %v1644_v46, 4  ;;  %v6132_v46 = vld [vmem:[%s7732_s29 + $0x4] sm:$0xf] }
 0x784   : > { %v1646_v50 = vpop.f32.mrf.mxu0 }
 0x785   : > { %v6125_v51 = vmul.f32 -1.442695, %v1649_v48  ;;  %v1660_v52 = vadd.f32 %v1658_v49, %v7999_v11 }
 0x786   : > { %v6609_v53 = vpop.f32.mrf.mxu0 }
 0x787   : > { %7165 = vpow2.f32 %v6125_v51  ;;  %v6126_v54 = vmul.f32 -1.442695, %v1660_v52 }
 0x789   : > { %7167 = vpow2.f32 %v6126_v54 }
 0x794   : > { %v7166_v55 = vpop.eup %7165 }
 0x795   : > { %v1653_v56 = vadd.f32 1.0, %v7166_v55 }
 0x796   : > { %v7168_v57 = vpop.eup %7167 }
 0x797   : > { %7169 = vrcp.f32 %v1653_v56  ;;  %v1664_v58 = vadd.f32 1.0, %v7168_v57 }
 0x799   : > { %7171 = vrcp.f32 %v1664_v58 }
 0x7a4   : > { %v7170_v59 = vpop.eup %7169 }
 0x7a5   : > { %v1656_v60 = vmul.f32 %v7170_v59, %v1649_v48 }
 0x7a6   : > { %v7172_v61 = vpop.eup %7171 }
 0x7a7   : > { %v1669_v62 = vpack.c.bf16 %v1656_v60, %v1656_v60  ;;  %v1667_v63 = vmul.f32 %v7172_v61, %v1660_v52  ;;  %v6140_v60 = vld [vmem:[%s9172_s8 + $0x2] sm:$0x3] }
 0x7a9   : > { %v1682_v0 = vsel %vm9104_vm15, %v1669_v62, 0  ;;  %v1725_v4 = vpack.c.bf16 %v1667_v63, %v1667_v63 }
 0x7aa   : > { %6611 = vmatpush3.bf16.msra.mxu1 %v1682_v0 }
 0x7ab   : > { %v1736_v6 = vsel %vm9104_vm15, %v1725_v4, 0  ;;  %6622 = vmatprep.subr.mxu1 %v7678_v1 }
 0x7ac   : > { %6617 = vmatpush3.bf16.msra.mxu0 %v1736_v6 }
 0x7ad   : > { %6613 = vmatmul.mubr.msk.bf16.vlgmr.msra.gmra.mxu1 %vm9103_vm1, %v1668_v5  ;;  %6629 = vmatprep.subr.bf16.mxu0 %v7678_v1 }
 0x7ae   : > { %6626 = vmatprep.mubr.msk.f32.mxu1 %vm9111_vm0, %v7678_v1  ;;  %6623 = vmatpush3.msk.msra.mxu1 %vm8051_vm8, %v7680_v10 }
 0x7af   : > { %6619 = vmatmul.mubr.msk.bf16.vlgmr.msra.gmra.mxu0 %vm9103_vm1, %v1724_v7  ;;  %6624 = vmatprep.subr.mxu1 %v7678_v1 }
 0x7b0   : > { %6633 = vmatprep.mubr.msk.bf16.mxu0 %vm9111_vm0, %v7678_v1  ;;  %6625 = vmatpush3.msk.msra.mxu1 %vm7941_vm5, %v7680_v10 }
 0x7b1   : > { %6637 = vmatprep.subr.bf16.mxu1 %v7678_v1 }
 0x86d   : > { %v1718_v16 = vpop.f32.mrf.mxu1 }
 0x86e   : > { %v1719_v32 = vadd.f32 %v1718_v16, %v1674_v31  ;;  %v6145_v16 = vld [vmem:[%s9166_s24 + $0x4] sm:$0xf] }
 0x86f   : > { %v1772_v18 = vpop.f32.mrf.mxu0  ;;  %v6614_v19 = vpop.f32.mrf.mxu1 }
 0x870   : > { %v1773_v20 = vadd.f32 %v1772_v18, %v1730_v17 }
 0x871   : > { %v6620_v22 = vpop.f32.mrf.mxu0  ;;  %v1721_v23 = vpop.f32.mrf.mxu1 }
 0x872   : > { %v1778_v24 = vmul.f32 0.5, %v1773_v20 }
 0x873   : > { %v1775_v25 = vpop.f32.mrf.mxu0  ;;  %v6615_v26 = vpop.f32.mrf.mxu1 }
 0x874   : > { %v1779_v27 = vmul.f32 1.442695, %v1778_v24  ;;  %v6144_v26 = vld [vmem:[%s9169_s19 + $0x2] sm:$0x3] }
 0x875   : > { %v6621_v28 = vpop.f32.mrf.mxu0 }
 0x876   : > { %7173 = vpow2.f32 %v1779_v27 }
 0x883   : > { %v7174_v30 = vpop.eup %7173 }
 0x884   : > { %v1782_v33 = vmul.f32 %v7174_v30, %v1781_v29 }
 0x886   : > { %v1783_v34 = vadd.f32 %v1782_v33, %v1719_v32 }
 0x888   : > { %v1785_v35 = vrot.slane %v1783_v34, 4 }
 0x88a   : > { %v1787_v36 = vsel %vm1224_vm2, %v7999_v11, %v1785_v35 }
 0x88b   : > { %6627 = vmatmul.mubr.msk.f32.vlgmr.msra.gmra.mxu1 %vm1788_vm9, %v1787_v36 }
 0x88c   : > { %6639 = vmatprep.mubr.msk.bf16.mxu1 %vm9111_vm0, %v7678_v1 }
 0x94b   : > { %v1858_v37 = vpop.f32.mrf.mxu1 }
 0x94c   : > { %1863 = vrot.lane.b32.xlu1 %v1858_v37, %s9188_s5  ;;  %1867 = vrot.lane.b32.xlu0 %v1858_v37, %s9189_s11 }
 0x94d   : > { %v6628_v38 = vpop.f32.mrf.mxu1 }
 0x94e   : > { %v6149_v38 = vld [vmem:[%s9173_s6 + $0x8] sm:$0xff] }
 0x950   : > { %1943 = vperm.xlu1 %7026, %v6141_v39   ;;  %1880 = vperm.xlu0 %7027, %v6133_v40  }
 0x9be   : > { %v1868_v41 = vpop.permute.xlu0 %1867  ;;  %v1864_v43 = vpop.permute.xlu1 %1863 }
 0x9bf   : > { %v1871_v42 = vsel %vm1870_vm14, %v1868_v41, 0.0  ;;  %v6136_v45 = vpack.c.bf16 %v1858_v37, %v1864_v43 }
 0x9c0   : > { %v1873_v11 = vpack.c.bf16 %v1871_v42, %v1871_v42 }
 0x9c2   : > { %v1887_v44 = vsel %vm1224_vm2, %v1873_v11, 0 }
 0x9c3   : > { %6630 = vmatpush3.bf16.msra.mxu0 %v1887_v44 }
 0x9c4   : > { %6631 = vmatprep.subr.bf16.mxu0 %v7678_v1 }
 0x9c7   : > { %6632 = vmatpush3.bf16.msk.msra.mxu0 %vm7963_vm10, %v6136_v45 }
 0x9c8   : > { %6649 = vmatprep.subr.bf16.mxu0 %v7678_v1 }
 0x9ca   : > { %6634 = vmatmul.mubr.msk.bf16.vlgmr.msra.gmra.mxu0 %vm9110_vm11, %v6132_v46  ;;  %v6148_v46 = vld [vmem:[%s7762_s30 + $0x4] sm:$0xf] }
 0x9cb   : > { %6651 = vmatprep.mubr.msk.bf16.mxu0 %vm9111_vm0, %v7678_v1  ;;  %v1881_v47 = vpop.permute.xlu0 %1880  ;;  %v1944_v61 = vpop.permute.xlu1 %1943 }
 0xa8a   : > { %v1923_v48 = vpop.f32.mrf.mxu0 }
 0xa8b   : > { %v1924_v49 = vadd.f32 %v1923_v48, %v1881_v47 }
 0xa8c   : > { %v6635_v50 = vpop.f32.mrf.mxu0 }
 0xa8d   : > { %v6139_v51 = vmul.f32 -1.442695, %v1924_v49 }
 0xa8e   : > { %v1926_v52 = vpop.f32.mrf.mxu0 }
 0xa8f   : > { %7175 = vpow2.f32 %v6139_v51 }
 0xa90   : > { %v6636_v53 = vpop.f32.mrf.mxu0 }
 0xa9c   : > { %v7176_v54 = vpop.eup %7175 }
 0xa9d   : > { %v1932_v55 = vadd.f32 1.0, %v7176_v54 }
 0xa9f   : > { %7177 = vrcp.f32 %v1932_v55 }
 0xaac   : > { %v7178_v56 = vpop.eup %7177 }
 0xaad   : > { %v1935_v57 = vmul.f32 %v7178_v56, %v1924_v49 }
 0xaaf   : > { %v1938_v58 = vpack.c.bf16 %v1935_v57, %v1935_v57 }
 0xab1   : > { %v1950_v59 = vsel %vm1224_vm2, %v1938_v58, 0  ;;  %v6165_v58 = vld [vmem:[%s9167_s21 + $0x4] sm:$0xf] }
 0xab2   : > { %6638 = vmatpush3.bf16.msra.mxu1 %v1950_v59  ;;  %v6153_v59 = vld [vmem:[%s9168_s20 + $0x8] sm:$0xff] }
 0xab3   : > { %6643 = vmatprep.subr.bf16.mxu1 %v7678_v1 }
 0xab5   : > { %6640 = vmatmul.mubr.msk.bf16.vlgmr.msra.gmra.mxu1 %vm9109_vm4, %v6140_v60  ;;  %v6162_v60 = vld [vmem:[%s9175_s4 + $0x4] sm:$0xf] }
 0xab6   : > { %6645 = vmatprep.mubr.msk.bf16.mxu1 %vm9111_vm0, %v7678_v1 }
 0xb75   : > { %v1986_v62 = vpop.f32.mrf.mxu1 }
 0xb76   : > { %v1987_v63 = vadd.f32 %v1986_v62, %v1944_v61 }
 0xb77   : > { %v6641_v0 = vpop.f32.mrf.mxu1 }
 0xb78   : > { %v6143_v4 = vmul.f32 -1.442695, %v1987_v63 }
 0xb79   : > { %v1989_v5 = vpop.f32.mrf.mxu1 }
 0xb7a   : > { %7179 = vpow2.f32 %v6143_v4 }
 0xb7b   : > { %v6642_v6 = vpop.f32.mrf.mxu1 }
 0xb7c   : > { %v6152_v6 = vld [vmem:[%s9171_s12 + $0x4] sm:$0xf] }
 0xb87   : > { %v7180_v7 = vpop.eup %7179 }
 0xb88   : > { %v1995_v9 = vadd.f32 1.0, %v7180_v7 }
 0xb8a   : > { %7181 = vrcp.f32 %v1995_v9 }
 0xb97   : > { %v7182_v12 = vpop.eup %7181 }
 0xb98   : > { %v1998_v14 = vmul.f32 %v7182_v12, %v1987_v63 }
 0xb9a   : > { %2004 = vrot.lane.b32.xlu1 %v1998_v14, %s9189_s11  ;;  %2000 = vrot.lane.b32.xlu0 %v1998_v14, %s9188_s5  ;;  %v2008_v17 = vrot.slane %v1998_v14, 4 }
 0xb9e   : > { %2018 = vperm.xlu0 %7027, %v6145_v16  }
 0xc0c   : > { %v2005_v18 = vpop.permute.xlu1 %2004  ;;  %v2001_v19 = vpop.permute.xlu0 %2000 }
 0xc0d   : > { %v2007_v20 = vsel %vm1870_vm14, %v2005_v18, 0.0  ;;  %v2003_v22 = vsel %vm9108_vm7, 0.0, %v2001_v19 }
 0xc0e   : > { %v2010_v23 = vsel %vm1224_vm2, %v2003_v22, %v2008_v17 }
 0xc0f   : > { %v2011_v24 = vpack.c.bf16 %v2007_v20, %v2010_v23 }
 0xc11   : > { %v2025_v25 = vsel %vm9107_vm12, %v2011_v24, 0 }
 0xc12   : > { %6644 = vmatpush3.bf16.msra.mxu1 %v2025_v25 }
 0xc13   : > { %6655 = vmatprep.subr.bf16.mxu1 %v7678_v1 }
 0xc15   : > { %6646 = vmatmul.mubr.msk.bf16.vlgmr.msra.gmra.mxu1 %vm9106_vm13, %v6144_v26 }
 0xc16   : > { %6659 = vmatprep.mubr.msk.bf16.mxu1 %vm9111_vm0, %v7678_v1 }
 0xc19   : > { %v2019_v27 = vpop.permute.xlu0 %2018 }
 0xcd5   : > { %v2061_v28 = vpop.f32.mrf.mxu1 }
 0xcd6   : > { %v2062_v29 = vadd.f32 %v2061_v28, %v2019_v27 }
 0xcd7   : > { %v6647_v30 = vpop.f32.mrf.mxu1 }
 0xcd8   : > { %v6147_v31 = vmul.f32 -1.442695, %v2062_v29 }
 0xcd9   : > { %v2064_v32 = vpop.f32.mrf.mxu1 }
 0xcda   : > { %7183 = vpow2.f32 %v6147_v31 }
 0xcdb   : > { %v6648_v33 = vpop.f32.mrf.mxu1 }
 0xce7   : > { %v7184_v34 = vpop.eup %7183 }
 0xce8   : > { %v2070_v35 = vadd.f32 1.0, %v7184_v34 }
 0xcea   : > { %7185 = vrcp.f32 %v2070_v35  ;;  %v6161_v35 = vld [vmem:[%s7782_s27 + $0x2] sm:$0x3] }
 0xcf7   : > { %v7186_v36 = vpop.eup %7185 }
 0xcf8   : > { %v8101_v37 = vmul.f32 %v7186_v36, %v2062_v29 }
 0xcfa   : > { %2081 = vrot.lane.b32.xlu0 %v8101_v37, %s9189_s11  ;;  %2077 = vrot.lane.b32.xlu1 %v8101_v37, %s9188_s5  ;;  %2075 = vst.msk [vmem:[%s9105_s10] sm:$0xf] %vm2074_vm3, %v8101_v37  ;;  %v2085_v41 = vrot.slane %v8101_v37, 4  ;;  %s1146_s10 = scalar_lea.vmem %s9198_s18, %s7935_s22  ;;  %s9211_s18 = sld [smem:[#allocation23_spill]] }
 0xcfe   : > { %2095 = vperm.xlu1 %7026, %v6149_v38   ;;  %v6164_v38 = vld [vmem:[%s9190_s26 + $0x2] sm:$0x3] }
 0xd6c   : > { %v2082_v39 = vpop.permute.xlu0 %2081  ;;  %v2078_v40 = vpop.permute.xlu1 %2077 }
 0xd6d   : > { %v2084_v42 = vsel %vm1870_vm14, %v2082_v39, 0.0  ;;  %v2080_v11 = vsel %vm9108_vm7, 0.0, %v2078_v40  ;;  %v1165_v39 = vadd.s32 24, %v7923_v2  ;;  %v1164_v40 = vadd.s32 16, %v7923_v2 }
 0xd6e   : > { %v2087_v43 = vsel %vm1224_vm2, %v2080_v11, %v2085_v41 }
 0xd6f   : > { %v2088_v44 = vpack.c.bf16 %v2084_v42, %v2087_v43  ;;  %v1175_v41 = vmul.u32 2, %v1165_v39  ;;  %v1174_v42 = vmul.u32 2, %v1164_v40 }
 0xd71   : > { %v2102_v45 = vsel %vm9107_vm12, %v2088_v44, 0  ;;  %vm1183_vm6 = vcmp.eq.s32.totalorder %v7925_v3, %v1175_v41  ;;  %v1191_v11 = vadd.s32 1, %v1175_v41  ;;  %v1190_v43 = vadd.s32 1, %v1174_v42 }
 0xd72   : > { %6650 = vmatpush3.bf16.msra.mxu0 %v2102_v45  ;;  %vm1182_vm9 = vcmp.eq.s32.totalorder %v7925_v3, %v1174_v42 }
 0xd73   : > { %6663 = vmatprep.subr.bf16.mxu0 %v7678_v1  ;;  %vm1198_vm3 = vcmp.eq.s32.totalorder %v7925_v3, %v1190_v43 }
 0xd75   : > { %6652 = vmatmul.mubr.msk.bf16.vlgmr.msra.gmra.mxu0 %vm9106_vm13, %v6148_v46 }
 0xd76   : > { %6665 = vmatprep.mubr.msk.bf16.mxu0 %vm9111_vm0, %v7678_v1 }
 0xd79   : > { %v2096_v47 = vpop.permute.xlu1 %2095 }
 0xe35   : > { %v2138_v48 = vpop.f32.mrf.mxu0 }
 0xe36   : > { %v2139_v49 = vadd.f32 %v2138_v48, %v2096_v47 }
 0xe37   : > { %v6653_v50 = vpop.f32.mrf.mxu0 }
 0xe38   : > { %v6151_v51 = vmul.f32 -1.442695, %v2139_v49 }
 0xe39   : > { %v2141_v52 = vpop.f32.mrf.mxu0 }
 0xe3a   : > { %7187 = vpow2.f32 %v6151_v51 }
 0xe3b   : > { %v6654_v53 = vpop.f32.mrf.mxu0 }
 0xe47   : > { %v7188_v54 = vpop.eup %7187 }
 0xe48   : > { %v2147_v55 = vadd.f32 1.0, %v7188_v54 }
 0xe4a   : > { %7189 = vrcp.f32 %v2147_v55 }
 0xe57   : > { %v7190_v56 = vpop.eup %7189 }
 0xe58   : > { %v2150_v57 = vmul.f32 %v7190_v56, %v2139_v49 }
 0xe5a   : > { %2152 = vrot.lane.b32.xlu1 %v2150_v57, %s9188_s5  ;;  %2156 = vrot.lane.b32.xlu0 %v2150_v57, %s9189_s11 }
 0xe5e   : > { %2299 = vperm.xlu1 %7026, %v6165_v58   ;;  %2168 = vperm.xlu0 %7027, %v6153_v59   ;;  %v2351_v58 = vld [vmem:[%s1146_s10] sm:$0xf]  ;;  %s9113_s10 = scalar_lea.vmem [#allocation6], %s7997_s16 }
 0xe62   : > { %2243 = vperm.xlu0 %7027, %v6162_v60  }
 0xecc   : > { %v2157_v61 = vpop.permute.xlu0 %2156  ;;  %v2153_v0 = vpop.permute.xlu1 %2152 }
 0xecd   : > { %v2159_v62 = vsel %vm1870_vm14, %v2157_v61, 0.0  ;;  %v6156_v5 = vpack.c.bf16 %v2150_v57, %v2153_v0  ;;  %vm1199_vm14 = vcmp.eq.s32.totalorder %v7925_v3, %v1191_v11 }
 0xece   : > { %v2161_v63 = vpack.c.bf16 %v2159_v62, %v2159_v62 }
 0xed0   : > { %v2175_v4 = vsel %vm1224_vm2, %v2161_v63, 0 }
 0xed1   : > { %6656 = vmatpush3.bf16.msra.mxu1 %v2175_v4 }
 0xed2   : > { %6657 = vmatprep.subr.bf16.mxu1 %v7678_v1 }
 0xed5   : > { %6658 = vmatpush3.bf16.msk.msra.mxu1 %vm7963_vm10, %v6156_v5 }
 0xed6   : > { %6669 = vmatprep.subr.bf16.mxu1 %v7678_v1 }
 0xed8   : > { %6660 = vmatmul.mubr.msk.bf16.vlgmr.msra.gmra.mxu1 %vm9110_vm11, %v6152_v6 }
 0xed9   : > { %6671 = vmatprep.mubr.msk.bf16.mxu1 %vm9111_vm0, %v7678_v1  ;;  %v2169_v7 = vpop.permute.xlu0 %2168  ;;  %v2300_v47 = vpop.permute.xlu1 %2299 }
 0xedd   : > { %v2244_v60 = vpop.permute.xlu0 %2243 }
 0xf98   : > { %v2211_v9 = vpop.f32.mrf.mxu1 }
 0xf99   : > { %v2212_v12 = vadd.f32 %v2211_v9, %v2169_v7  ;;  %v6181_v7 = vld [vmem:[%s9170_s14 + $0x8] sm:$0xf]  ;;  %v6173_v9 = vld [vmem:[%s9174_s3 + $0x10] sm:$0xff] }
 0xf9a   : > { %v6661_v14 = vpop.f32.mrf.mxu1 }
 0xf9b   : > { %v2217_v16 = vadd.f32 %v2212_v12, %v8101_v37  ;;  %v2226_v17 = vrot.slane %v2212_v12, 4 }
 0xf9c   : > { %v2214_v18 = vpop.f32.mrf.mxu1 }
 0xf9d   : > { %v6159_v19 = vmul.f32 -1.442695, %v2217_v16  ;;  %v2228_v20 = vadd.f32 %v2226_v17, %v8101_v37 }
 0xf9e   : > { %v6662_v22 = vpop.f32.mrf.mxu1 }
 0xf9f   : > { %7191 = vpow2.f32 %v6159_v19  ;;  %v6160_v23 = vmul.f32 -1.442695, %v2228_v20  ;;  %v6172_v19 = vld [vmem:[%s7732_s29 + $0x8] sm:$0xf] }
 0xfa1   : > { %7193 = vpow2.f32 %v6160_v23 }
 0xfac   : > { %v7192_v24 = vpop.eup %7191 }
 0xfad   : > { %v2221_v25 = vadd.f32 1.0, %v7192_v24 }
 0xfae   : > { %v7194_v26 = vpop.eup %7193 }
 0xfaf   : > { %7195 = vrcp.f32 %v2221_v25  ;;  %v2232_v27 = vadd.f32 1.0, %v7194_v26 }
 0xfb1   : > { %7197 = vrcp.f32 %v2232_v27 }
 0xfbc   : > { %v7196_v28 = vpop.eup %7195 }
 0xfbd   : > { %v2224_v29 = vmul.f32 %v7196_v28, %v2217_v16 }
 0xfbe   : > { %v7198_v30 = vpop.eup %7197 }
 0xfbf   : > { %v2238_v31 = vpack.c.bf16 %v2224_v29, %v2224_v29  ;;  %v2235_v32 = vmul.f32 %v7198_v30, %v2228_v20 }
 0xfc1   : > { %v2250_v33 = vsel %vm9104_vm15, %v2238_v31, 0  ;;  %v2294_v34 = vpack.c.bf16 %v2235_v32, %v2235_v32 }
 0xfc2   : > { %6664 = vmatpush3.bf16.msra.mxu0 %v2250_v33 }
 0xfc3   : > { %v2306_v36 = vsel %vm9104_vm15, %v2294_v34, 0  ;;  %6675 = vmatprep.subr.mxu0 %v7678_v1  ;;  %vm8164_vm15 = vmor %vm1182_vm9, %vm1198_vm3  ;;  %vm2440_vm9 = vcmask 515072   ;;  %v6180_v34 = vld [vmem:[%s9172_s8 + $0x4] sm:$0x3]  ;;  %vm9199_vm3 = vcmask 1041408  }
 0xfc4   : > { %6670 = vmatpush3.bf16.msra.mxu1 %v2306_v36 }
 0xfc5   : > { %6666 = vmatmul.mubr.msk.bf16.vlgmr.msra.gmra.mxu0 %vm9103_vm1, %v6161_v35  ;;  %6686 = vmatprep.subr.bf16.mxu1 %v7678_v1 }
 0xfc6   : > { %6683 = vmatprep.mubr.msk.f32.mxu0 %vm9111_vm0, %v7678_v1 }
 0xfc7   : > { %6672 = vmatmul.mubr.msk.bf16.vlgmr.msra.gmra.mxu1 %vm9103_vm1, %v6164_v38  ;;  %vm8157_vm1 = vmor %vm1183_vm6, %vm1199_vm14  ;;  %vm2358_vm6 = vcmask 261120   ;;  %vm2644_vm14 = vcmask 519168  }
 0xfc8   : > { %6690 = vmatprep.mubr.msk.bf16.mxu1 %vm9111_vm0, %v7678_v1  ;;  %6676 = vmatpush3.msk.msra.mxu0 %vm8157_vm1, %v7680_v10 }
 0xfc9   : > { %6677 = vmatprep.subr.mxu0 %v7678_v1 }
 0xfca   : > { %6678 = vmatpush3.msk.msra.mxu0 %vm8164_vm15, %v7680_v10 }
 0xfcb   : > { %6679 = vmatprep.subr.mxu0 %v7678_v1 }
 0xfcc   : > { %6680 = vmatpush3.msk.msra.mxu0 %vm8051_vm8, %v7680_v10 }
 0xfcd   : > { %6681 = vmatprep.subr.mxu0 %v7678_v1 }
 0xfce   : > { %6682 = vmatpush3.msk.msra.mxu0 %vm7941_vm5, %v7680_v10 }
 0xfcf   : > { %6694 = vmatprep.subr.bf16.mxu0 %v7678_v1 }
0x1085   : > { %v2286_v46 = vpop.f32.mrf.mxu0 }
0x1086   : > { %v2287_v61 = vadd.f32 %v2286_v46, %v2244_v60 }
0x1087   : > { %v2342_v48 = vpop.f32.mrf.mxu1  ;;  %v6667_v49 = vpop.f32.mrf.mxu0 }
0x1088   : > { %v2343_v50 = vadd.f32 %v2342_v48, %v2300_v47  ;;  %v6185_v48 = vld [vmem:[%s9166_s24 + $0x8] sm:$0xf] }
0x1089   : > { %v6673_v51 = vpop.f32.mrf.mxu1  ;;  %v2289_v52 = vpop.f32.mrf.mxu0 }
0x108a   : > { %v2348_v53 = vmul.f32 0.5, %v2343_v50 }
0x108b   : > { %v2345_v54 = vpop.f32.mrf.mxu1  ;;  %v6668_v55 = vpop.f32.mrf.mxu0 }
0x108c   : > { %v2349_v56 = vmul.f32 1.442695, %v2348_v53 }
0x108d   : > { %v6674_v57 = vpop.f32.mrf.mxu1 }
0x108e   : > { %7199 = vpow2.f32 %v2349_v56  ;;  %v6184_v57 = vld [vmem:[%s9169_s19 + $0x4] sm:$0x3] }
0x109b   : > { %v7200_v59 = vpop.eup %7199 }
0x109c   : > { %v2352_v62 = vmul.f32 %v7200_v59, %v2351_v58 }
0x109e   : > { %v2353_v63 = vadd.f32 %v2352_v62, %v2287_v61 }
0x10a0   : > { %v2355_v0 = vrot.slane %v2353_v63, 4 }
0x10a2   : > { %v2357_v4 = vsel %vm1224_vm2, %v8101_v37, %v2355_v0 }
0x10a3   : > { %6684 = vmatmul.mubr.msk.f32.vlgmr.msra.gmra.mxu0 %vm2358_vm6, %v2357_v4  ;;  %vm9200_vm6 = vmmov %vm9199_vm3 }
0x10a4   : > { %6696 = vmatprep.mubr.msk.bf16.mxu0 %vm9111_vm0, %v7678_v1 }
0x1163   : > { %v2428_v5 = vpop.f32.mrf.mxu0 }
0x1164   : > { %2433 = vrot.lane.b32.xlu0 %v2428_v5, %s9188_s5  ;;  %2437 = vrot.lane.b32.xlu1 %v2428_v5, %s9189_s11 }
0x1165   : > { %v6685_v6 = vpop.f32.mrf.mxu0 }
0x1168   : > { %2513 = vperm.xlu0 %7027, %v6181_v7   ;;  %2450 = vperm.xlu1 %7026, %v6173_v9   ;;  %v6189_v9 = vld [vmem:[%s9173_s6 + $0x10] sm:$0xff] }
0x11d6   : > { %v2438_v12 = vpop.permute.xlu1 %2437  ;;  %v2434_v16 = vpop.permute.xlu0 %2433 }
0x11d7   : > { %v2441_v14 = vsel %vm2440_vm9, %v2438_v12, 0.0  ;;  %v6176_v18 = vpack.c.bf16 %v2428_v5, %v2434_v16 }
0x11d8   : > { %v2443_v37 = vpack.c.bf16 %v2441_v14, %v2441_v14 }
0x11da   : > { %v2457_v17 = vsel %vm1224_vm2, %v2443_v37, 0 }
0x11db   : > { %6687 = vmatpush3.bf16.msra.mxu1 %v2457_v17 }
0x11dc   : > { %6688 = vmatprep.subr.bf16.mxu1 %v7678_v1 }
0x11df   : > { %6689 = vmatpush3.bf16.msk.msra.mxu1 %vm7963_vm10, %v6176_v18 }
0x11e0   : > { %6706 = vmatprep.subr.bf16.mxu1 %v7678_v1 }
0x11e2   : > { %6691 = vmatmul.mubr.msk.bf16.vlgmr.msra.gmra.mxu1 %vm9110_vm11, %v6172_v19 }
0x11e3   : > { %6708 = vmatprep.mubr.msk.bf16.mxu1 %vm9111_vm0, %v7678_v1  ;;  %v2451_v20 = vpop.permute.xlu1 %2450  ;;  %v2514_v35 = vpop.permute.xlu0 %2513 }
0x12a2   : > { %v2493_v22 = vpop.f32.mrf.mxu1 }
0x12a3   : > { %v2494_v23 = vadd.f32 %v2493_v22, %v2451_v20  ;;  %v6188_v22 = vld [vmem:[%s7762_s30 + $0x8] sm:$0xf] }
0x12a4   : > { %v6692_v24 = vpop.f32.mrf.mxu1 }
0x12a5   : > { %v6179_v25 = vmul.f32 -1.442695, %v2494_v23 }
0x12a6   : > { %v2496_v26 = vpop.f32.mrf.mxu1 }
0x12a7   : > { %7201 = vpow2.f32 %v6179_v25 }
0x12a8   : > { %v6693_v27 = vpop.f32.mrf.mxu1 }
0x12b4   : > { %v7202_v28 = vpop.eup %7201 }
0x12b5   : > { %v2502_v29 = vadd.f32 1.0, %v7202_v28 }
0x12b7   : > { %7203 = vrcp.f32 %v2502_v29 }
0x12c4   : > { %v7204_v30 = vpop.eup %7203 }
0x12c5   : > { %v2505_v31 = vmul.f32 %v7204_v30, %v2494_v23 }
0x12c7   : > { %v2508_v32 = vpack.c.bf16 %v2505_v31, %v2505_v31 }
0x12c9   : > { %v2520_v33 = vsel %vm1224_vm2, %v2508_v32, 0 }
0x12ca   : > { %6695 = vmatpush3.bf16.msra.mxu0 %v2520_v33 }
0x12cb   : > { %6700 = vmatprep.subr.bf16.mxu0 %v7678_v1 }
0x12cd   : > { %6697 = vmatmul.mubr.msk.bf16.vlgmr.msra.gmra.mxu0 %vm9109_vm4, %v6180_v34  ;;  %v6205_v34 = vld [vmem:[%s9167_s21 + $0x8] sm:$0xf] }
0x12ce   : > { %6702 = vmatprep.mubr.msk.bf16.mxu0 %vm9111_vm0, %v7678_v1 }
0x138d   : > { %v2556_v36 = vpop.f32.mrf.mxu0 }
0x138e   : > { %v2557_v38 = vadd.f32 %v2556_v36, %v2514_v35  ;;  %v6193_v35 = vld [vmem:[%s9168_s20 + $0x10] sm:$0xff]  ;;  %v6202_v36 = vld [vmem:[%s9175_s4 + $0x8] sm:$0xf] }
0x138f   : > { %v6698_v39 = vpop.f32.mrf.mxu0 }
0x1390   : > { %v6183_v40 = vmul.f32 -1.442695, %v2557_v38 }
0x1391   : > { %v2559_v41 = vpop.f32.mrf.mxu0 }
0x1392   : > { %7205 = vpow2.f32 %v6183_v40 }
0x1393   : > { %v6699_v42 = vpop.f32.mrf.mxu0 }
0x139f   : > { %v7206_v11 = vpop.eup %7205 }
0x13a0   : > { %v2565_v43 = vadd.f32 1.0, %v7206_v11 }
0x13a2   : > { %7207 = vrcp.f32 %v2565_v43  ;;  %v6192_v43 = vld [vmem:[%s9171_s12 + $0x8] sm:$0xf] }
0x13af   : > { %v7208_v46 = vpop.eup %7207 }
0x13b0   : > { %v2568_v47 = vmul.f32 %v7208_v46, %v2557_v38 }
0x13b2   : > { %2574 = vrot.lane.b32.xlu0 %v2568_v47, %s9189_s11  ;;  %2570 = vrot.lane.b32.xlu1 %v2568_v47, %s9188_s5  ;;  %v2578_v49 = vrot.slane %v2568_v47, 4 }
0x13b6   : > { %2588 = vperm.xlu1 %7026, %v6185_v48  }
0x1424   : > { %v2575_v50 = vpop.permute.xlu0 %2574  ;;  %v2571_v51 = vpop.permute.xlu1 %2570 }
0x1425   : > { %v2577_v52 = vsel %vm2440_vm9, %v2575_v50, 0.0  ;;  %v2573_v53 = vsel %vm9108_vm7, 0.0, %v2571_v51 }
0x1426   : > { %v2580_v54 = vsel %vm1224_vm2, %v2573_v53, %v2578_v49 }
0x1427   : > { %v2581_v55 = vpack.c.bf16 %v2577_v52, %v2580_v54 }
0x1429   : > { %v2595_v56 = vsel %vm9107_vm12, %v2581_v55, 0 }
0x142a   : > { %6701 = vmatpush3.bf16.msra.mxu0 %v2595_v56 }
0x142b   : > { %6712 = vmatprep.subr.bf16.mxu0 %v7678_v1 }
0x142d   : > { %6703 = vmatmul.mubr.msk.bf16.vlgmr.msra.gmra.mxu0 %vm9106_vm13, %v6184_v57 }
0x142e   : > { %6716 = vmatprep.mubr.msk.bf16.mxu0 %vm9111_vm0, %v7678_v1 }
0x1431   : > { %v2589_v58 = vpop.permute.xlu1 %2588 }
0x14ed   : > { %v2631_v59 = vpop.f32.mrf.mxu0 }
0x14ee   : > { %v2632_v60 = vadd.f32 %v2631_v59, %v2589_v58 }
0x14ef   : > { %v6704_v61 = vpop.f32.mrf.mxu0 }
0x14f0   : > { %v6187_v62 = vmul.f32 -1.442695, %v2632_v60 }
0x14f1   : > { %v2634_v63 = vpop.f32.mrf.mxu0 }
0x14f2   : > { %7209 = vpow2.f32 %v6187_v62 }
0x14f3   : > { %v6705_v0 = vpop.f32.mrf.mxu0 }
0x14ff   : > { %v7210_v4 = vpop.eup %7209 }
0x1500   : > { %v2640_v5 = vadd.f32 1.0, %v7210_v4 }
0x1502   : > { %7211 = vrcp.f32 %v2640_v5 }
0x150f   : > { %v7212_v6 = vpop.eup %7211 }
0x1510   : > { %v8219_v7 = vmul.f32 %v7212_v6, %v2632_v60 }
0x1512   : > { %2651 = vrot.lane.b32.xlu1 %v8219_v7, %s9189_s11  ;;  %2647 = vrot.lane.b32.xlu0 %v8219_v7, %s9188_s5  ;;  %2645 = vst.msk [vmem:[%s9113_s10] sm:$0xf] %vm2644_vm14, %v8219_v7  ;;  %v2655_v37 = vrot.slane %v8219_v7, 4  ;;  %s1150_s10 = scalar_lea.vmem %s9211_s18, %s7935_s22  ;;  %s9223_s18 = sld [smem:[#allocation24_spill]] }
0x1516   : > { %2665 = vperm.xlu0 %7027, %v6189_v9   ;;  %v6201_v9 = vld [vmem:[%s7782_s27 + $0x4] sm:$0x3] }
0x1584   : > { %v2652_v12 = vpop.permute.xlu1 %2651  ;;  %v2648_v14 = vpop.permute.xlu0 %2647 }
0x1585   : > { %v2654_v16 = vsel %vm2440_vm9, %v2652_v12, 0.0  ;;  %v2650_v17 = vsel %vm9108_vm7, 0.0, %v2648_v14  ;;  %v6204_v14 = vld [vmem:[%s9190_s26 + $0x4] sm:$0x3] }
0x1586   : > { %v2657_v18 = vsel %vm1224_vm2, %v2650_v17, %v2655_v37  ;;  %v1169_v37 = vadd.s32 56, %v7923_v2  ;;  %v1168_v17 = vadd.s32 48, %v7923_v2 }
0x1587   : > { %v2658_v19 = vpack.c.bf16 %v2654_v16, %v2657_v18  ;;  %v1167_v18 = vadd.s32 40, %v7923_v2 }
0x1588   : > { %v1179_v16 = vmul.u32 2, %v1169_v37 }
0x1589   : > { %v2672_v20 = vsel %vm9107_vm12, %v2658_v19, 0  ;;  %v1166_v19 = vadd.s32 32, %v7923_v2 }
0x158a   : > { %6707 = vmatpush3.bf16.msra.mxu1 %v2672_v20  ;;  %v1195_v20 = vadd.s32 1, %v1179_v16 }
0x158b   : > { %6720 = vmatprep.subr.bf16.mxu1 %v7678_v1 }
0x158d   : > { %6709 = vmatmul.mubr.msk.bf16.vlgmr.msra.gmra.mxu1 %vm9106_vm13, %v6188_v22  ;;  %v1178_v22 = vmul.u32 2, %v1168_v17 }
0x158e   : > { %6722 = vmatprep.mubr.msk.bf16.mxu1 %vm9111_vm0, %v7678_v1 }
0x1591   : > { %v2666_v23 = vpop.permute.xlu0 %2665 }
0x164d   : > { %v2708_v24 = vpop.f32.mrf.mxu1 }
0x164e   : > { %v2709_v25 = vadd.f32 %v2708_v24, %v2666_v23  ;;  %v1177_v23 = vmul.u32 2, %v1167_v18  ;;  %v1176_v24 = vmul.u32 2, %v1166_v19  ;;  %v6224_v19 = vld [vmem:[%s9172_s8 + $0x6] sm:$0x3] }
0x164f   : > { %v6710_v26 = vpop.f32.mrf.mxu1 }
0x1650   : > { %v6191_v27 = vmul.f32 -1.442695, %v2709_v25  ;;  %vm1185_vm13 = vcmp.eq.s32.totalorder %v7925_v3, %v1177_v23  ;;  %vm1184_vm7 = vcmp.eq.s32.totalorder %v7925_v3, %v1176_v24 }
0x1651   : > { %v2711_v28 = vpop.f32.mrf.mxu1 }
0x1652   : > { %7213 = vpow2.f32 %v6191_v27  ;;  %v1193_v27 = vadd.s32 1, %v1177_v23  ;;  %v1192_v28 = vadd.s32 1, %v1176_v24 }
0x1653   : > { %v6711_v29 = vpop.f32.mrf.mxu1 }
0x165f   : > { %v7214_v30 = vpop.eup %7213 }
0x1660   : > { %v2717_v31 = vadd.f32 1.0, %v7214_v30 }
0x1662   : > { %7215 = vrcp.f32 %v2717_v31 }
0x166f   : > { %v7216_v32 = vpop.eup %7215 }
0x1670   : > { %v2720_v33 = vmul.f32 %v7216_v32, %v2709_v25  ;;  %v1194_v25 = vadd.s32 1, %v1178_v22 }
0x1672   : > { %2722 = vrot.lane.b32.xlu0 %v2720_v33, %s9188_s5  ;;  %2726 = vrot.lane.b32.xlu1 %v2720_v33, %s9189_s11  ;;  %vm1202_vm12 = vcmp.eq.s32.totalorder %v7925_v3, %v1194_v25 }
0x1676   : > { %2869 = vperm.xlu0 %7027, %v6205_v34   ;;  %2738 = vperm.xlu1 %7026, %v6193_v35  }
0x167a   : > { %2813 = vperm.xlu1 %7026, %v6202_v36  }
0x16e4   : > { %v2727_v38 = vpop.permute.xlu1 %2726  ;;  %v2723_v41 = vpop.permute.xlu0 %2722 }
0x16e5   : > { %v2729_v39 = vsel %vm2440_vm9, %v2727_v38, 0.0  ;;  %v6196_v11 = vpack.c.bf16 %v2720_v33, %v2723_v41  ;;  %vm9201_vm9 = vcmask 31744  }
0x16e6   : > { %v2731_v40 = vpack.c.bf16 %v2729_v39, %v2729_v39  ;;  %vm9202_vm14 = vmmov %vm9201_vm9 }
0x16e8   : > { %v2745_v42 = vsel %vm1224_vm2, %v2731_v40, 0 }
0x16e9   : > { %6713 = vmatpush3.bf16.msra.mxu0 %v2745_v42 }
0x16ea   : > { %6714 = vmatprep.subr.bf16.mxu0 %v7678_v1 }
0x16ed   : > { %6715 = vmatpush3.bf16.msk.msra.mxu0 %vm7963_vm10, %v6196_v11  ;;  %v2921_v11 = vld [vmem:[%s1150_s10] sm:$0xf]  ;;  %s9114_s10 = scalar_lea.vmem [#allocation7], %s7997_s16 }
0x16ee   : > { %6726 = vmatprep.subr.bf16.mxu0 %v7678_v1 }
0x16f0   : > { %6717 = vmatmul.mubr.msk.bf16.vlgmr.msra.gmra.mxu0 %vm9110_vm11, %v6192_v43 }
0x16f1   : > { %6728 = vmatprep.mubr.msk.bf16.mxu0 %vm9111_vm0, %v7678_v1  ;;  %v2739_v46 = vpop.permute.xlu1 %2738  ;;  %v2870_v31 = vpop.permute.xlu0 %2869 }
0x17b0   : > { %v2781_v47 = vpop.f32.mrf.mxu0 }
0x17b1   : > { %v2782_v48 = vadd.f32 %v2781_v47, %v2739_v46  ;;  %v2814_v46 = vpop.permute.xlu1 %2813 }
0x17b2   : > { %v6718_v49 = vpop.f32.mrf.mxu0 }
0x17b3   : > { %v2787_v50 = vadd.f32 %v2782_v48, %v8219_v7  ;;  %v2796_v51 = vrot.slane %v2782_v48, 4 }
0x17b4   : > { %v2784_v52 = vpop.f32.mrf.mxu0 }
0x17b5   : > { %v6199_v53 = vmul.f32 -1.442695, %v2787_v50  ;;  %v2798_v54 = vadd.f32 %v2796_v51, %v8219_v7 }
0x17b6   : > { %v6719_v55 = vpop.f32.mrf.mxu0 }
0x17b7   : > { %7217 = vpow2.f32 %v6199_v53  ;;  %v6200_v56 = vmul.f32 -1.442695, %v2798_v54  ;;  %v6217_v55 = vld [vmem:[%s9174_s3 + $0x18] sm:$0xff] }
0x17b9   : > { %7219 = vpow2.f32 %v6200_v56 }
0x17c4   : > { %v7218_v57 = vpop.eup %7217 }
0x17c5   : > { %v2791_v58 = vadd.f32 1.0, %v7218_v57 }
0x17c6   : > { %v7220_v59 = vpop.eup %7219 }
0x17c7   : > { %7221 = vrcp.f32 %v2791_v58  ;;  %v2802_v60 = vadd.f32 1.0, %v7220_v59 }
0x17c9   : > { %7223 = vrcp.f32 %v2802_v60 }
0x17d4   : > { %v7222_v61 = vpop.eup %7221 }
0x17d5   : > { %v2794_v62 = vmul.f32 %v7222_v61, %v2787_v50  ;;  %v6216_v61 = vld [vmem:[%s7732_s29 + $0xc] sm:$0xf] }
0x17d6   : > { %v7224_v63 = vpop.eup %7223 }
0x17d7   : > { %v2808_v0 = vpack.c.bf16 %v2794_v62, %v2794_v62  ;;  %v2805_v4 = vmul.f32 %v7224_v63, %v2798_v54  ;;  %v6225_v54 = vld [vmem:[%s9170_s14 + $0xc] sm:$0xf] }
0x17d9   : > { %v2820_v5 = vsel %vm9199_vm3, %v2808_v0, 0  ;;  %v2864_v6 = vpack.c.bf16 %v2805_v4, %v2805_v4  ;;  %vm1187_vm3 = vcmp.eq.s32.totalorder %v7925_v3, %v1179_v16 }
0x17da   : > { %6721 = vmatpush3.bf16.msra.mxu1 %v2820_v5 }
0x17db   : > { %v2876_v12 = vsel %vm9200_vm6, %v2864_v6, 0  ;;  %6732 = vmatprep.subr.mxu1 %v7678_v1  ;;  %vm1203_vm6 = vcmp.eq.s32.totalorder %v7925_v3, %v1195_v20 }
0x17dc   : > { %6727 = vmatpush3.bf16.msra.mxu0 %v2876_v12 }
0x17dd   : > { %6723 = vmatmul.mubr.msk.bf16.vlgmr.msra.gmra.mxu1 %vm9201_vm9, %v6201_v9  ;;  %6751 = vmatprep.subr.bf16.mxu0 %v7678_v1  ;;  %vm1186_vm9 = vcmp.eq.s32.totalorder %v7925_v3, %v1178_v22 }
0x17de   : > { %6748 = vmatprep.mubr.msk.f32.mxu1 %vm9111_vm0, %v7678_v1  ;;  %vm8287_vm4 = vmor %vm1186_vm9, %vm1202_vm12  ;;  %vm9212_vm12 = vmmov 0   ;;  %vm9213_vm9 = vcmask 195584  }
0x17df   : > { %6729 = vmatmul.mubr.msk.bf16.vlgmr.msra.gmra.mxu0 %vm9202_vm14, %v6204_v14  ;;  %vm8276_vm14 = vmor %vm1187_vm3, %vm1203_vm6  ;;  %vm1201_vm3 = vcmp.eq.s32.totalorder %v7925_v3, %v1193_v27  ;;  %vm1200_vm6 = vcmp.eq.s32.totalorder %v7925_v3, %v1192_v28 }
0x17e0   : > { %6755 = vmatprep.mubr.msk.bf16.mxu0 %vm9111_vm0, %v7678_v1  ;;  %6733 = vmatpush3.msk.msra.mxu1 %vm8276_vm14, %v7680_v10  ;;  %vm8296_vm11 = vmor %vm1185_vm13, %vm1201_vm3  ;;  %vm9119_vm13 = vcmask 1039360   ;;  %vm9214_vm3 = vcmask 64512  }
0x17e1   : > { %6734 = vmatprep.subr.mxu1 %v7678_v1  ;;  %vm8301_vm0 = vmor %vm1184_vm7, %vm1200_vm6  ;;  %vm9116_vm7 = vcmask 523264   ;;  %vm9215_vm6 = vcmask 7168  }
0x17e2   : > { %6735 = vmatpush3.msk.msra.mxu1 %vm8287_vm4, %v7680_v10 }
0x17e3   : > { %6736 = vmatprep.subr.mxu1 %v7678_v1 }
0x17e4   : > { %6737 = vmatpush3.msk.msra.mxu1 %vm8296_vm11, %v7680_v10 }
0x17e5   : > { %6738 = vmatprep.subr.mxu1 %v7678_v1 }
0x17e6   : > { %6739 = vmatpush3.msk.msra.mxu1 %vm8301_vm0, %v7680_v10 }
0x17e7   : > { %6740 = vmatprep.subr.mxu1 %v7678_v1 }
0x17e8   : > { %6741 = vmatpush3.msk.msra.mxu1 %vm8157_vm1, %v7680_v10 }
0x17e9   : > { %6742 = vmatprep.subr.mxu1 %v7678_v1 }
0x17ea   : > { %6743 = vmatpush3.msk.msra.mxu1 %vm8164_vm15, %v7680_v10 }
0x17eb   : > { %6744 = vmatprep.subr.mxu1 %v7678_v1 }
0x17ec   : > { %6745 = vmatpush3.msk.msra.mxu1 %vm8051_vm8, %v7680_v10 }
0x17ed   : > { %6746 = vmatprep.subr.mxu1 %v7678_v1 }
0x17ee   : > { %6747 = vmatpush3.msk.msra.mxu1 %vm7941_vm5, %v7680_v10 }
0x17ef   : > { %6759 = vmatprep.subr.bf16.mxu1 %v7678_v1 }
0x189d   : > { %v2856_v3 = vpop.f32.mrf.mxu1 }
0x189e   : > { %v2857_v47 = vadd.f32 %v2856_v3, %v2814_v46 }
0x189f   : > { %v2912_v32 = vpop.f32.mrf.mxu0  ;;  %v6724_v33 = vpop.f32.mrf.mxu1 }
0x18a0   : > { %v2913_v34 = vadd.f32 %v2912_v32, %v2870_v31 }
0x18a1   : > { %v6730_v35 = vpop.f32.mrf.mxu0  ;;  %v2859_v36 = vpop.f32.mrf.mxu1 }
0x18a2   : > { %v2918_v38 = vmul.f32 0.5, %v2913_v34  ;;  %v6229_v34 = vld [vmem:[%s9166_s24 + $0xc] sm:$0xf] }
0x18a3   : > { %v2915_v39 = vpop.f32.mrf.mxu0  ;;  %v6725_v40 = vpop.f32.mrf.mxu1 }
0x18a4   : > { %v2919_v41 = vmul.f32 1.442695, %v2918_v38 }
0x18a5   : > { %v6731_v42 = vpop.f32.mrf.mxu0 }
0x18a6   : > { %7225 = vpow2.f32 %v2919_v41 }
0x18b3   : > { %v7226_v43 = vpop.eup %7225 }
0x18b4   : > { %v2922_v48 = vmul.f32 %v7226_v43, %v2921_v11  ;;  %v6228_v43 = vld [vmem:[%s9169_s19 + $0x6] sm:$0x3] }
0x18b6   : > { %v2923_v49 = vadd.f32 %v2922_v48, %v2857_v47 }
0x18b8   : > { %v2925_v50 = vrot.slane %v2923_v49, 4 }
0x18ba   : > { %v2927_v51 = vsel %vm1224_vm2, %v8219_v7, %v2925_v50 }
0x18bb   : > { %6749 = vmatmul.mubr.msk.f32.vlgmr.msra.gmra.mxu1 %vm9116_vm7, %v2927_v51 }
0x18bc   : > { %6761 = vmatprep.mubr.msk.bf16.mxu1 %vm9212_vm12, %v7678_v1 }
0x197b   : > { %v2998_v52 = vpop.f32.mrf.mxu1 }
0x197c   : > { %3003 = vrot.lane.b32.xlu1 %v2998_v52, %s9188_s5  ;;  %3007 = vrot.lane.b32.xlu0 %v2998_v52, %s9189_s11 }
0x197d   : > { %v6750_v53 = vpop.f32.mrf.mxu1 }
0x1980   : > { %3083 = vperm.xlu1 %7026, %v6225_v54   ;;  %3020 = vperm.xlu0 %7027, %v6217_v55  }
0x19ee   : > { %v3008_v56 = vpop.permute.xlu0 %3007  ;;  %v3004_v58 = vpop.permute.xlu1 %3003 }
0x19ef   : > { %v3011_v7 = vsel %vm9119_vm13, %v3008_v56, 0.0  ;;  %v6220_v60 = vpack.c.bf16 %v2998_v52, %v3004_v58 }
0x19f0   : > { %v3013_v57 = vpack.c.bf16 %v3011_v7, %v3011_v7  ;;  %v6233_v7 = vld [vmem:[%s9173_s6 + $0x18] sm:$0xff] }
0x19f2   : > { %v3027_v59 = vsel %vm1224_vm2, %v3013_v57, 0 }
0x19f3   : > { %6752 = vmatpush3.bf16.msra.mxu0 %v3027_v59 }
0x19f4   : > { %6753 = vmatprep.subr.bf16.mxu0 %v7678_v1 }
0x19f7   : > { %6754 = vmatpush3.bf16.msk.msra.mxu0 %vm7963_vm10, %v6220_v60 }
0x19f8   : > { %6765 = vmatprep.subr.bf16.mxu0 %v7678_v1 }
0x19fa   : > { %6756 = vmatmul.mubr.msk.bf16.vlgmr.msra.gmra.mxu0 %vm9213_vm9, %v6216_v61  ;;  %vm9216_vm9 = vcmask 1045504  }
0x19fb   : > { %6767 = vmatprep.mubr.msk.bf16.mxu0 %vm9212_vm12, %v7678_v1  ;;  %v3021_v62 = vpop.permute.xlu0 %3020  ;;  %v3084_v20 = vpop.permute.xlu1 %3083 }
0x1aba   : > { %v3063_v63 = vpop.f32.mrf.mxu0 }
0x1abb   : > { %v3064_v0 = vadd.f32 %v3063_v63, %v3021_v62 }
0x1abc   : > { %v6757_v4 = vpop.f32.mrf.mxu0 }
0x1abd   : > { %v6223_v5 = vmul.f32 -1.442695, %v3064_v0  ;;  %v6232_v4 = vld [vmem:[%s7762_s30 + $0xc] sm:$0xf] }
0x1abe   : > { %v3066_v6 = vpop.f32.mrf.mxu0 }
0x1abf   : > { %7227 = vpow2.f32 %v6223_v5 }
0x1ac0   : > { %v6758_v9 = vpop.f32.mrf.mxu0 }
0x1acc   : > { %v7228_v12 = vpop.eup %7227 }
0x1acd   : > { %v3072_v14 = vadd.f32 1.0, %v7228_v12 }
0x1acf   : > { %7229 = vrcp.f32 %v3072_v14 }
0x1adc   : > { %v7230_v37 = vpop.eup %7229 }
0x1add   : > { %v3075_v16 = vmul.f32 %v7230_v37, %v3064_v0 }
0x1adf   : > { %v3078_v17 = vpack.c.bf16 %v3075_v16, %v3075_v16 }
0x1ae1   : > { %v3090_v18 = vsel %vm1224_vm2, %v3078_v17, 0 }
0x1ae2   : > { %6760 = vmatpush3.bf16.msra.mxu1 %v3090_v18 }
0x1ae3   : > { %6771 = vmatprep.subr.bf16.mxu1 %v7678_v1 }
0x1ae5   : > { %6762 = vmatmul.mubr.msk.bf16.vlgmr.msra.gmra.mxu1 %vm9214_vm3, %v6224_v19  ;;  %vm9217_vm3 = vcmask 97280  }
0x1ae6   : > { %6773 = vmatprep.mubr.msk.bf16.mxu1 %vm9212_vm12, %v7678_v1 }
0x1ba5   : > { %v3126_v22 = vpop.f32.mrf.mxu1 }
0x1ba6   : > { %v3127_v23 = vadd.f32 %v3126_v22, %v3084_v20  ;;  %v6249_v22 = vld [vmem:[%s9167_s21 + $0xc] sm:$0xf] }
0x1ba7   : > { %v6763_v24 = vpop.f32.mrf.mxu1 }
0x1ba8   : > { %v6227_v25 = vmul.f32 -1.442695, %v3127_v23  ;;  %v6246_v24 = vld [vmem:[%s9175_s4 + $0xc] sm:$0xf] }
0x1ba9   : > { %v3129_v27 = vpop.f32.mrf.mxu1 }
0x1baa   : > { %7231 = vpow2.f32 %v6227_v25 }
0x1bab   : > { %v6764_v28 = vpop.f32.mrf.mxu1 }
0x1bb7   : > { %v7232_v3 = vpop.eup %7231 }
0x1bb8   : > { %v3135_v31 = vadd.f32 1.0, %v7232_v3 }
0x1bba   : > { %7233 = vrcp.f32 %v3135_v31 }
0x1bc7   : > { %v7234_v32 = vpop.eup %7233 }
0x1bc8   : > { %v3138_v33 = vmul.f32 %v7234_v32, %v3127_v23  ;;  %v6237_v23 = vld [vmem:[%s9168_s20 + $0x18] sm:$0xff] }
0x1bca   : > { %3144 = vrot.lane.b32.xlu1 %v3138_v33, %s9189_s11  ;;  %3140 = vrot.lane.b32.xlu0 %v3138_v33, %s9188_s5  ;;  %v3148_v35 = vrot.slane %v3138_v33, 4  ;;  %v6236_v33 = vld [vmem:[%s9171_s12 + $0xc] sm:$0xf] }
0x1bce   : > { %3158 = vperm.xlu0 %7027, %v6229_v34  }
0x1c3c   : > { %v3145_v36 = vpop.permute.xlu1 %3144  ;;  %v3141_v38 = vpop.permute.xlu0 %3140 }
0x1c3d   : > { %v3147_v39 = vsel %vm9119_vm13, %v3145_v36, 0.0  ;;  %v3143_v40 = vsel %vm9215_vm6, 0.0, %v3141_v38 }
0x1c3e   : > { %v3150_v41 = vsel %vm1224_vm2, %v3143_v40, %v3148_v35 }
0x1c3f   : > { %v3151_v42 = vpack.c.bf16 %v3147_v39, %v3150_v41 }
0x1c41   : > { %v3165_v11 = vsel %vm9216_vm9, %v3151_v42, 0 }
0x1c42   : > { %6766 = vmatpush3.bf16.msra.mxu0 %v3165_v11 }
0x1c43   : > { %6777 = vmatprep.subr.bf16.mxu0 %v7678_v1 }
0x1c45   : > { %6768 = vmatmul.mubr.msk.bf16.vlgmr.msra.gmra.mxu0 %vm9217_vm3, %v6228_v43 }
0x1c46   : > { %6781 = vmatprep.mubr.msk.bf16.mxu0 %vm9212_vm12, %v7678_v1 }
0x1c49   : > { %v3159_v46 = vpop.permute.xlu0 %3158 }
0x1d05   : > { %v3201_v47 = vpop.f32.mrf.mxu0 }
0x1d06   : > { %v3202_v48 = vadd.f32 %v3201_v47, %v3159_v46 }
0x1d07   : > { %v6769_v49 = vpop.f32.mrf.mxu0 }
0x1d08   : > { %v6231_v50 = vmul.f32 -1.442695, %v3202_v48 }
0x1d09   : > { %v3204_v51 = vpop.f32.mrf.mxu0 }
0x1d0a   : > { %7235 = vpow2.f32 %v6231_v50 }
0x1d0b   : > { %v6770_v52 = vpop.f32.mrf.mxu0 }
0x1d17   : > { %v7236_v53 = vpop.eup %7235 }
0x1d18   : > { %v3210_v54 = vadd.f32 1.0, %v7236_v53 }
0x1d1a   : > { %7237 = vrcp.f32 %v3210_v54 }
0x1d27   : > { %v7238_v55 = vpop.eup %7237 }
0x1d28   : > { %v8368_v56 = vmul.f32 %v7238_v55, %v3202_v48 }
0x1d2a   : > { %3220 = vrot.lane.b32.xlu0 %v8368_v56, %s9189_s11  ;;  %3216 = vrot.lane.b32.xlu1 %v8368_v56, %s9188_s5  ;;  %3214 = vst [vmem:[%s9114_s10] sm:$0xf] %v8368_v56  ;;  %v3224_v59 = vrot.slane %v8368_v56, 4  ;;  %s1154_s10 = scalar_lea.vmem %s9223_s18, %s7935_s22  ;;  %s6095_s22 = sshll.u32 %s7994_s23, 3 }
0x1d2b   : > { %s9244_s18 = sld [smem:[#allocation25_spill]] }
0x1d2e   : > { %3234 = vperm.xlu1 %7026, %v6233_v7  }
0x1d9c   : > { %v3221_v57 = vpop.permute.xlu0 %3220  ;;  %v3217_v58 = vpop.permute.xlu1 %3216 }
0x1d9d   : > { %v3223_v60 = vsel %vm9119_vm13, %v3221_v57, 0.0  ;;  %v3219_v61 = vsel %vm9215_vm6, 0.0, %v3217_v58  ;;  %vm9218_vm6 = vcmask 195584   ;;  %v6245_v58 = vld [vmem:[%s7782_s27 + $0x6] sm:$0x3] }
0x1d9e   : > { %v3226_v62 = vsel %vm1224_vm2, %v3219_v61, %v3224_v59 }
0x1d9f   : > { %v3227_v63 = vpack.c.bf16 %v3223_v60, %v3226_v62  ;;  %v6248_v60 = vld [vmem:[%s9190_s26 + $0x6] sm:$0x3] }
0x1da1   : > { %v3241_v0 = vsel %vm9216_vm9, %v3227_v63, 0  ;;  %vm9219_vm9 = vcmask 1041408  }
0x1da2   : > { %6772 = vmatpush3.bf16.msra.mxu1 %v3241_v0 }
0x1da3   : > { %6785 = vmatprep.subr.bf16.mxu1 %v7678_v1 }
0x1da5   : > { %6774 = vmatmul.mubr.msk.bf16.vlgmr.msra.gmra.mxu1 %vm9217_vm3, %v6232_v4  ;;  %vm9220_vm3 = vmmov %vm9219_vm9 }
0x1da6   : > { %6787 = vmatprep.mubr.msk.bf16.mxu1 %vm9212_vm12, %v7678_v1 }
0x1da9   : > { %v3235_v5 = vpop.permute.xlu1 %3234 }
0x1e65   : > { %v3277_v6 = vpop.f32.mrf.mxu1 }
0x1e66   : > { %v3278_v9 = vadd.f32 %v3277_v6, %v3235_v5 }
0x1e67   : > { %v6775_v12 = vpop.f32.mrf.mxu1 }
0x1e68   : > { %v6235_v14 = vmul.f32 -1.442695, %v3278_v9 }
0x1e69   : > { %v3280_v37 = vpop.f32.mrf.mxu1 }
0x1e6a   : > { %7239 = vpow2.f32 %v6235_v14 }
0x1e6b   : > { %v6776_v16 = vpop.f32.mrf.mxu1 }
0x1e77   : > { %v7240_v17 = vpop.eup %7239 }
0x1e78   : > { %v3286_v18 = vadd.f32 1.0, %v7240_v17  ;;  %v3490_v17 = vld [vmem:[%s1154_s10] sm:$0xf]  ;;  %s8533_s10 = scalar_lea.vmem [#allocation9], %s6095_s22  ;;  %s6429_s22 = sshll.u32 %s7928_s2, 3 }
0x1e7a   : > { %7241 = vrcp.f32 %v3286_v18 }
0x1e87   : > { %v7242_v19 = vpop.eup %7241 }
0x1e88   : > { %v3289_v20 = vmul.f32 %v7242_v19, %v3278_v9 }
0x1e8a   : > { %3291 = vrot.lane.b32.xlu1 %v3289_v20, %s9188_s5  ;;  %3295 = vrot.lane.b32.xlu0 %v3289_v20, %s9189_s11 }
0x1e8e   : > { %3438 = vperm.xlu1 %7026, %v6249_v22   ;;  %3307 = vperm.xlu0 %7027, %v6237_v23  }
0x1e92   : > { %3382 = vperm.xlu0 %7027, %v6246_v24  }
0x1efc   : > { %v3296_v25 = vpop.permute.xlu0 %3295  ;;  %v3292_v3 = vpop.permute.xlu1 %3291 }
0x1efd   : > { %v3298_v27 = vsel %vm9119_vm13, %v3296_v25, 0.0  ;;  %v6240_v32 = vpack.c.bf16 %v3289_v20, %v3292_v3 }
0x1efe   : > { %v3300_v28 = vpack.c.bf16 %v3298_v27, %v3298_v27 }
0x1f00   : > { %v3314_v31 = vsel %vm1224_vm2, %v3300_v28, 0 }
0x1f01   : > { %6778 = vmatpush3.bf16.msra.mxu0 %v3314_v31 }
0x1f02   : > { %6779 = vmatprep.subr.bf16.mxu0 %v7678_v1 }
0x1f05   : > { %6780 = vmatpush3.bf16.msk.msra.mxu0 %vm7963_vm10, %v6240_v32 }
0x1f06   : > { %6791 = vmatprep.subr.bf16.mxu0 %v7678_v1 }
0x1f08   : > { %6782 = vmatmul.mubr.msk.bf16.vlgmr.msra.gmra.mxu0 %vm9218_vm6, %v6236_v33  ;;  %vm9221_vm6 = vcmask 31744  }
0x1f09   : > { %6793 = vmatprep.mubr.msk.bf16.mxu0 %vm9212_vm12, %v7678_v1  ;;  %v3308_v34 = vpop.permute.xlu0 %3307  ;;  %v3439_v62 = vpop.permute.xlu1 %3438 }
0x1f0d   : > { %v3383_v19 = vpop.permute.xlu0 %3382 }
0x1fc8   : > { %v3350_v35 = vpop.f32.mrf.mxu0 }
0x1fc9   : > { %v3351_v36 = vadd.f32 %v3350_v35, %v3308_v34  ;;  %v6270_v34 = vld [vmem:[%s9174_s3 + $0x20] sm:$0xff] }
0x1fca   : > { %v6783_v38 = vpop.f32.mrf.mxu0 }
0x1fcb   : > { %v3356_v39 = vadd.f32 %v3351_v36, %v8368_v56  ;;  %v3365_v40 = vrot.slane %v3351_v36, 4 }
0x1fcc   : > { %v3353_v41 = vpop.f32.mrf.mxu0 }
0x1fcd   : > { %v6243_v42 = vmul.f32 -1.442695, %v3356_v39  ;;  %v3367_v11 = vadd.f32 %v3365_v40, %v8368_v56 }
0x1fce   : > { %v6784_v43 = vpop.f32.mrf.mxu0 }
0x1fcf   : > { %7243 = vpow2.f32 %v6243_v42  ;;  %v6244_v46 = vmul.f32 -1.442695, %v3367_v11 }
0x1fd1   : > { %7245 = vpow2.f32 %v6244_v46 }
0x1fdc   : > { %v7244_v47 = vpop.eup %7243 }
0x1fdd   : > { %v3360_v48 = vadd.f32 1.0, %v7244_v47 }
0x1fde   : > { %v7246_v49 = vpop.eup %7245 }
0x1fdf   : > { %7247 = vrcp.f32 %v3360_v48  ;;  %v3371_v50 = vadd.f32 1.0, %v7246_v49 }
0x1fe1   : > { %7249 = vrcp.f32 %v3371_v50 }
0x1fec   : > { %v7248_v51 = vpop.eup %7247 }
0x1fed   : > { %v3363_v52 = vmul.f32 %v7248_v51, %v3356_v39  ;;  %v6269_v51 = vld [vmem:[%s7732_s29 + $0x10] sm:$0xf] }
0x1fee   : > { %v7250_v53 = vpop.eup %7249 }
0x1fef   : > { %v3377_v54 = vpack.c.bf16 %v3363_v52, %v3363_v52  ;;  %v3374_v55 = vmul.f32 %v7250_v53, %v3367_v11 }
0x1ff1   : > { %v3389_v7 = vsel %vm9219_vm9, %v3377_v54, 0  ;;  %v3433_v57 = vpack.c.bf16 %v3374_v55, %v3374_v55  ;;  %vm9222_vm9 = vmmov %vm9221_vm6 }
0x1ff2   : > { %6786 = vmatpush3.bf16.msra.mxu1 %v3389_v7 }
0x1ff3   : > { %v3445_v59 = vsel %vm9220_vm3, %v3433_v57, 0  ;;  %6797 = vmatprep.subr.mxu1 %v7678_v1  ;;  %vm9224_vm3 = vcmask 7168  }
0x1ff4   : > { %6792 = vmatpush3.bf16.msra.mxu0 %v3445_v59 }
0x1ff5   : > { %6788 = vmatmul.mubr.msk.bf16.vlgmr.msra.gmra.mxu1 %vm9221_vm6, %v6245_v58  ;;  %6816 = vmatprep.subr.mxu0 %v7678_v1  ;;  %vm9225_vm6 = vcmask 195584  }
0x1ff6   : > { %6798 = vmatpush3.msk.msra.mxu1 %vm8276_vm14, %v7680_v10  ;;  %6813 = vmatprep.mubr.msk.f32.mxu1 %vm9212_vm12, %v7678_v1 }
0x1ff7   : > { %6794 = vmatmul.mubr.msk.bf16.vlgmr.msra.gmra.mxu0 %vm9222_vm9, %v6248_v60  ;;  %6799 = vmatprep.subr.mxu1 %v7678_v1  ;;  %vm9226_vm9 = vcmask 64512  }
0x1ff8   : > { %6800 = vmatpush3.msk.msra.mxu1 %vm8287_vm4, %v7680_v10  ;;  %6817 = vmatpush3.msk.msra.mxu0 %vm8276_vm14, %v7680_v10 }
0x1ff9   : > { %6801 = vmatprep.subr.mxu1 %v7678_v1  ;;  %6818 = vmatprep.subr.mxu0 %v7678_v1 }
0x1ffa   : > { %6802 = vmatpush3.msk.msra.mxu1 %vm8296_vm11, %v7680_v10  ;;  %6819 = vmatpush3.msk.msra.mxu0 %vm8287_vm4, %v7680_v10 }
0x1ffb   : > { %6803 = vmatprep.subr.mxu1 %v7678_v1  ;;  %6820 = vmatprep.subr.mxu0 %v7678_v1 }
0x1ffc   : > { %6804 = vmatpush3.msk.msra.mxu1 %vm8301_vm0, %v7680_v10  ;;  %6821 = vmatpush3.msk.msra.mxu0 %vm8296_vm11, %v7680_v10 }
0x1ffd   : > { %6805 = vmatprep.subr.mxu1 %v7678_v1  ;;  %6822 = vmatprep.subr.mxu0 %v7678_v1 }
0x1ffe   : > { %6806 = vmatpush3.msk.msra.mxu1 %vm8157_vm1, %v7680_v10  ;;  %6823 = vmatpush3.msk.msra.mxu0 %vm8301_vm0, %v7680_v10 }
0x1fff   : > { %6807 = vmatprep.subr.mxu1 %v7678_v1  ;;  %6824 = vmatprep.subr.mxu0 %v7678_v1 }
0x2000   : > { %6808 = vmatpush3.msk.msra.mxu1 %vm8164_vm15, %v7680_v10  ;;  %6825 = vmatpush3.msk.msra.mxu0 %vm8157_vm1, %v7680_v10 }
0x2001   : > { %6809 = vmatprep.subr.mxu1 %v7678_v1  ;;  %6826 = vmatprep.subr.mxu0 %v7678_v1 }
0x2002   : > { %6810 = vmatpush3.msk.msra.mxu1 %vm8051_vm8, %v7680_v10  ;;  %6827 = vmatpush3.msk.msra.mxu0 %vm8164_vm15, %v7680_v10 }
0x2003   : > { %6811 = vmatprep.subr.mxu1 %v7678_v1  ;;  %6828 = vmatprep.subr.mxu0 %v7678_v1 }
0x2004   : > { %6812 = vmatpush3.msk.msra.mxu1 %vm7941_vm5, %v7680_v10  ;;  %6829 = vmatpush3.msk.msra.mxu0 %vm8051_vm8, %v7680_v10 }
0x2005   : > { %6830 = vmatprep.subr.mxu0 %v7678_v1  ;;  %6832 = vmatprep.mubr.msk.f32.mxu0 %vm9212_vm12, %v7678_v1 }
0x2006   : > { %6831 = vmatpush3.msk.msra.mxu0 %vm7941_vm5, %v7680_v10  ;;  %vm9230_vm5 = vcmask 97280  }
0x20b5   : > { %v3425_v61 = vpop.f32.mrf.mxu1 }
0x20b6   : > { %v3426_v20 = vadd.f32 %v3425_v61, %v3383_v19 }
0x20b7   : > { %v3481_v63 = vpop.f32.mrf.mxu0  ;;  %v6789_v0 = vpop.f32.mrf.mxu1 }
0x20b8   : > { %v3482_v4 = vadd.f32 %v3481_v63, %v3439_v62 }
0x20b9   : > { %v6795_v5 = vpop.f32.mrf.mxu0  ;;  %v3428_v6 = vpop.f32.mrf.mxu1 }
0x20ba   : > { %v3487_v9 = vmul.f32 0.5, %v3482_v4 }
0x20bb   : > { %v3484_v12 = vpop.f32.mrf.mxu0  ;;  %v6790_v14 = vpop.f32.mrf.mxu1 }
0x20bc   : > { %v3488_v37 = vmul.f32 1.442695, %v3487_v9 }
0x20bd   : > { %v6796_v16 = vpop.f32.mrf.mxu0 }
0x20be   : > { %7251 = vpow2.f32 %v3488_v37  ;;  %v6279_v16 = vld [vmem:[%s9172_s8 + $0x8] sm:$0x3] }
0x20cb   : > { %v7252_v18 = vpop.eup %7251 }
0x20cc   : > { %v3491_v22 = vmul.f32 %v7252_v18, %v3490_v17 }
0x20ce   : > { %v3492_v23 = vadd.f32 %v3491_v22, %v3426_v20 }
0x20d0   : > { %v3494_v24 = vrot.slane %v3492_v23, 4 }
0x20d2   : > { %v3496_v25 = vsel %vm1224_vm2, %v8368_v56, %v3494_v24  ;;  %v6280_v56 = vld [vmem:[%s9170_s14 + $0x10] sm:$0xf] }
0x20d3   : > { %3570 = vrot.lane.b32.xlu1 %v3496_v25, %s9120_s1  ;;  %6814 = vmatmul.mubr.msk.f32.vlgmr.msra.gmra.mxu1 %vm9116_vm7, %v3496_v25  ;;  %s1159_s1 = scalar_lea.vmem %s9244_s18, %s6429_s22  ;;  %s9280_s18 = sld [smem:[#allocation37_spill]] }
0x20d4   : > { %3716 = vmatprep.mubr.bf16.mxu1 %v7681_v13  ;;  %s9290_s22 = sld [smem:[#allocation40_spill]] }
0x2145   : > { %v3571_v27 = vpop.permute.xlu1 %3570 }
0x2146   : > { %6833 = vmatmul.mubr.msk.f32.vlgmr.msra.gmra.mxu0 %vm9116_vm7, %v3571_v27 }
0x2147   : > { %3791 = vmatprep.mubr.bf16.mxu0 %v7681_v13 }
0x2193   : > { %v3566_v28 = vpop.f32.mrf.mxu1 }
0x2195   : > { %v6815_v3 = vpop.f32.mrf.mxu1 }
0x2206   : > { %v3640_v31 = vpop.f32.mrf.mxu0 }
0x2207   : > { %v7033_v32 = vpack.i.bf16 %v3640_v31, %v3566_v28 }
0x2208   : > { %v6834_v33 = vpop.f32.mrf.mxu0 }
0x2209   : > { %7034 = vrot.lane.b32.xlu1 %v7033_v32, %s9188_s5  ;;  %7029 = vrot.lane.b32.xlu0 %v7033_v32, %s9189_s11 }
0x220d   : > { %3747 = vperm.xlu1 %7026, %v6280_v56   ;;  %3672 = vperm.xlu0 %7027, %v6270_v34  }
0x227b   : > { %v7035_v35 = vpop.permute.xlu1 %7034  ;;  %v7030_v36 = vpop.permute.xlu0 %7029 }
0x227c   : > { %v7037_v38 = vunpack.i.h.bf16 %v7035_v35  ;;  %v7036_v39 = vunpack.i.l.bf16 %v7035_v35  ;;  %v7032_v40 = vunpack.i.h.bf16 %v7030_v36  ;;  %v7031_v41 = vunpack.i.l.bf16 %v7030_v36 }
0x227e   : > { %v3661_v42 = vsel %vm9119_vm13, %v7032_v40, 0.0  ;;  %v3658_v11 = vsel %vm9119_vm13, %v7031_v41, %v7032_v40  ;;  %v3650_v43 = vsel %vm9224_vm3, %v7036_v39, %v7037_v38  ;;  %v6274_v50 = vpack.c.bf16 %v3566_v28, %v7036_v39  ;;  %v6286_v38 = vld [vmem:[%s9166_s24 + $0x10] sm:$0xf] }
0x227f   : > { %v3665_v46 = vpack.c.bf16 %v3661_v42, %v3661_v42  ;;  %v3664_v47 = vpack.c.bf16 %v3658_v11, %v3658_v11  ;;  %v3663_v49 = vpack.c.bf16 %v3640_v31, %v3650_v43 }
0x2281   : > { %6271 = vmatprep.subr.msk.bf16.mxu1 %vm1224_vm2, %v3665_v46  ;;  %v3679_v48 = vsel %vm1224_vm2, %v3664_v47, 0 }
0x2282   : > { %3697 = vmatpush1.bf16.msra.mxu1 %v3679_v48 }
0x2283   : > { %3698 = vmatprep.subr.bf16.mxu1 %v3663_v49 }
0x2286   : > { %6275 = vmatpush1.bf16.msk.msra.mxu1 %vm7963_vm10, %v6274_v50 }
0x2288   : > { %v3673_v52 = vpop.permute.xlu0 %3672  ;;  %v3748_v17 = vpop.permute.xlu1 %3747 }
0x2289   : > { %6276 = vmatmul.mubr.msk.bf16.vlgmr.msra.gmra.mxu1 %vm9225_vm6, %v6269_v51  ;;  %vm9227_vm6 = vmmov %vm9224_vm3 }
0x228a   : > { %3992 = vmatprep.mubr.bf16.mxu1 %v7681_v13 }
0x2349   : > { %v3718_v53 = vpop.f32.mrf.mxu1 }
0x234a   : > { %v3719_v54 = vadd.f32 %v3718_v53, %v3673_v52 }
0x234b   : > { %v3720_v55 = vpop.f32.mrf.mxu1 }
0x234c   : > { %v6277_v7 = vmul.f32 -1.442695, %v3719_v54  ;;  %v3721_v57 = vadd.f32 %v3720_v55, %v3673_v52 }
0x234d   : > { %v3722_v58 = vpop.f32.mrf.mxu1 }
0x234e   : > { %7253 = vpow2.f32 %v6277_v7  ;;  %v6278_v59 = vmul.f32 -1.442695, %v3721_v57 }
0x234f   : > { %v3723_v60 = vpop.f32.mrf.mxu1 }
0x2350   : > { %7255 = vpow2.f32 %v6278_v59 }
0x235b   : > { %v7254_v61 = vpop.eup %7253 }
0x235c   : > { %v3731_v62 = vadd.f32 1.0, %v7254_v61 }
0x235d   : > { %v7256_v63 = vpop.eup %7255 }
0x235e   : > { %7257 = vrcp.f32 %v3731_v62  ;;  %v3732_v0 = vadd.f32 1.0, %v7256_v63 }
0x2360   : > { %7259 = vrcp.f32 %v3732_v0 }
0x236b   : > { %v7258_v4 = vpop.eup %7257 }
0x236c   : > { %v3737_v5 = vmul.f32 %v7258_v4, %v3719_v54 }
0x236d   : > { %v7260_v6 = vpop.eup %7259 }
0x236e   : > { %v3741_v9 = vpack.c.bf16 %v3737_v5, %v3737_v5  ;;  %v3738_v12 = vmul.f32 %v7260_v6, %v3721_v57  ;;  %v6285_v57 = vld [vmem:[%s9169_s19 + $0x8] sm:$0x3] }
0x2370   : > { %v3742_v14 = vpack.c.bf16 %v3738_v12, %v3738_v12  ;;  %v3754_v37 = vsel %vm1224_vm2, %v3741_v9, 0 }
0x2372   : > { %6281 = vmatprep.subr.msk.bf16.mxu0 %vm1224_vm2, %v3742_v14 }
0x2373   : > { %3774 = vmatpush1.bf16.msra.mxu0 %v3754_v37 }
0x2376   : > { %6282 = vmatmul.mubr.msk.bf16.vlgmr.msra.gmra.mxu0 %vm9226_vm9, %v6279_v16  ;;  %vm9228_vm9 = vcmask 1045504  }
0x2377   : > { %3890 = vmatprep.mubr.bf16.mxu0 %v7681_v13  ;;  %vm9229_vm7 = vmmov %vm9228_vm9 }
0x2436   : > { %v3793_v18 = vpop.f32.mrf.mxu0 }
0x2437   : > { %v3794_v19 = vadd.f32 %v3793_v18, %v3748_v17 }
0x2438   : > { %v3795_v20 = vpop.f32.mrf.mxu0 }
0x2439   : > { %v6283_v22 = vmul.f32 -1.442695, %v3794_v19  ;;  %v3796_v23 = vadd.f32 %v3795_v20, %v3748_v17 }
0x243a   : > { %v3797_v24 = vpop.f32.mrf.mxu0 }
0x243b   : > { %7261 = vpow2.f32 %v6283_v22  ;;  %v6284_v25 = vmul.f32 -1.442695, %v3796_v23  ;;  %v6292_v22 = vld [vmem:[%s9173_s6 + $0x20] sm:$0xff]  ;;  %s9313_s6 = scalar_lea.vmem [#allocation4], %s7997_s16 }
0x243c   : > { %v3798_v27 = vpop.f32.mrf.mxu0 }
0x243d   : > { %7263 = vpow2.f32 %v6284_v25 }
0x2448   : > { %v7262_v28 = vpop.eup %7261 }
0x2449   : > { %v3806_v3 = vadd.f32 1.0, %v7262_v28 }
0x244a   : > { %v7264_v31 = vpop.eup %7263 }
0x244b   : > { %7265 = vrcp.f32 %v3806_v3  ;;  %v3807_v32 = vadd.f32 1.0, %v7264_v31 }
0x244d   : > { %7267 = vrcp.f32 %v3807_v32 }
0x2458   : > { %v7266_v33 = vpop.eup %7265 }
0x2459   : > { %v3812_v34 = vmul.f32 %v7266_v33, %v3794_v19 }
0x245a   : > { %v7268_v56 = vpop.eup %7267 }
0x245b   : > { %v3813_v35 = vmul.f32 %v7268_v56, %v3796_v23  ;;  %v3832_v46 = vrot.slane %v3812_v34, 4 }
0x245d   : > { %v7043_v36 = vpack.i.bf16 %v3813_v35, %v3812_v34  ;;  %v3833_v47 = vrot.slane %v3813_v35, 4 }
0x245f   : > { %7044 = vrot.lane.b32.xlu1 %v7043_v36, %s9189_s11  ;;  %7039 = vrot.lane.b32.xlu0 %v7043_v36, %s9188_s5 }
0x2463   : > { %3846 = vperm.xlu0 %7027, %v6286_v38  }
0x24d1   : > { %v7045_v39 = vpop.permute.xlu1 %7044  ;;  %v7040_v40 = vpop.permute.xlu0 %7039 }
0x24d2   : > { %v7047_v41 = vunpack.i.h.bf16 %v7045_v39  ;;  %v7046_v42 = vunpack.i.l.bf16 %v7045_v39  ;;  %v7042_v11 = vunpack.i.h.bf16 %v7040_v40  ;;  %v7041_v43 = vunpack.i.l.bf16 %v7040_v40 }
0x24d4   : > { %v3831_v48 = vsel %vm9119_vm13, %v7047_v41, 0.0  ;;  %v3828_v49 = vsel %vm9119_vm13, %v7046_v42, %v7047_v41  ;;  %v3820_v50 = vsel %vm9224_vm3, %v7041_v43, %v7042_v11  ;;  %v3823_v51 = vsel %vm9227_vm6, 0.0, %v7041_v43  ;;  %v6291_v42 = vld [vmem:[%s7762_s30 + $0x10] sm:$0xf] }
0x24d5   : > { %v3836_v52 = vsel %vm1224_vm2, %v3823_v51, %v3832_v46  ;;  %v3837_v53 = vsel %vm1224_vm2, %v3820_v50, %v3833_v47 }
0x24d6   : > { %v3839_v54 = vpack.c.bf16 %v3831_v48, %v3837_v53  ;;  %v3838_v55 = vpack.c.bf16 %v3828_v49, %v3836_v52 }
0x24d8   : > { %6287 = vmatprep.subr.msk.bf16.mxu0 %vm9228_vm9, %v3839_v54  ;;  %v3853_v7 = vsel %vm9229_vm7, %v3838_v55, 0  ;;  %vm9232_vm7 = vmmov %vm9224_vm3 }
0x24d9   : > { %3873 = vmatpush1.bf16.msra.mxu0 %v3853_v7 }
0x24dc   : > { %6288 = vmatmul.mubr.msk.bf16.vlgmr.msra.gmra.mxu0 %vm9230_vm5, %v6285_v57  ;;  %vm9231_vm5 = vmmov %vm9224_vm3 }
0x24dd   : > { %4087 = vmatprep.mubr.bf16.mxu0 %v7681_v13  ;;  %vm9233_vm3 = vmmov %vm9228_vm9  ;;  %vm9235_vm9 = vcmask 97280  }
0x24de   : > { %v3847_v58 = vpop.permute.xlu0 %3846  ;;  %vm9234_vm6 = vmmov %vm9233_vm3 }
0x259c   : > { %v3892_v59 = vpop.f32.mrf.mxu0 }
0x259d   : > { %v3893_v60 = vadd.f32 %v3892_v59, %v3847_v58 }
0x259e   : > { %v3894_v61 = vpop.f32.mrf.mxu0 }
0x259f   : > { %v6289_v62 = vmul.f32 -1.442695, %v3893_v60  ;;  %v3895_v63 = vadd.f32 %v3894_v61, %v3847_v58 }
0x25a0   : > { %v3896_v0 = vpop.f32.mrf.mxu0 }
0x25a1   : > { %7269 = vpow2.f32 %v6289_v62  ;;  %v6290_v4 = vmul.f32 -1.442695, %v3895_v63  ;;  %v6314_v62 = vld [vmem:[%s9167_s21 + $0x10] sm:$0xf] }
0x25a2   : > { %v3897_v5 = vpop.f32.mrf.mxu0  ;;  %v6310_v0 = vld [vmem:[%s9175_s4 + $0x10] sm:$0xf]  ;;  %s9245_s4 = smov 64  }
0x25a3   : > { %7271 = vpow2.f32 %v6290_v4 }
0x25ae   : > { %v7270_v6 = vpop.eup %7269 }
0x25af   : > { %v3905_v9 = vadd.f32 1.0, %v7270_v6 }
0x25b0   : > { %v7272_v12 = vpop.eup %7271 }
0x25b1   : > { %7273 = vrcp.f32 %v3905_v9  ;;  %v3906_v14 = vadd.f32 1.0, %v7272_v12 }
0x25b3   : > { %7275 = vrcp.f32 %v3906_v14 }
0x25be   : > { %v7274_v37 = vpop.eup %7273 }
0x25bf   : > { %v8523_v17 = vmul.f32 %v7274_v37, %v3893_v60 }
0x25c0   : > { %v7276_v16 = vpop.eup %7275 }
0x25c1   : > { %v8525_v18 = vmul.f32 %v7276_v16, %v3895_v63  ;;  %v3934_v31 = vrot.slane %v8523_v17, 4  ;;  %v6298_v63 = vld [vmem:[%s9168_s20 + $0x20] sm:$0xff] }
0x25c3   : > { %v7053_v19 = vpack.i.bf16 %v8525_v18, %v8523_v17  ;;  %v3915_v20 = vcombine.low %v8523_v17, %v8525_v18  ;;  %v3935_v32 = vrot.slane %v8525_v18, 4 }
0x25c5   : > { %7054 = vrot.lane.b32.xlu0 %v7053_v19, %s9189_s11  ;;  %7049 = vrot.lane.b32.xlu1 %v7053_v19, %s9188_s5  ;;  %3917 = vst [vmem:[%s8533_s10] sm:$0xff] %v3915_v20 }
0x25c9   : > { %3948 = vperm.xlu1 %7026, %v6292_v22  }
0x2637   : > { %v7055_v23 = vpop.permute.xlu0 %7054  ;;  %v7050_v24 = vpop.permute.xlu1 %7049 }
0x2638   : > { %v7057_v25 = vunpack.i.h.bf16 %v7055_v23  ;;  %v7056_v27 = vunpack.i.l.bf16 %v7055_v23  ;;  %v7052_v28 = vunpack.i.h.bf16 %v7050_v24  ;;  %v7051_v3 = vunpack.i.l.bf16 %v7050_v24 }
0x263a   : > { %v3933_v33 = vsel %vm9119_vm13, %v7057_v25, 0.0  ;;  %v3930_v56 = vsel %vm9119_vm13, %v7056_v27, %v7057_v25  ;;  %v3922_v34 = vsel %vm9231_vm5, %v7051_v3, %v7052_v28  ;;  %v3925_v35 = vsel %vm9232_vm7, 0.0, %v7051_v3  ;;  %v6297_v27 = vld [vmem:[%s9171_s12 + $0x10] sm:$0xf] }
0x263b   : > { %v3938_v36 = vsel %vm1224_vm2, %v3925_v35, %v3934_v31  ;;  %v3939_v38 = vsel %vm1224_vm2, %v3922_v34, %v3935_v32  ;;  %vm9236_vm7 = vcmask 195584  }
0x263c   : > { %v3941_v39 = vpack.c.bf16 %v3933_v33, %v3939_v38  ;;  %v3940_v40 = vpack.c.bf16 %v3930_v56, %v3938_v36 }
0x263e   : > { %6293 = vmatprep.subr.msk.bf16.mxu1 %vm9233_vm3, %v3941_v39  ;;  %v3955_v41 = vsel %vm9234_vm6, %v3940_v40, 0  ;;  %vm9237_vm3 = vcmask 1041408  }
0x263f   : > { %3975 = vmatpush1.bf16.msra.mxu1 %v3955_v41  ;;  %vm9238_vm6 = vmmov %vm9237_vm3 }
0x2642   : > { %6294 = vmatmul.mubr.msk.bf16.vlgmr.msra.gmra.mxu1 %vm9235_vm9, %v6291_v42  ;;  %vm9239_vm9 = vmmov %vm9237_vm3 }
0x2643   : > { %4186 = vmatprep.mubr.bf16.mxu1 %v7681_v13 }
0x2644   : > { %v3949_v11 = vpop.permute.xlu1 %3948 }
0x2702   : > { %v3994_v43 = vpop.f32.mrf.mxu1 }
0x2703   : > { %v3995_v46 = vadd.f32 %v3994_v43, %v3949_v11 }
0x2704   : > { %v3996_v47 = vpop.f32.mrf.mxu1 }
0x2705   : > { %v6295_v48 = vmul.f32 -1.442695, %v3995_v46  ;;  %v3997_v49 = vadd.f32 %v3996_v47, %v3949_v11 }
0x2706   : > { %v3998_v50 = vpop.f32.mrf.mxu1 }
0x2707   : > { %7277 = vpow2.f32 %v6295_v48  ;;  %v6296_v51 = vmul.f32 -1.442695, %v3997_v49 }
0x2708   : > { %v3999_v52 = vpop.f32.mrf.mxu1 }
0x2709   : > { %7279 = vpow2.f32 %v6296_v51 }
0x2714   : > { %v7278_v53 = vpop.eup %7277 }
0x2715   : > { %v4007_v54 = vadd.f32 1.0, %v7278_v53 }
0x2716   : > { %v7280_v55 = vpop.eup %7279 }
0x2717   : > { %7281 = vrcp.f32 %v4007_v54  ;;  %v4008_v7 = vadd.f32 1.0, %v7280_v55 }
0x2719   : > { %7283 = vrcp.f32 %v4008_v7 }
0x2724   : > { %v7282_v57 = vpop.eup %7281 }
0x2725   : > { %v4013_v59 = vmul.f32 %v7282_v57, %v3995_v46 }
0x2726   : > { %v7284_v58 = vpop.eup %7283 }
0x2727   : > { %v4014_v60 = vmul.f32 %v7284_v58, %v3997_v49 }
0x2729   : > { %v7063_v61 = vpack.i.bf16 %v4014_v60, %v4013_v59 }
0x272b   : > { %7064 = vrot.lane.b32.xlu1 %v7063_v61, %s9188_s5  ;;  %7059 = vrot.lane.b32.xlu0 %v7063_v61, %s9189_s11 }
0x272f   : > { %4203 = vperm.xlu1 %7026, %v6314_v62   ;;  %4043 = vperm.xlu0 %7027, %v6298_v63  }
0x2733   : > { %4142 = vperm.xlu0 %7027, %v6310_v0  }
0x279d   : > { %v7065_v4 = vpop.permute.xlu1 %7064  ;;  %v7060_v5 = vpop.permute.xlu0 %7059 }
0x279e   : > { %v7067_v6 = vunpack.i.h.bf16 %v7065_v4  ;;  %v7066_v9 = vunpack.i.l.bf16 %v7065_v4  ;;  %v7062_v12 = vunpack.i.h.bf16 %v7060_v5  ;;  %v7061_v14 = vunpack.i.l.bf16 %v7060_v5 }
0x27a0   : > { %v4032_v37 = vsel %vm9119_vm13, %v7062_v12, 0.0  ;;  %v4029_v16 = vsel %vm9119_vm13, %v7061_v14, %v7062_v12  ;;  %v4021_v19 = vsel %vm9231_vm5, %v7066_v9, %v7067_v6  ;;  %v6302_v25 = vpack.c.bf16 %v4013_v59, %v7066_v9  ;;  %vm9240_vm5 = vmmov %vm9237_vm3  ;;  %v6309_v12 = vld [vmem:[%s7782_s27 + $0x8] sm:$0x3] }
0x27a1   : > { %v4036_v20 = vpack.c.bf16 %v4032_v37, %v4032_v37  ;;  %v4035_v22 = vpack.c.bf16 %v4029_v16, %v4029_v16  ;;  %v4034_v24 = vpack.c.bf16 %v4014_v60, %v4021_v19  ;;  %v6313_v14 = vld [vmem:[%s9190_s26 + $0x8] sm:$0x3] }
0x27a3   : > { %6299 = vmatprep.subr.msk.bf16.mxu0 %vm1224_vm2, %v4036_v20  ;;  %v4050_v23 = vsel %vm1224_vm2, %v4035_v22, 0 }
0x27a4   : > { %4068 = vmatpush1.bf16.msra.mxu0 %v4050_v23 }
0x27a5   : > { %4069 = vmatprep.subr.bf16.mxu0 %v4034_v24 }
0x27a8   : > { %6303 = vmatpush1.bf16.msk.msra.mxu0 %vm7963_vm10, %v6302_v25 }
0x27aa   : > { %v4044_v28 = vpop.permute.xlu0 %4043  ;;  %v4204_v16 = vpop.permute.xlu1 %4203 }
0x27ab   : > { %6304 = vmatmul.mubr.msk.bf16.vlgmr.msra.gmra.mxu0 %vm9236_vm7, %v6297_v27  ;;  %vm9241_vm7 = vcmask 31744  }
0x27ac   : > { %4247 = vmatprep.mubr.bf16.mxu0 %v7681_v13  ;;  %vm9242_vm13 = vmmov %vm9241_vm7 }
0x286b   : > { %v4089_v3 = vpop.f32.mrf.mxu0 }
0x286c   : > { %v4090_v31 = vadd.f32 %v4089_v3, %v4044_v28 }
0x286d   : > { %v4091_v32 = vpop.f32.mrf.mxu0 }
0x286e   : > { %v4096_v33 = vadd.f32 %v4090_v31, %v8523_v17  ;;  %v4114_v56 = vrot.slane %v4090_v31, 4  ;;  %v4092_v34 = vadd.f32 %v4091_v32, %v4044_v28 }
0x286f   : > { %v4093_v35 = vpop.f32.mrf.mxu0 }
0x2870   : > { %v6305_v36 = vmul.f32 -1.442695, %v4096_v33  ;;  %v4118_v38 = vadd.f32 %v4114_v56, %v8523_v17  ;;  %v4097_v39 = vadd.f32 %v4092_v34, %v8525_v18  ;;  %v4115_v40 = vrot.slane %v4092_v34, 4  ;;  %v4262_v34 = vld [vmem:[%s1159_s1] sm:$0xff]  ;;  %s9274_s1 = sld [smem:[#allocation38_spill]] }
0x2871   : > { %v4094_v41 = vpop.f32.mrf.mxu0  ;;  %v4264_v35 = vcombine.high %v4262_v34, %v4262_v34 }
0x2872   : > { %7285 = vpow2.f32 %v6305_v36  ;;  %v6307_v42 = vmul.f32 -1.442695, %v4118_v38  ;;  %v6306_v11 = vmul.f32 -1.442695, %v4097_v39  ;;  %v4119_v43 = vadd.f32 %v4115_v40, %v8525_v18 }
0x2874   : > { %7287 = vpow2.f32 %v6307_v42  ;;  %v6308_v46 = vmul.f32 -1.442695, %v4119_v43 }
0x2875   : > { %7289 = vpow2.f32 %v6306_v11 }
0x2876   : > { %7291 = vpow2.f32 %v6308_v46 }
0x287f   : > { %v7286_v47 = vpop.eup %7285 }
0x2880   : > { %v4104_v48 = vadd.f32 1.0, %v7286_v47 }
0x2881   : > { %v7288_v49 = vpop.eup %7287 }
0x2882   : > { %v7290_v50 = vpop.eup %7289  ;;  %7293 = vrcp.f32 %v4104_v48  ;;  %v4126_v51 = vadd.f32 1.0, %v7288_v49 }
0x2883   : > { %v7292_v52 = vpop.eup %7291  ;;  %v4105_v53 = vadd.f32 1.0, %v7290_v50 }
0x2884   : > { %7295 = vrcp.f32 %v4126_v51  ;;  %v4127_v54 = vadd.f32 1.0, %v7292_v52  ;;  %v6368_v52 = vld [vmem:[%s9170_s14 + $0x14] sm:$0xf] }
0x2885   : > { %7297 = vrcp.f32 %v4105_v53 }
0x2886   : > { %7299 = vrcp.f32 %v4127_v54 }
0x288f   : > { %v7294_v55 = vpop.eup %7293 }
0x2890   : > { %v4110_v7 = vmul.f32 %v7294_v55, %v4096_v33 }
0x2891   : > { %v7296_v57 = vpop.eup %7295 }
0x2892   : > { %v7298_v58 = vpop.eup %7297  ;;  %v4132_v59 = vmul.f32 %v7296_v57, %v4118_v38  ;;  %v4136_v61 = vpack.c.bf16 %v4110_v7, %v4110_v7  ;;  %v4143_v38 = vpop.permute.xlu0 %4142 }
0x2893   : > { %v7300_v60 = vpop.eup %7299  ;;  %v4111_v62 = vmul.f32 %v7298_v58, %v4097_v39 }
0x2894   : > { %v4133_v63 = vmul.f32 %v7300_v60, %v4119_v43  ;;  %v4197_v0 = vpack.c.bf16 %v4132_v59, %v4132_v59  ;;  %v4149_v6 = vsel %vm9238_vm6, %v4136_v61, 0 }
0x2895   : > { %v4137_v4 = vpack.c.bf16 %v4111_v62, %v4111_v62 }
0x2896   : > { %v4198_v5 = vpack.c.bf16 %v4133_v63, %v4133_v63  ;;  %v4210_v9 = vsel %vm9240_vm5, %v4197_v0, 0  ;;  %vm9257_vm5 = vcmask 195584  }
0x2897   : > { %6311 = vmatprep.subr.msk.bf16.mxu1 %vm9237_vm3, %v4137_v4  ;;  %vm9246_vm3 = vcmask 523264  }
0x2898   : > { %4169 = vmatpush1.bf16.msra.mxu1 %v4149_v6  ;;  %6315 = vmatprep.subr.msk.bf16.mxu0 %vm9239_vm9, %v4198_v5  ;;  %vm9247_vm6 = vmmov %vm9246_vm3 }
0x2899   : > { %4230 = vmatpush1.bf16.msra.mxu0 %v4210_v9  ;;  %6835 = vmatprep.subr.mxu1 %v7678_v1  ;;  %vm9248_vm9 = vmmov %vm9246_vm3 }
0x289a   : > { %6854 = vmatprep.subr.mxu0 %v7678_v1 }
0x289b   : > { %6312 = vmatmul.mubr.msk.bf16.vlgmr.msra.gmra.mxu1 %vm9241_vm7, %v6309_v12  ;;  %vm9258_vm7 = vmmov %vm9257_vm5 }
0x289c   : > { %6316 = vmatmul.mubr.msk.bf16.vlgmr.msra.gmra.mxu0 %vm9242_vm13, %v6313_v14  ;;  %6836 = vmatpush3.msk.msra.mxu1 %vm8276_vm14, %v7680_v10  ;;  %vm9243_vm13 = vnez %v9185_v8 }
0x289d   : > { %6837 = vmatprep.subr.mxu1 %v7678_v1  ;;  %6851 = vmatprep.mubr.msk.f32.mxu1 %vm9212_vm12, %v7678_v1 }
0x289e   : > { %6838 = vmatpush3.msk.msra.mxu1 %vm8287_vm4, %v7680_v10  ;;  %6855 = vmatpush3.msk.msra.mxu0 %vm8276_vm14, %v7680_v10 }
0x289f   : > { %6839 = vmatprep.subr.mxu1 %v7678_v1  ;;  %6856 = vmatprep.subr.mxu0 %v7678_v1 }
0x28a0   : > { %6840 = vmatpush3.msk.msra.mxu1 %vm8296_vm11, %v7680_v10  ;;  %6857 = vmatpush3.msk.msra.mxu0 %vm8287_vm4, %v7680_v10 }
0x28a1   : > { %6841 = vmatprep.subr.mxu1 %v7678_v1  ;;  %6858 = vmatprep.subr.mxu0 %v7678_v1 }
0x28a2   : > { %6842 = vmatpush3.msk.msra.mxu1 %vm8301_vm0, %v7680_v10  ;;  %6859 = vmatpush3.msk.msra.mxu0 %vm8296_vm11, %v7680_v10 }
0x28a3   : > { %6843 = vmatprep.subr.mxu1 %v7678_v1  ;;  %6860 = vmatprep.subr.mxu0 %v7678_v1 }
0x28a4   : > { %6844 = vmatpush3.msk.msra.mxu1 %vm8157_vm1, %v7680_v10  ;;  %6861 = vmatpush3.msk.msra.mxu0 %vm8301_vm0, %v7680_v10 }
0x28a5   : > { %6845 = vmatprep.subr.mxu1 %v7678_v1  ;;  %6862 = vmatprep.subr.mxu0 %v7678_v1 }
0x28a6   : > { %6846 = vmatpush3.msk.msra.mxu1 %vm8164_vm15, %v7680_v10  ;;  %6863 = vmatpush3.msk.msra.mxu0 %vm8157_vm1, %v7680_v10 }
0x28a7   : > { %6847 = vmatprep.subr.mxu1 %v7678_v1  ;;  %6864 = vmatprep.subr.mxu0 %v7678_v1 }
0x28a8   : > { %6848 = vmatpush3.msk.msra.mxu1 %vm8051_vm8, %v7680_v10  ;;  %6865 = vmatpush3.msk.msra.mxu0 %vm8164_vm15, %v7680_v10 }
0x28a9   : > { %6849 = vmatprep.subr.mxu1 %v7678_v1  ;;  %6866 = vmatprep.subr.mxu0 %v7678_v1 }
0x28aa   : > { %6850 = vmatpush3.msk.msra.mxu1 %vm9243_vm13, %v7680_v10  ;;  %6867 = vmatpush3.msk.msra.mxu0 %vm8051_vm8, %v7680_v10 }
0x28ab   : > { %6873 = vmatprep.subr.mxu1 %v7678_v1  ;;  %6868 = vmatprep.subr.mxu0 %v7678_v1 }
0x28ac   : > { %6869 = vmatpush3.msk.msra.mxu0 %vm9243_vm13, %v7680_v10  ;;  %6870 = vmatprep.mubr.msk.f32.mxu0 %vm9212_vm12, %v7678_v1 }
0x28ad   : > { %6892 = vmatprep.subr.mxu0 %v7678_v1 }
0x295b   : > { %v4188_v37 = vpop.f32.mrf.mxu1 }
0x295c   : > { %v4249_v19 = vpop.f32.mrf.mxu0  ;;  %v4189_v39 = vadd.f32 %v4188_v37, %v4143_v38 }
0x295d   : > { %v4190_v20 = vpop.f32.mrf.mxu1  ;;  %v4250_v22 = vadd.f32 %v4249_v19, %v4204_v16 }
0x295e   : > { %v4251_v23 = vpop.f32.mrf.mxu0  ;;  %v4191_v42 = vadd.f32 %v4190_v20, %v4143_v38 }
0x295f   : > { %v4256_v24 = vmul.f32 0.5, %v4250_v22  ;;  %v4252_v25 = vadd.f32 %v4251_v23, %v4204_v16  ;;  %v4192_v27 = vpop.f32.mrf.mxu1 }
0x2960   : > { %v4253_v28 = vpop.f32.mrf.mxu0 }
0x2961   : > { %v4258_v3 = vmul.f32 1.442695, %v4256_v24  ;;  %v4257_v31 = vmul.f32 0.5, %v4252_v25  ;;  %v4193_v32 = vpop.f32.mrf.mxu1 }
0x2962   : > { %v4254_v33 = vpop.f32.mrf.mxu0 }
0x2963   : > { %7301 = vpow2.f32 %v4258_v3  ;;  %v4260_v56 = vmul.f32 1.442695, %v4257_v31  ;;  %v6353_v31 = vld [vmem:[%s7732_s29 + $0x14] sm:$0xf] }
0x2965   : > { %7303 = vpow2.f32 %v4260_v56 }
0x2970   : > { %v7302_v36 = vpop.eup %7301 }
0x2971   : > { %v4266_v40 = vmul.f32 %v7302_v36, %v4262_v34 }
0x2972   : > { %v7304_v41 = vpop.eup %7303 }
0x2973   : > { %v4268_v11 = vadd.f32 %v4266_v40, %v4189_v39  ;;  %v4267_v43 = vmul.f32 %v7304_v41, %v4264_v35 }
0x2975   : > { %v4272_v46 = vrot.slane %v4268_v11, 4  ;;  %v4269_v47 = vadd.f32 %v4267_v43, %v4191_v42 }
0x2977   : > { %v4276_v48 = vsel %vm1224_vm2, %v8523_v17, %v4272_v46  ;;  %v4273_v49 = vrot.slane %v4269_v47, 4 }
0x2978   : > { %4351 = vrot.lane.b32.xlu1 %v4276_v48, %s9245_s4  ;;  %6852 = vmatmul.mubr.msk.f32.vlgmr.msra.gmra.mxu1 %vm9246_vm3, %v4276_v48 }
0x2979   : > { %6874 = vmatpush3.msk.msra.mxu1 %vm8276_vm14, %v7680_v10  ;;  %v4277_v50 = vsel %vm1224_vm2, %v8525_v18, %v4273_v49  ;;  %6889 = vmatprep.mubr.msk.f32.mxu1 %vm9212_vm12, %v7678_v1 }
0x297a   : > { %6875 = vmatprep.subr.mxu1 %v7678_v1  ;;  %4498 = vrot.lane.b32.xlu0 %v4277_v50, %s9245_s4  ;;  %s8787_s4 = sshll.u32 %s7994_s23, 4 }
0x297b   : > { %6876 = vmatpush3.msk.msra.mxu1 %vm8287_vm4, %v7680_v10  ;;  %s8807_s2 = scalar_lea.vmem [#allocation10], %s8787_s4 }
0x297c   : > { %6877 = vmatprep.subr.mxu1 %v7678_v1 }
0x297d   : > { %6878 = vmatpush3.msk.msra.mxu1 %vm8296_vm11, %v7680_v10 }
0x297e   : > { %6879 = vmatprep.subr.mxu1 %v7678_v1 }
0x297f   : > { %6880 = vmatpush3.msk.msra.mxu1 %vm8301_vm0, %v7680_v10 }
0x2980   : > { %6881 = vmatprep.subr.mxu1 %v7678_v1 }
0x2981   : > { %6882 = vmatpush3.msk.msra.mxu1 %vm8157_vm1, %v7680_v10 }
0x2982   : > { %6883 = vmatprep.subr.mxu1 %v7678_v1 }
0x2983   : > { %6884 = vmatpush3.msk.msra.mxu1 %vm8164_vm15, %v7680_v10 }
0x2984   : > { %6885 = vmatprep.subr.mxu1 %v7678_v1 }
0x2985   : > { %6886 = vmatpush3.msk.msra.mxu1 %vm8051_vm8, %v7680_v10 }
0x2986   : > { %6887 = vmatprep.subr.mxu1 %v7678_v1 }
0x2987   : > { %6888 = vmatpush3.msk.msra.mxu1 %vm9243_vm13, %v7680_v10 }
0x2988   : > { %6890 = vmatmul.mubr.msk.f32.vlgmr.msra.gmra.mxu1 %vm9247_vm6, %v4277_v50 }
0x2989   : > { %4672 = vmatprep.mubr.bf16.mxu1 %v7681_v13 }
0x29ea   : > { %v4352_v17 = vpop.permute.xlu1 %4351 }
0x29eb   : > { %6871 = vmatmul.mubr.msk.f32.vlgmr.msra.gmra.mxu0 %vm9248_vm9, %v4352_v17 }
0x29ec   : > { %6893 = vmatpush3.msk.msra.mxu0 %vm8276_vm14, %v7680_v10  ;;  %6908 = vmatprep.mubr.msk.f32.mxu0 %vm9212_vm12, %v7678_v1  ;;  %v4499_v26 = vpop.permute.xlu0 %4498 }
0x29ed   : > { %6894 = vmatprep.subr.mxu0 %v7678_v1 }
0x29ee   : > { %6895 = vmatpush3.msk.msra.mxu0 %vm8287_vm4, %v7680_v10  ;;  %vm9250_vm4 = vcmask 1039360  }
0x29ef   : > { %6896 = vmatprep.subr.mxu0 %v7678_v1 }
0x29f0   : > { %6897 = vmatpush3.msk.msra.mxu0 %vm8296_vm11, %v7680_v10  ;;  %vm9251_vm11 = vmmov %vm9250_vm4 }
0x29f1   : > { %6898 = vmatprep.subr.mxu0 %v7678_v1 }
0x29f2   : > { %6899 = vmatpush3.msk.msra.mxu0 %vm8301_vm0, %v7680_v10  ;;  %vm9249_vm0 = vmmov %vm9246_vm3 }
0x29f3   : > { %6900 = vmatprep.subr.mxu0 %v7678_v1 }
0x29f4   : > { %6901 = vmatpush3.msk.msra.mxu0 %vm8157_vm1, %v7680_v10  ;;  %vm9253_vm1 = vmmov %vm9250_vm4 }
0x29f5   : > { %6902 = vmatprep.subr.mxu0 %v7678_v1 }
0x29f6   : > { %6903 = vmatpush3.msk.msra.mxu0 %vm8164_vm15, %v7680_v10  ;;  %vm9252_vm15 = vmmov %vm9250_vm4 }
0x29f7   : > { %6904 = vmatprep.subr.mxu0 %v7678_v1 }
0x29f8   : > { %6905 = vmatpush3.msk.msra.mxu0 %vm8051_vm8, %v7680_v10  ;;  %vm9254_vm8 = vcmask 7168  }
0x29f9   : > { %6906 = vmatprep.subr.mxu0 %v7678_v1  ;;  %v6354_v1 = vld [vmem:[%s9174_s3 + $0x28] sm:$0xff]  ;;  %vm9255_vm14 = vmmov %vm9254_vm8 }
0x29fa   : > { %6907 = vmatpush3.msk.msra.mxu0 %vm9243_vm13, %v7680_v10  ;;  %vm9256_vm12 = vmmov %vm9254_vm8 }
0x29fb   : > { %6909 = vmatmul.mubr.msk.f32.vlgmr.msra.gmra.mxu0 %vm9249_vm0, %v4499_v26  ;;  %vm9261_vm3 = vmmov %vm9254_vm8 }
0x29fc   : > { %4713 = vmatprep.mubr.bf16.mxu0 %v7681_v13  ;;  %vm9262_vm6 = vmmov %vm9261_vm3 }
0x29fd   : > { %vm9263_vm9 = vmmov %vm9261_vm3 }
0x29fe   : > { %vm9264_vm0 = vmmov %vm9261_vm3 }
0x2a38   : > { %v4347_v44 = vpop.f32.mrf.mxu1 }
0x2a3a   : > { %v6853_v45 = vpop.f32.mrf.mxu1 }
0x2a48   : > { %v4494_v2 = vpop.f32.mrf.mxu1 }
0x2a4a   : > { %v6891_v29 = vpop.f32.mrf.mxu1 }
0x2aab   : > { %v4421_v30 = vpop.f32.mrf.mxu0 }
0x2aac   : > { %v7068_v15 = vpack.i.bf16 %v4421_v30, %v4347_v44 }
0x2aad   : > { %v6872_v18 = vpop.f32.mrf.mxu0 }
0x2aae   : > { %7069 = vrot.lane.b32.xlu1 %v7068_v15, %s9189_s11 }
0x2ab2   : > { %7074 = vrot.lane.b32.xlu1 %v7068_v15, %s9188_s5 }
0x2ab6   : > { %4622 = vperm.xlu1 %7026, %v6354_v1  }
0x2abb   : > { %v4568_v8 = vpop.f32.mrf.mxu0 }
0x2abc   : > { %v7078_v10 = vpack.i.bf16 %v4568_v8, %v4494_v2 }
0x2abd   : > { %v6910_v51 = vpop.f32.mrf.mxu0 }
0x2abe   : > { %7079 = vrot.lane.b32.xlu0 %v7078_v10, %s9189_s11 }
0x2ac2   : > { %7084 = vrot.lane.b32.xlu0 %v7078_v10, %s9188_s5 }
0x2ac6   : > { %4760 = vperm.xlu0 %7027, %v6368_v52  }
0x2b20   : > { %v7070_v53 = vpop.permute.xlu1 %7069 }
0x2b21   : > { %v7072_v54 = vunpack.i.h.bf16 %v7070_v53  ;;  %v7071_v55 = vunpack.i.l.bf16 %v7070_v53 }
0x2b23   : > { %v4600_v59 = vsel %vm9250_vm4, %v7071_v55, %v7072_v54  ;;  %vm9265_vm4 = vmmov %vm9253_vm1 }
0x2b24   : > { %v7075_v7 = vpop.permute.xlu1 %7074  ;;  %v4612_v63 = vpack.c.bf16 %v4600_v59, %v4600_v59  ;;  %v6367_v59 = vld [vmem:[%s9172_s8 + $0xa] sm:$0x3]  ;;  %s5638_s8 = sshll.u32 %s9313_s6, 4  ;;  %s5639_s8 = int_to_ptr.vmem [resolvable:$true] %s5638_s8 }
0x2b25   : > { %v7077_v57 = vunpack.i.h.bf16 %v7075_v7  ;;  %v7076_v58 = vunpack.i.l.bf16 %v7075_v7 }
0x2b26   : > { %v4629_v20 = vsel %vm1224_vm2, %v4612_v63, 0 }
0x2b27   : > { %v4584_v6 = vsel %vm9254_vm8, %v7076_v58, %v7077_v57  ;;  %v6358_v3 = vpack.c.bf16 %v4347_v44, %v7076_v58  ;;  %vm9268_vm8 = vcmask 1045504  }
0x2b28   : > { %v4609_v23 = vpack.c.bf16 %v4421_v30, %v4584_v6 }
0x2b30   : > { %v7080_v60 = vpop.permute.xlu0 %7079 }
0x2b31   : > { %v7082_v61 = vunpack.i.h.bf16 %v7080_v60  ;;  %v7081_v62 = vunpack.i.l.bf16 %v7080_v60  ;;  %v4623_v32 = vpop.permute.xlu1 %4622 }
0x2b33   : > { %v4607_v0 = vsel %vm9251_vm11, %v7082_v61, 0.0  ;;  %v4601_v4 = vsel %vm9252_vm15, %v7072_v54, %v7081_v62  ;;  %v4602_v5 = vsel %vm9253_vm1, %v7081_v62, %v7082_v61  ;;  %vm9266_vm11 = vmmov %vm9253_vm1 }
0x2b34   : > { %v4615_v9 = vpack.c.bf16 %v4607_v0, %v4607_v0  ;;  %v4613_v12 = vpack.c.bf16 %v4601_v4, %v4601_v4  ;;  %v7085_v14 = vpop.permute.xlu0 %7084  ;;  %v4614_v37 = vpack.c.bf16 %v4602_v5, %v4602_v5  ;;  %vm9267_vm15 = vmmov %vm9253_vm1 }
0x2b35   : > { %v7087_v16 = vunpack.i.h.bf16 %v7085_v14  ;;  %v7086_v19 = vunpack.i.l.bf16 %v7085_v14 }
0x2b36   : > { %6355 = vmatprep.subr.msk.bf16.mxu1 %vm1224_vm2, %v4613_v12  ;;  %6361 = vmatprep.subr.msk.bf16.mxu0 %vm1224_vm2, %v4615_v9  ;;  %v4635_v22 = vsel %vm1224_vm2, %v4614_v37, 0 }
0x2b37   : > { %v4585_v24 = vsel %vm9255_vm14, %v7077_v57, %v7086_v19  ;;  %4653 = vmatpush1.bf16.msra.mxu1 %v4629_v20  ;;  %4694 = vmatpush1.bf16.msra.mxu0 %v4635_v22  ;;  %v4586_v25 = vsel %vm9256_vm12, %v7086_v19, %v7087_v16  ;;  %vm9269_vm14 = vmmov %vm9268_vm8 }
0x2b38   : > { %v4610_v27 = vpack.c.bf16 %v4494_v2, %v4585_v24  ;;  %4654 = vmatprep.subr.bf16.mxu1 %v4609_v23  ;;  %v4611_v28 = vpack.c.bf16 %v4568_v8, %v4586_v25  ;;  %vm9270_vm12 = vmmov %vm9268_vm8 }
0x2b3a   : > { %4695 = vmatprep.subr.bf16.mxu0 %v4611_v28 }
0x2b3b   : > { %6359 = vmatpush1.bf16.msk.msra.mxu1 %vm7963_vm10, %v6358_v3  ;;  %4696 = vmatpush1.bf16.msra.mxu0 %v4610_v27  ;;  %vm9259_vm10 = vcmask 64512  }
0x2b3c   : > { %vm9260_vm13 = vmmov %vm9259_vm10 }
0x2b3e   : > { %6360 = vmatmul.mubr.msk.bf16.vlgmr.msra.gmra.mxu1 %vm9257_vm5, %v6353_v31  ;;  %6362 = vmatmul.mubr.msk.bf16.vlgmr.msra.gmra.mxu0 %vm9258_vm7, %v6353_v31  ;;  %vm9271_vm5 = vmmov %vm9268_vm8  ;;  %vm9272_vm7 = vcmask 97280  }
0x2b3f   : > { %4810 = vmatprep.mubr.bf16.mxu1 %v7681_v13  ;;  %4851 = vmatprep.mubr.bf16.mxu0 %v7681_v13 }
0x2b41   : > { %v4761_v60 = vpop.permute.xlu0 %4760 }
0x2bfe   : > { %v4674_v33 = vpop.f32.mrf.mxu1  ;;  %v4715_v56 = vpop.f32.mrf.mxu0 }
0x2bff   : > { %v4675_v34 = vadd.f32 %v4674_v33, %v4623_v32  ;;  %v4716_v35 = vadd.f32 %v4715_v56, %v4623_v32 }
0x2c00   : > { %v4676_v36 = vpop.f32.mrf.mxu1  ;;  %v4717_v38 = vpop.f32.mrf.mxu0 }
0x2c01   : > { %v6363_v39 = vmul.f32 -1.442695, %v4675_v34  ;;  %v6365_v21 = vmul.f32 -1.442695, %v4716_v35  ;;  %v4677_v40 = vadd.f32 %v4676_v36, %v4623_v32  ;;  %v4718_v41 = vadd.f32 %v4717_v38, %v4623_v32 }
0x2c02   : > { %v4678_v42 = vpop.f32.mrf.mxu1  ;;  %v4719_v11 = vpop.f32.mrf.mxu0 }
0x2c03   : > { %7305 = vpow2.f32 %v6363_v39  ;;  %v6364_v43 = vmul.f32 -1.442695, %v4677_v40  ;;  %v6366_v46 = vmul.f32 -1.442695, %v4718_v41  ;;  %v6378_v11 = vld [vmem:[%s9166_s24 + $0x14] sm:$0xf] }
0x2c04   : > { %7307 = vpow2.f32 %v6365_v21  ;;  %v4679_v47 = vpop.f32.mrf.mxu1  ;;  %v4720_v48 = vpop.f32.mrf.mxu0 }
0x2c05   : > { %7309 = vpow2.f32 %v6364_v43 }
0x2c06   : > { %7311 = vpow2.f32 %v6366_v46 }
0x2c10   : > { %v7306_v49 = vpop.eup %7305 }
0x2c11   : > { %v7308_v50 = vpop.eup %7307  ;;  %v4734_v17 = vadd.f32 1.0, %v7306_v49 }
0x2c12   : > { %v7310_v26 = vpop.eup %7309  ;;  %v4736_v44 = vadd.f32 1.0, %v7308_v50 }
0x2c13   : > { %v7312_v45 = vpop.eup %7311  ;;  %7313 = vrcp.f32 %v4734_v17  ;;  %v4735_v2 = vadd.f32 1.0, %v7310_v26 }
0x2c14   : > { %7315 = vrcp.f32 %v4736_v44  ;;  %v4737_v29 = vadd.f32 1.0, %v7312_v45 }
0x2c15   : > { %7317 = vrcp.f32 %v4735_v2 }
0x2c16   : > { %7319 = vrcp.f32 %v4737_v29 }
0x2c20   : > { %v7314_v30 = vpop.eup %7313 }
0x2c21   : > { %v7316_v15 = vpop.eup %7315  ;;  %v4746_v18 = vmul.f32 %v7314_v30, %v4675_v34 }
0x2c22   : > { %v7318_v1 = vpop.eup %7317  ;;  %v4748_v8 = vmul.f32 %v7316_v15, %v4716_v35 }
0x2c23   : > { %v7320_v10 = vpop.eup %7319  ;;  %v4752_v51 = vpack.c.bf16 %v4746_v18, %v4746_v18  ;;  %v4747_v52 = vmul.f32 %v7318_v1, %v4677_v40 }
0x2c24   : > { %v4754_v53 = vpack.c.bf16 %v4748_v8, %v4748_v8  ;;  %v4749_v54 = vmul.f32 %v7320_v10, %v4718_v41 }
0x2c25   : > { %v4753_v55 = vpack.c.bf16 %v4747_v52, %v4747_v52  ;;  %v4767_v57 = vsel %vm1224_vm2, %v4752_v51, 0 }
0x2c26   : > { %v4755_v7 = vpack.c.bf16 %v4749_v54, %v4749_v54  ;;  %v4773_v58 = vsel %vm1224_vm2, %v4754_v53, 0 }
0x2c27   : > { %6369 = vmatprep.subr.msk.bf16.mxu1 %vm1224_vm2, %v4753_v55 }
0x2c28   : > { %6371 = vmatprep.subr.msk.bf16.mxu0 %vm1224_vm2, %v4755_v7  ;;  %4793 = vmatpush1.bf16.msra.mxu1 %v4767_v57 }
0x2c29   : > { %4834 = vmatpush1.bf16.msra.mxu0 %v4773_v58 }
0x2c2b   : > { %6370 = vmatmul.mubr.msk.bf16.vlgmr.msra.gmra.mxu1 %vm9259_vm10, %v6367_v59  ;;  %vm9273_vm10 = vmmov %vm9272_vm7 }
0x2c2c   : > { %6372 = vmatmul.mubr.msk.bf16.vlgmr.msra.gmra.mxu0 %vm9260_vm13, %v6367_v59  ;;  %4996 = vmatprep.mubr.bf16.mxu1 %v7681_v13  ;;  %vm9275_vm13 = vmmov %vm9264_vm0 }
0x2c2d   : > { %5037 = vmatprep.mubr.bf16.mxu0 %v7681_v13 }
0x2ceb   : > { %v4812_v61 = vpop.f32.mrf.mxu1 }
0x2cec   : > { %v4813_v62 = vadd.f32 %v4812_v61, %v4761_v60  ;;  %v4853_v63 = vpop.f32.mrf.mxu0 }
0x2ced   : > { %v4854_v0 = vadd.f32 %v4853_v63, %v4761_v60  ;;  %v4814_v4 = vpop.f32.mrf.mxu1 }
0x2cee   : > { %v6373_v5 = vmul.f32 -1.442695, %v4813_v62  ;;  %v4815_v6 = vadd.f32 %v4814_v4, %v4761_v60  ;;  %v4855_v9 = vpop.f32.mrf.mxu0 }
0x2cef   : > { %v6375_v12 = vmul.f32 -1.442695, %v4854_v0  ;;  %v4856_v14 = vadd.f32 %v4855_v9, %v4761_v60  ;;  %v4816_v37 = vpop.f32.mrf.mxu1 }
0x2cf0   : > { %7321 = vpow2.f32 %v6373_v5  ;;  %v6374_v16 = vmul.f32 -1.442695, %v4815_v6  ;;  %v4857_v19 = vpop.f32.mrf.mxu0 }
0x2cf1   : > { %7323 = vpow2.f32 %v6375_v12  ;;  %v6376_v20 = vmul.f32 -1.442695, %v4856_v14  ;;  %v4817_v22 = vpop.f32.mrf.mxu1 }
0x2cf2   : > { %7325 = vpow2.f32 %v6374_v16  ;;  %v4858_v23 = vpop.f32.mrf.mxu0 }
0x2cf3   : > { %7327 = vpow2.f32 %v6376_v20 }
0x2cfd   : > { %v7322_v24 = vpop.eup %7321 }
0x2cfe   : > { %v7324_v25 = vpop.eup %7323  ;;  %v4872_v27 = vadd.f32 1.0, %v7322_v24 }
0x2cff   : > { %v7326_v28 = vpop.eup %7325  ;;  %v4874_v3 = vadd.f32 1.0, %v7324_v25 }
0x2d00   : > { %v7328_v31 = vpop.eup %7327  ;;  %7329 = vrcp.f32 %v4872_v27  ;;  %v4873_v32 = vadd.f32 1.0, %v7326_v28 }
0x2d01   : > { %7331 = vrcp.f32 %v4874_v3  ;;  %v4875_v33 = vadd.f32 1.0, %v7328_v31 }
0x2d02   : > { %7333 = vrcp.f32 %v4873_v32 }
0x2d03   : > { %7335 = vrcp.f32 %v4875_v33 }
0x2d0d   : > { %v7330_v56 = vpop.eup %7329 }
0x2d0e   : > { %v7332_v34 = vpop.eup %7331  ;;  %v4884_v38 = vmul.f32 %v7330_v56, %v4813_v62 }
0x2d0f   : > { %v7334_v35 = vpop.eup %7333  ;;  %v4886_v21 = vmul.f32 %v7332_v34, %v4854_v0 }
0x2d10   : > { %v7336_v36 = vpop.eup %7335  ;;  %v4885_v39 = vmul.f32 %v7334_v35, %v4815_v6  ;;  %v4924_v17 = vrot.slane %v4884_v38, 4  ;;  %v6377_v6 = vld [vmem:[%s9169_s19 + $0xa] sm:$0x3]  ;;  %s7686_s19 = smov [#allocation4]  }
0x2d11   : > { %v4887_v40 = vmul.f32 %v7336_v36, %v4856_v14  ;;  %v4926_v44 = vrot.slane %v4886_v21, 4  ;;  %s7389_s20 = sshll.u32 %s7686_s19, 4  ;;  %s7390_s20 = int_to_ptr.vmem [resolvable:$false] %s7389_s20 }
0x2d12   : > { %v7088_v41 = vpack.i.bf16 %v4885_v39, %v4884_v38  ;;  %v4925_v15 = vrot.slane %v4885_v39, 4  ;;  %s7391_s21 = scalar_lea.vmem %s7390_s20, 128  ;;  %p7392_p0 = scmp.lt.s32.totalorder %s5639_s8, %s7390_s20 }
0x2d13   : > { %v7098_v42 = vpack.i.bf16 %v4887_v40, %v4886_v21  ;;  %v4927_v18 = vrot.slane %v4887_v40, 4 }
0x2d14   : > { %7089 = vrot.lane.b32.xlu1 %v7088_v41, %s9188_s5 }
0x2d15   : > { %7099 = vrot.lane.b32.xlu0 %v7098_v42, %s9188_s5 }
0x2d18   : > { %7094 = vrot.lane.b32.xlu1 %v7088_v41, %s9189_s11 }
0x2d19   : > { %7104 = vrot.lane.b32.xlu0 %v7098_v42, %s9189_s11 }
0x2d1c   : > { %4946 = vperm.xlu1 %7026, %v6378_v11  }
0x2d86   : > { %v7090_v43 = vpop.permute.xlu1 %7089 }
0x2d87   : > { %v7100_v46 = vpop.permute.xlu0 %7099  ;;  %v7092_v47 = vunpack.i.h.bf16 %v7090_v43  ;;  %v7091_v48 = vunpack.i.l.bf16 %v7090_v43 }
0x2d88   : > { %v7102_v49 = vunpack.i.h.bf16 %v7100_v46  ;;  %v7101_v50 = vunpack.i.l.bf16 %v7100_v46 }
0x2d89   : > { %v4907_v26 = vsel %vm9261_vm3, 0.0, %v7091_v48  ;;  %v4900_v29 = vsel %vm9264_vm0, %v7091_v48, %v7092_v47  ;;  %vm9276_vm3 = vmmov %vm9264_vm0 }
0x2d8a   : > { %v4902_v45 = vsel %vm9262_vm6, %v7101_v50, %v7102_v49  ;;  %v4901_v2 = vsel %vm9263_vm9, %v7092_v47, %v7101_v50  ;;  %v7095_v30 = vpop.permute.xlu1 %7094  ;;  %v4932_v51 = vsel %vm1224_vm2, %v4907_v26, %v4924_v17  ;;  %v4933_v7 = vsel %vm1224_vm2, %v4900_v29, %v4925_v15  ;;  %vm9277_vm6 = vmmov %vm9264_vm0 }
0x2d8b   : > { %v7105_v1 = vpop.permute.xlu0 %7104  ;;  %v7097_v8 = vunpack.i.h.bf16 %v7095_v30  ;;  %v7096_v10 = vunpack.i.l.bf16 %v7095_v30  ;;  %v4935_v54 = vsel %vm1224_vm2, %v4902_v45, %v4927_v18  ;;  %v4934_v57 = vsel %vm1224_vm2, %v4901_v2, %v4926_v44  ;;  %v5133_v45 = vld [vmem:[%s9274_s1] sm:$0xf]  ;;  %vm9278_vm9 = vmmov %vm9264_vm0  ;;  %s9291_s1 = sld [smem:[#allocation42_spill]] }
0x2d8c   : > { %v7107_v52 = vunpack.i.h.bf16 %v7105_v1  ;;  %v7106_v53 = vunpack.i.l.bf16 %v7105_v1  ;;  %vm9279_vm0 = vmmov %vm9253_vm1 }
0x2d8d   : > { %v4916_v55 = vsel %vm9265_vm4, %v7096_v10, %v7097_v8  ;;  %vm9281_vm4 = vmmov %vm9279_vm0 }
0x2d8e   : > { %v4923_v58 = vsel %vm9266_vm11, %v7107_v52, 0.0  ;;  %v4918_v59 = vsel %vm9267_vm15, %v7106_v53, %v7107_v52  ;;  %v4917_v60 = vsel %vm9253_vm1, %v7097_v8, %v7106_v53  ;;  %v4936_v61 = vpack.c.bf16 %v4916_v55, %v4932_v51  ;;  %vm9282_vm11 = vmmov %vm9279_vm0 }
0x2d8f   : > { %v4939_v62 = vpack.c.bf16 %v4923_v58, %v4935_v54  ;;  %v4937_v63 = vpack.c.bf16 %v4917_v60, %v4933_v7  ;;  %v4938_v0 = vpack.c.bf16 %v4918_v59, %v4934_v57  ;;  %vm9283_vm15 = vmmov %vm9279_vm0 }
0x2d90   : > { %v4953_v4 = vsel %vm9268_vm8, %v4936_v61, 0  ;;  %vm9284_vm1 = vmmov %vm9271_vm5 }
0x2d91   : > { %6379 = vmatprep.subr.msk.bf16.mxu1 %vm9269_vm14, %v4937_v63  ;;  %6381 = vmatprep.subr.msk.bf16.mxu0 %vm9270_vm12, %v4939_v62  ;;  %v4959_v5 = vsel %vm9271_vm5, %v4938_v0, 0  ;;  %vm9285_vm8 = vmmov %vm9284_vm1 }
0x2d92   : > { %4979 = vmatpush1.bf16.msra.mxu1 %v4953_v4  ;;  %5020 = vmatpush1.bf16.msra.mxu0 %v4959_v5  ;;  %vm9286_vm14 = vmmov %vm9284_vm1 }
0x2d93   : > { %vm9287_vm12 = vmmov %vm9284_vm1 }
0x2d94   : > { %vm9288_vm5 = vmmov %vm9272_vm7 }
0x2d95   : > { %6380 = vmatmul.mubr.msk.bf16.vlgmr.msra.gmra.mxu1 %vm9272_vm7, %v6377_v6  ;;  %6382 = vmatmul.mubr.msk.bf16.vlgmr.msra.gmra.mxu0 %vm9273_vm10, %v6377_v6  ;;  %vm9289_vm7 = vmmov %vm9288_vm5 }
0x2d96   : > { %5186 = vmatprep.mubr.bf16.mxu1 %v7681_v13  ;;  %5227 = vmatprep.mubr.bf16.mxu0 %v7681_v13  ;;  %vm9292_vm10 = vmmov %vm9276_vm3 }
0x2d97   : > { %v4947_v9 = vpop.permute.xlu1 %4946 }
0x2e55   : > { %v4998_v12 = vpop.f32.mrf.mxu1  ;;  %v5039_v14 = vpop.f32.mrf.mxu0 }
0x2e56   : > { %v4999_v37 = vadd.f32 %v4998_v12, %v4947_v9  ;;  %v5040_v16 = vadd.f32 %v5039_v14, %v4947_v9 }
0x2e57   : > { %v5000_v19 = vpop.f32.mrf.mxu1  ;;  %v5041_v20 = vpop.f32.mrf.mxu0 }
0x2e58   : > { %v6383_v22 = vmul.f32 -1.442695, %v4999_v37  ;;  %v6385_v23 = vmul.f32 -1.442695, %v5040_v16  ;;  %v5001_v24 = vadd.f32 %v5000_v19, %v4947_v9  ;;  %v5042_v25 = vadd.f32 %v5041_v20, %v4947_v9 }
0x2e59   : > { %v5002_v27 = vpop.f32.mrf.mxu1  ;;  %v5043_v28 = vpop.f32.mrf.mxu0 }
0x2e5a   : > { %7337 = vpow2.f32 %v6383_v22  ;;  %v6384_v3 = vmul.f32 -1.442695, %v5001_v24  ;;  %v6386_v31 = vmul.f32 -1.442695, %v5042_v25 }
0x2e5b   : > { %7339 = vpow2.f32 %v6385_v23  ;;  %v5003_v32 = vpop.f32.mrf.mxu1  ;;  %v5044_v33 = vpop.f32.mrf.mxu0 }
0x2e5c   : > { %7341 = vpow2.f32 %v6384_v3 }
0x2e5d   : > { %7343 = vpow2.f32 %v6386_v31 }
0x2e67   : > { %v7338_v56 = vpop.eup %7337 }
0x2e68   : > { %v7340_v34 = vpop.eup %7339  ;;  %v5058_v35 = vadd.f32 1.0, %v7338_v56 }
0x2e69   : > { %v7342_v36 = vpop.eup %7341  ;;  %v5060_v38 = vadd.f32 1.0, %v7340_v34 }
0x2e6a   : > { %v7344_v39 = vpop.eup %7343  ;;  %7345 = vrcp.f32 %v5058_v35  ;;  %v5059_v21 = vadd.f32 1.0, %v7342_v36 }
0x2e6b   : > { %7347 = vrcp.f32 %v5060_v38  ;;  %v5061_v40 = vadd.f32 1.0, %v7344_v39 }
0x2e6c   : > { %7349 = vrcp.f32 %v5059_v21 }
0x2e6d   : > { %7351 = vrcp.f32 %v5061_v40 }
0x2e77   : > { %v7346_v41 = vpop.eup %7345 }
0x2e78   : > { %v7348_v42 = vpop.eup %7347  ;;  %v8789_v46 = vmul.f32 %v7346_v41, %v4999_v37 }
0x2e79   : > { %v7350_v11 = vpop.eup %7349  ;;  %v8793_v48 = vmul.f32 %v7348_v42, %v5040_v16 }
0x2e7a   : > { %v7352_v43 = vpop.eup %7351  ;;  %v8791_v47 = vmul.f32 %v7350_v11, %v5001_v24  ;;  %v5116_v10 = vrot.slane %v8789_v46, 4  ;;  %v5132_v24 = vld [vmem:[%s9280_s18] sm:$0x3]  ;;  %s9305_s18 = sld [smem:[#allocation44_spill]] }
0x2e7b   : > { %v8795_v49 = vmul.f32 %v7352_v43, %v5042_v25  ;;  %v5118_v55 = vrot.slane %v8793_v48, 4 }
0x2e7c   : > { %v7108_v50 = vpack.i.bf16 %v8791_v47, %v8789_v46  ;;  %v5078_v17 = vcombine.low %v8789_v46, %v8791_v47  ;;  %v5117_v58 = vrot.slane %v8791_v47, 4 }
0x2e7d   : > { %v7118_v26 = vpack.i.bf16 %v8795_v49, %v8793_v48  ;;  %v5079_v44 = vcombine.low %v8793_v48, %v8795_v49  ;;  %v5119_v7 = vrot.slane %v8795_v49, 4 }
0x2e7e   : > { %7109 = vrot.lane.b32.xlu0 %v7108_v50, %s9188_s5  ;;  %5082 = vst [vmem:[%s8807_s2] sm:$0xff] %v5078_v17 }
0x2e7f   : > { %7119 = vrot.lane.b32.xlu1 %v7118_v26, %s9188_s5  ;;  %5083 = vst [vmem:[%s8807_s2 + $0x8] sm:$0xff] %v5079_v44 }
0x2e82   : > { %7114 = vrot.lane.b32.xlu0 %v7108_v50, %s9189_s11 }
0x2e83   : > { %7124 = vrot.lane.b32.xlu1 %v7118_v26, %s9189_s11 }
0x2e86   : > { %5136 = vperm.xlu0 %7027, %v5133_v45  }
0x2ef0   : > { %v7110_v2 = vpop.permute.xlu0 %7109 }
0x2ef1   : > { %v7120_v29 = vpop.permute.xlu1 %7119  ;;  %v7112_v30 = vunpack.i.h.bf16 %v7110_v2  ;;  %v7111_v15 = vunpack.i.l.bf16 %v7110_v2 }
0x2ef2   : > { %v7122_v18 = vunpack.i.h.bf16 %v7120_v29  ;;  %v7121_v1 = vunpack.i.l.bf16 %v7120_v29 }
0x2ef3   : > { %v5099_v8 = vsel %vm9275_vm13, 0.0, %v7111_v15  ;;  %v5092_v53 = vsel %vm9278_vm9, %v7111_v15, %v7112_v30  ;;  %vm9293_vm13 = vmmov %vm9276_vm3 }
0x2ef4   : > { %v5094_v51 = vsel %vm9276_vm3, %v7121_v1, %v7122_v18  ;;  %v5093_v52 = vsel %vm9277_vm6, %v7112_v30, %v7121_v1  ;;  %v7115_v54 = vpop.permute.xlu0 %7114  ;;  %v5124_v61 = vsel %vm1224_vm2, %v5099_v8, %v5116_v10  ;;  %v5125_v5 = vsel %vm1224_vm2, %v5092_v53, %v5117_v58  ;;  %vm9294_vm6 = vmmov %vm9276_vm3 }
0x2ef5   : > { %v7125_v57 = vpop.permute.xlu1 %7124  ;;  %v7117_v59 = vunpack.i.h.bf16 %v7115_v54  ;;  %v7116_v60 = vunpack.i.l.bf16 %v7115_v54  ;;  %v5127_v0 = vsel %vm1224_vm2, %v5094_v51, %v5119_v7  ;;  %v5126_v6 = vsel %vm1224_vm2, %v5093_v52, %v5118_v55  ;;  %v5317_v54 = vld [vmem:[%s9290_s22] sm:$0xf]  ;;  %vm9295_vm9 = vmmov %vm9279_vm0  ;;  %s9306_s22 = sld [smem:[#allocation46_spill]] }
0x2ef6   : > { %v7127_v62 = vunpack.i.h.bf16 %v7125_v57  ;;  %v7126_v63 = vunpack.i.l.bf16 %v7125_v57  ;;  %v5429_v55 = vld [vmem:[%s9291_s1] sm:$0xf]  ;;  %s8879_s1 = sand.u32 1, %s7890_s0  }
0x2ef7   : > { %v5108_v4 = vsel %vm9279_vm0, %v7116_v60, %v7117_v59 }
0x2ef8   : > { %v5115_v9 = vsel %vm9281_vm4, %v7127_v62, 0.0  ;;  %v5110_v12 = vsel %vm9282_vm11, %v7126_v63, %v7127_v62  ;;  %v5109_v14 = vsel %vm9283_vm15, %v7117_v59, %v7126_v63  ;;  %v5128_v37 = vpack.c.bf16 %v5108_v4, %v5124_v61  ;;  %vm9297_vm4 = vmmov %vm9279_vm0 }
0x2ef9   : > { %v5131_v16 = vpack.c.bf16 %v5115_v9, %v5127_v0  ;;  %v5129_v19 = vpack.c.bf16 %v5109_v14, %v5125_v5  ;;  %v5130_v20 = vpack.c.bf16 %v5110_v12, %v5126_v6  ;;  %vm9298_vm11 = vmmov %vm9279_vm0 }
0x2efa   : > { %v5143_v22 = vsel %vm9284_vm1, %v5128_v37, 0  ;;  %vm9299_vm15 = vmmov %vm9284_vm1 }
0x2efb   : > { %6387 = vmatprep.subr.msk.bf16.mxu1 %vm9285_vm8, %v5129_v19  ;;  %6389 = vmatprep.subr.msk.bf16.mxu0 %vm9286_vm14, %v5131_v16  ;;  %v5149_v23 = vsel %vm9287_vm12, %v5130_v20, 0  ;;  %vm9300_vm8 = vmmov %vm9284_vm1 }
0x2efc   : > { %5169 = vmatpush1.bf16.msra.mxu1 %v5143_v22  ;;  %5210 = vmatpush1.bf16.msra.mxu0 %v5149_v23  ;;  %vm9301_vm14 = vmmov %vm9284_vm1 }
0x2eff   : > { %6388 = vmatmul.mubr.msk.bf16.vlgmr.msra.gmra.mxu1 %vm9288_vm5, %v5132_v24  ;;  %6390 = vmatmul.mubr.msk.bf16.vlgmr.msra.gmra.mxu0 %vm9289_vm7, %v5132_v24 }
0x2f00   : > { %5370 = vmatprep.mubr.bf16.mxu1 %v7681_v13  ;;  %5411 = vmatprep.mubr.bf16.mxu0 %v7681_v13 }
0x2f01   : > { %v5137_v25 = vpop.permute.xlu0 %5136 }
0x2fbf   : > { %v5188_v27 = vpop.f32.mrf.mxu1  ;;  %v5229_v28 = vpop.f32.mrf.mxu0 }
0x2fc0   : > { %v5189_v3 = vadd.f32 %v5188_v27, %v5137_v25  ;;  %v5230_v31 = vadd.f32 %v5229_v28, %v5137_v25 }
0x2fc1   : > { %v5190_v32 = vpop.f32.mrf.mxu1  ;;  %v5231_v33 = vpop.f32.mrf.mxu0 }
0x2fc2   : > { %v6391_v56 = vmul.f32 -1.442695, %v5189_v3  ;;  %v6393_v34 = vmul.f32 -1.442695, %v5230_v31  ;;  %v5191_v35 = vadd.f32 %v5190_v32, %v5137_v25  ;;  %v5232_v36 = vadd.f32 %v5231_v33, %v5137_v25 }
0x2fc3   : > { %v5192_v38 = vpop.f32.mrf.mxu1  ;;  %v5233_v39 = vpop.f32.mrf.mxu0 }
0x2fc4   : > { %7353 = vpow2.f32 %v6391_v56  ;;  %v6392_v21 = vmul.f32 -1.442695, %v5191_v35  ;;  %v6394_v40 = vmul.f32 -1.442695, %v5232_v36 }
0x2fc5   : > { %7355 = vpow2.f32 %v6393_v34  ;;  %v5193_v41 = vpop.f32.mrf.mxu1  ;;  %v5234_v42 = vpop.f32.mrf.mxu0 }
0x2fc6   : > { %7357 = vpow2.f32 %v6392_v21 }
0x2fc7   : > { %7359 = vpow2.f32 %v6394_v40 }
0x2fd1   : > { %v7354_v11 = vpop.eup %7353 }
0x2fd2   : > { %v7356_v43 = vpop.eup %7355  ;;  %v5248_v50 = vadd.f32 1.0, %v7354_v11 }
0x2fd3   : > { %v7358_v17 = vpop.eup %7357  ;;  %v5250_v26 = vadd.f32 1.0, %v7356_v43 }
0x2fd4   : > { %v7360_v44 = vpop.eup %7359  ;;  %7361 = vrcp.f32 %v5248_v50  ;;  %v5249_v45 = vadd.f32 1.0, %v7358_v17 }
0x2fd5   : > { %7363 = vrcp.f32 %v5250_v26  ;;  %v5251_v2 = vadd.f32 1.0, %v7360_v44 }
0x2fd6   : > { %7365 = vrcp.f32 %v5249_v45 }
0x2fd7   : > { %7367 = vrcp.f32 %v5251_v2 }
0x2fe1   : > { %v7362_v29 = vpop.eup %7361 }
0x2fe2   : > { %v7364_v30 = vpop.eup %7363  ;;  %v5260_v1 = vmul.f32 %v7362_v29, %v5189_v3 }
0x2fe3   : > { %v7366_v15 = vpop.eup %7365  ;;  %v5262_v10 = vmul.f32 %v7364_v30, %v5230_v31 }
0x2fe4   : > { %v7368_v18 = vpop.eup %7367  ;;  %v5261_v8 = vmul.f32 %v7366_v15, %v5191_v35  ;;  %v5300_v62 = vrot.slane %v5260_v1, 4 }
0x2fe5   : > { %v5263_v51 = vmul.f32 %v7368_v18, %v5232_v36  ;;  %v5302_v0 = vrot.slane %v5262_v10, 4 }
0x2fe6   : > { %v7128_v52 = vpack.i.bf16 %v5261_v8, %v5260_v1  ;;  %v5301_v12 = vrot.slane %v5261_v8, 4 }
0x2fe7   : > { %v7138_v53 = vpack.i.bf16 %v5263_v51, %v5262_v10  ;;  %v5303_v14 = vrot.slane %v5263_v51, 4 }
0x2fe8   : > { %7129 = vrot.lane.b32.xlu1 %v7128_v52, %s9188_s5 }
0x2fe9   : > { %7139 = vrot.lane.b32.xlu0 %v7138_v53, %s9188_s5  ;;  %s9296_s5 = sld [smem:[#allocation39_spill]] }
0x2fec   : > { %7134 = vrot.lane.b32.xlu1 %v7128_v52, %s9189_s11 }
0x2fed   : > { %7144 = vrot.lane.b32.xlu0 %v7138_v53, %s9189_s11  ;;  %s9304_s11 = sld [smem:[#allocation41_spill]] }
0x2fef   : > { %v5316_v39 = vld [vmem:[%s9296_s5] sm:$0x3]  ;;  %s8882_s5 = sshll.u32 %s7890_s0, 6 }
0x2ff0   : > { %5320 = vperm.xlu1 %7026, %v5317_v54   ;;  %s8886_s3 = scalar_lea.hbm %s9305_s18, %s8882_s5  ;;  %s8892_s12 = scalar_lea.hbm %s9306_s22, %s8882_s5 }
0x2ff1   : > { %5432 = vperm.xlu0 %7027, %v5429_v55  }
0x305a   : > { %v7130_v7 = vpop.permute.xlu1 %7129 }
0x305b   : > { %v7140_v57 = vpop.permute.xlu0 %7139  ;;  %v7132_v58 = vunpack.i.h.bf16 %v7130_v7  ;;  %v7131_v59 = vunpack.i.l.bf16 %v7130_v7 }
0x305c   : > { %v7142_v60 = vunpack.i.h.bf16 %v7140_v57  ;;  %v7141_v61 = vunpack.i.l.bf16 %v7140_v57 }
0x305d   : > { %v5283_v63 = vsel %vm9292_vm10, 0.0, %v7131_v59  ;;  %v5276_v6 = vsel %vm9294_vm6, %v7131_v59, %v7132_v58 }
0x305e   : > { %v5278_v4 = vsel %vm9293_vm13, %v7141_v61, %v7142_v60  ;;  %v5277_v5 = vsel %vm9276_vm3, %v7132_v58, %v7141_v61  ;;  %v7135_v9 = vpop.permute.xlu1 %7134  ;;  %v5308_v20 = vsel %vm1224_vm2, %v5283_v63, %v5300_v62  ;;  %v5309_v27 = vsel %vm1224_vm2, %v5276_v6, %v5301_v12 }
0x305f   : > { %v7145_v37 = vpop.permute.xlu0 %7144  ;;  %v7137_v16 = vunpack.i.h.bf16 %v7135_v9  ;;  %v7136_v19 = vunpack.i.l.bf16 %v7135_v9  ;;  %v5311_v24 = vsel %vm1224_vm2, %v5278_v4, %v5303_v14  ;;  %v5310_v28 = vsel %vm1224_vm2, %v5277_v5, %v5302_v0  ;;  %vm9302_vm2 = vmmov %vm9288_vm5 }
0x3060   : > { %v7147_v22 = vunpack.i.h.bf16 %v7145_v37  ;;  %v7146_v23 = vunpack.i.l.bf16 %v7145_v37  ;;  %vm9303_vm12 = vmmov %vm9302_vm2  ;;  %vm9307_vm5 = vcmask 1041408   ;;  %vm9311_vm3 = vcmask 31744  }
0x3061   : > { %v5292_v25 = vsel %vm9295_vm9, %v7136_v19, %v7137_v16  ;;  %vm9308_vm7 = vmmov %vm9307_vm5 }
0x3062   : > { %v5299_v3 = vsel %vm9279_vm0, %v7147_v22, 0.0  ;;  %v5294_v31 = vsel %vm9297_vm4, %v7146_v23, %v7147_v22  ;;  %v5293_v32 = vsel %vm9298_vm11, %v7137_v16, %v7146_v23  ;;  %v5312_v33 = vpack.c.bf16 %v5292_v25, %v5308_v20  ;;  %vm9309_vm10 = vmmov %vm9307_vm5 }
0x3063   : > { %v5315_v56 = vpack.c.bf16 %v5299_v3, %v5311_v24  ;;  %v5313_v34 = vpack.c.bf16 %v5293_v32, %v5309_v27  ;;  %v5314_v35 = vpack.c.bf16 %v5294_v31, %v5310_v28  ;;  %vm9310_vm13 = vmmov %vm9307_vm5 }
0x3064   : > { %v5327_v36 = vsel %vm9299_vm15, %v5312_v33, 0  ;;  %vm9312_vm6 = vmmov %vm9311_vm3 }
0x3065   : > { %6395 = vmatprep.subr.msk.bf16.mxu1 %vm9284_vm1, %v5313_v34  ;;  %6397 = vmatprep.subr.msk.bf16.mxu0 %vm9300_vm8, %v5315_v56  ;;  %v5333_v38 = vsel %vm9301_vm14, %v5314_v35, 0 }
0x3066   : > { %5353 = vmatpush1.bf16.msra.mxu1 %v5327_v36  ;;  %5394 = vmatpush1.bf16.msra.mxu0 %v5333_v38 }
0x3069   : > { %6396 = vmatmul.mubr.msk.bf16.vlgmr.msra.gmra.mxu1 %vm9302_vm2, %v5316_v39  ;;  %6398 = vmatmul.mubr.msk.bf16.vlgmr.msra.gmra.mxu0 %vm9303_vm12, %v5316_v39 }
0x306a   : > { %5482 = vmatprep.mubr.bf16.mxu1 %v7681_v13  ;;  %5523 = vmatprep.mubr.bf16.mxu0 %v7681_v13 }
0x306b   : > { %v5321_v21 = vpop.permute.xlu1 %5320 }
0x3129   : > { %v5372_v40 = vpop.f32.mrf.mxu1  ;;  %v5413_v41 = vpop.f32.mrf.mxu0 }
0x312a   : > { %v5373_v42 = vadd.f32 %v5372_v40, %v5321_v21  ;;  %v5414_v11 = vadd.f32 %v5413_v41, %v5321_v21 }
0x312b   : > { %v5374_v43 = vpop.f32.mrf.mxu1  ;;  %v5415_v50 = vpop.f32.mrf.mxu0 }
0x312c   : > { %v5420_v17 = vadd.f32 %v5373_v42, %v8789_v46  ;;  %v5422_v26 = vadd.f32 %v5414_v11, %v8793_v48  ;;  %v5375_v44 = vadd.f32 %v5374_v43, %v5321_v21  ;;  %v5416_v45 = vadd.f32 %v5415_v50, %v5321_v21 }
0x312d   : > { %v5376_v2 = vpop.f32.mrf.mxu1  ;;  %v5417_v29 = vpop.f32.mrf.mxu0 }
0x312e   : > { %v5425_v30 = vpack.c.bf16 %v5420_v17, %v5420_v17  ;;  %v5427_v15 = vpack.c.bf16 %v5422_v26, %v5422_v26  ;;  %v5421_v13 = vadd.f32 %v5375_v44, %v8791_v47  ;;  %v5423_v18 = vadd.f32 %v5416_v45, %v8795_v49  ;;  %v5424_v47 = vld [vmem:[%s9304_s11] sm:$0x3]  ;;  %s7385_s11 = scalar_lea.vmem %s5639_s8, 64 }
0x312f   : > { %v5377_v1 = vpop.f32.mrf.mxu1  ;;  %v5418_v8 = vpop.f32.mrf.mxu0  ;;  %p7386_p11 = scmp.ne.s32.totalorder %s5639_s8, %s7385_s11  ;;  %p7393_p1 = scmp.lt.s32.totalorder %s7391_s21, %s7385_s11 }
0x3130   : > { %v5426_v46 = vpack.c.bf16 %v5421_v13, %v5421_v13  ;;  %v5428_v48 = vpack.c.bf16 %v5423_v18, %v5423_v18  ;;  %v5439_v10 = vsel %vm9309_vm10, %v5425_v30, 0  ;;  %v5445_v51 = vsel %vm9310_vm13, %v5427_v15, 0 }
0x3131   : > { %p7387_p12 = pnand %p7386_p11, %p7909_p5  ;;  %p7394_p2 = por %p7393_p1, %p7392_p0 }
0x3132   : > { %6399 = vmatprep.subr.msk.bf16.mxu1 %vm9307_vm5, %v5426_v46  ;;  %6401 = vmatprep.subr.msk.bf16.mxu0 %vm9308_vm7, %v5428_v48 }
0x3133   : > { %5465 = vmatpush1.bf16.msra.mxu1 %v5439_v10  ;;  %5506 = vmatpush1.bf16.msra.mxu0 %v5445_v51  ;;  %p7388_p13 = pneg %p7387_p12 }
0x3135   : > { %p7395_p3 = pnand %p7394_p2, %p7388_p13 }
0x3136   : > { %6400 = vmatmul.mubr.msk.bf16.vlgmr.msra.gmra.mxu1 %vm9311_vm3, %v5424_v47  ;;  %6402 = vmatmul.mubr.msk.bf16.vlgmr.msra.gmra.mxu0 %vm9312_vm6, %v5424_v47 }
0x3137   : > { %7398 = shalt.err (!%p7395_p3)
}
0x3138   : > { %s7399_s6 = scalar_lea.hbm %s8886_s3, 64  ;;  %s7403_s14 = scalar_lea.hbm %s9305_s18, 128 }
0x3139   : > { %p7400_p4 = scmp.ne.s32.totalorder %s8886_s3, %s7399_s6  ;;  %p7404_p9 = scmp.lt.s32.totalorder %s8886_s3, %s9305_s18 }
0x313a   : > { %p7405_p10 = scmp.lt.s32.totalorder %s7403_s14, %s7399_s6 }
0x313b   : > { %p7401_p7 = pnand %p7400_p4, %p7909_p5 }
0x313c   : > { %p7406_p11 = por %p7405_p10, %p7404_p9 }
0x313d   : > { %p7402_p8 = pneg %p7401_p7 }
0x313f   : > { %p7407_p12 = pnand %p7406_p11, %p7402_p8 }
0x3141   : > { %7410 = shalt.err (!%p7407_p12)
}
0x3142   : > { %s9314_s21 = scalar_lea.sflag [#allocation5], %s8879_s1  ;;  %s9315_s19 = scalar_lea.vmem [#allocation7], %s7997_s16 }
0x3143   : > { %6912 = dma.vmem_to_hbm [thread:$0]  (%p7909_p5), %s5639_s8, 64, %s8886_s3, %s9314_s21  }
0x3144   : > { %s5664_s20 = sshll.u32 %s9315_s19, 4  ;;  %s8912_s11 = sshll.u32 %s7890_s0, 8  ;;  %s5665_s20 = int_to_ptr.vmem [resolvable:$true] %s5664_s20 }
0x3145   : > { %s9134_s18 = scalar_lea.sflag [#allocation8], %s8879_s1  ;;  %s7411_s14 = scalar_lea.vmem %s5665_s20, 64 }
0x3146   : > { %p7412_p13 = scmp.ne.s32.totalorder %s5665_s20, %s7411_s14  ;;  %s7687_s6 = smov [#allocation7]  }
0x3147   : > { %s7415_s24 = sshll.u32 %s7687_s6, 4  ;;  %s7416_s24 = int_to_ptr.vmem [resolvable:$false] %s7415_s24 }
0x3148   : > { %p7413_p0 = pnand %p7412_p13, %p7909_p5  ;;  %s7417_s26 = scalar_lea.vmem %s7416_s24, 128 }
0x3149   : > { %p7418_p2 = scmp.lt.s32.totalorder %s5665_s20, %s7416_s24  ;;  %p7419_p3 = scmp.lt.s32.totalorder %s7417_s26, %s7411_s14 }
0x314a   : > { %p7414_p1 = pneg %p7413_p0 }
0x314b   : > { %p7420_p4 = por %p7419_p3, %p7418_p2 }
0x314d   : > { %p7421_p7 = pnand %p7420_p4, %p7414_p1 }
0x314f   : > { %7424 = shalt.err (!%p7421_p7)
}
0x3150   : > { %s7425_s3 = scalar_lea.hbm %s8892_s12, 64  ;;  %s7429_s8 = scalar_lea.hbm %s9306_s22, 128 }
0x3151   : > { %p7426_p8 = scmp.ne.s32.totalorder %s8892_s12, %s7425_s3  ;;  %p7430_p11 = scmp.lt.s32.totalorder %s8892_s12, %s9306_s22 }
0x3152   : > { %p7431_p12 = scmp.lt.s32.totalorder %s7429_s8, %s7425_s3 }
0x3153   : > { %p7427_p9 = pnand %p7426_p8, %p7909_p5 }
0x3154   : > { %p7432_p13 = por %p7431_p12, %p7430_p11 }
0x3155   : > { %p7428_p10 = pneg %p7427_p9 }
0x3157   : > { %p7433_p0 = pnand %p7432_p13, %p7428_p10 }
0x3159   : > { %7436 = shalt.err (!%p7433_p0)
}
0x315a   : > { %6914 = dma.vmem_to_hbm [thread:$0]  (%p7909_p5), %s5665_s20, 64, %s8892_s12, %s9134_s18  }
0x315b   : > { %s5690_s24 = scalar_lea.hbm %s9165_s25, %s8912_s11  ;;  %s5692_s26 = sshll.u32 %s8807_s2, 4  ;;  %s5693_s26 = int_to_ptr.vmem [resolvable:$true] %s5692_s26 }
0x315c   : > { %s5602_s21 = scalar_lea.sflag [#allocation11], %s8879_s1  ;;  %s7437_s19 = scalar_lea.vmem %s5693_s26, 256 }
0x315d   : > { %p7438_p1 = scmp.ne.s32.totalorder %s5693_s26, %s7437_s19  ;;  %s7688_s14 = smov [#allocation10]  }
0x315e   : > { %s7441_s6 = sshll.u32 %s7688_s14, 4  ;;  %s7442_s6 = int_to_ptr.vmem [resolvable:$false] %s7441_s6 }
0x315f   : > { %p7439_p2 = pnand %p7438_p1, %p7909_p5  ;;  %s7443_s3 = scalar_lea.vmem %s7442_s6, 512 }
0x3160   : > { %p7444_p4 = scmp.lt.s32.totalorder %s5693_s26, %s7442_s6  ;;  %p7445_p7 = scmp.lt.s32.totalorder %s7443_s3, %s7437_s19 }
0x3161   : > { %p7440_p3 = pneg %p7439_p2 }
0x3162   : > { %p7446_p8 = por %p7445_p7, %p7444_p4 }
0x3164   : > { %p7447_p9 = pnand %p7446_p8, %p7440_p3 }
0x3166   : > { %7450 = shalt.err (!%p7447_p9)
}
0x3167   : > { %s7451_s8 = scalar_lea.hbm %s5690_s24, 256  ;;  %s7455_s12 = scalar_lea.hbm %s9165_s25, 512 }
0x3168   : > { %p7452_p10 = scmp.ne.s32.totalorder %s5690_s24, %s7451_s8  ;;  %p7456_p13 = scmp.lt.s32.totalorder %s5690_s24, %s9165_s25 }
0x3169   : > { %p7457_p0 = scmp.lt.s32.totalorder %s7455_s12, %s7451_s8 }
0x316a   : > { %p7453_p11 = pnand %p7452_p10, %p7909_p5 }
0x316b   : > { %p7458_p1 = por %p7457_p0, %p7456_p13 }
0x316c   : > { %p7454_p12 = pneg %p7453_p11 }
0x316e   : > { %p7459_p2 = pnand %p7458_p1, %p7454_p12 }
0x3170   : > { %7462 = shalt.err (!%p7459_p2)
}
0x3171   : > { %s9316_s2 = sld [smem:[#allocation43_spill]]  ;;  %s9318_s14 = scalar_lea.vmem [#allocation2], %s7997_s16 }
0x3172   : > { %s9317_s20 = sld [smem:[#allocation45_spill]]  ;;  %s5625_s6 = sshll.u32 %s9318_s14, 4  ;;  %s5626_s6 = int_to_ptr.vmem [resolvable:$true] %s5625_s6 }
0x3173   : > { %6916 = dma.vmem_to_hbm [thread:$0]  (%p7909_p5), %s5693_s26, 256, %s5690_s24, %s5602_s21  }
0x3174   : > { %s5577_s8 = scalar_lea.sflag [#allocation3], %s7994_s23  ;;  %s7463_s12 = scalar_lea.vmem %s5626_s6, 64 }
0x3175   : > { %p7464_p3 = scmp.ne.s32.totalorder %s5626_s6, %s7463_s12  ;;  %s7689_s18 = smov [#allocation2]  }
0x3176   : > { %s7467_s22 = sshll.u32 %s7689_s18, 4  ;;  %s7468_s22 = int_to_ptr.vmem [resolvable:$false] %s7467_s22 }
0x3177   : > { %s8945_s19 = scalar_lea.hbm %s9316_s2, %s8882_s5  ;;  %p7465_p4 = pnand %p7464_p3, %p7909_p5 }
0x3178   : > { %s8951_s3 = scalar_lea.hbm %s9317_s20, %s8882_s5  ;;  %s7469_s25 = scalar_lea.vmem %s7468_s22, 128 }
0x3179   : > { %p7466_p7 = pneg %p7465_p4  ;;  %p7470_p8 = scmp.lt.s32.totalorder %s5626_s6, %s7468_s22 }
0x317a   : > { %p7471_p9 = scmp.lt.s32.totalorder %s7469_s25, %s7463_s12 }
0x317c   : > { %p7472_p10 = por %p7471_p9, %p7470_p8 }
0x317e   : > { %p7473_p11 = pnand %p7472_p10, %p7466_p7 }
0x3180   : > { %7476 = shalt.err (!%p7473_p11)
}
0x3181   : > { %s7477_s5 = scalar_lea.hbm %s8945_s19, 64  ;;  %s7481_s24 = scalar_lea.hbm %s9316_s2, 128 }
0x3182   : > { %p7478_p12 = scmp.ne.s32.totalorder %s8945_s19, %s7477_s5  ;;  %p7482_p1 = scmp.lt.s32.totalorder %s8945_s19, %s9316_s2 }
0x3183   : > { %p7483_p2 = scmp.lt.s32.totalorder %s7481_s24, %s7477_s5 }
0x3184   : > { %p7479_p13 = pnand %p7478_p12, %p7909_p5 }
0x3185   : > { %p7484_p3 = por %p7483_p2, %p7482_p1 }
0x3186   : > { %p7480_p0 = pneg %p7479_p13 }
0x3188   : > { %p7485_p4 = pnand %p7484_p3, %p7480_p0 }
0x318a   : > { %7488 = shalt.err (!%p7485_p4)
}
0x318b   : > { %6911 = dma.vmem_to_hbm [thread:$0]  (%p7909_p5), %s5626_s6, 64, %s8945_s19, %s5577_s8  }
0x318c   : > { %s9319_s25 = scalar_lea.vmem [#allocation6], %s7997_s16  ;;  %s6430_s22 = sshll.u32 %s7890_s0, 7 }
0x318d   : > { %s5651_s18 = sshll.u32 %s9319_s25, 4  ;;  %s8970_s26 = scalar_lea.hbm %s7852_s9, %s6430_s22  ;;  %s5652_s18 = int_to_ptr.vmem [resolvable:$true] %s5651_s18 }
0x318e   : > { %s7489_s14 = scalar_lea.vmem %s5652_s18, 64  ;;  %s7690_s12 = smov [#allocation6]  }
0x318f   : > { %p7490_p7 = scmp.ne.s32.totalorder %s5652_s18, %s7489_s14  ;;  %s7493_s5 = sshll.u32 %s7690_s12, 4  ;;  %s7494_s5 = int_to_ptr.vmem [resolvable:$false] %s7493_s5 }
0x3190   : > { %s7495_s24 = scalar_lea.vmem %s7494_s5, 128  ;;  %p7496_p10 = scmp.lt.s32.totalorder %s5652_s18, %s7494_s5 }
0x3191   : > { %p7491_p8 = pnand %p7490_p7, %p7909_p5  ;;  %p7497_p11 = scmp.lt.s32.totalorder %s7495_s24, %s7489_s14 }
0x3193   : > { %p7492_p9 = pneg %p7491_p8  ;;  %p7498_p12 = por %p7497_p11, %p7496_p10 }
0x3195   : > { %p7499_p13 = pnand %p7498_p12, %p7492_p9 }
0x3197   : > { %7502 = shalt.err (!%p7499_p13)
}
0x3198   : > { %s7503_s0 = scalar_lea.hbm %s8951_s3, 64  ;;  %s7507_s16 = scalar_lea.hbm %s9317_s20, 128 }
0x3199   : > { %p7504_p0 = scmp.ne.s32.totalorder %s8951_s3, %s7503_s0  ;;  %p7508_p3 = scmp.lt.s32.totalorder %s8951_s3, %s9317_s20 }
0x319a   : > { %p7509_p4 = scmp.lt.s32.totalorder %s7507_s16, %s7503_s0 }
0x319b   : > { %p7505_p1 = pnand %p7504_p0, %p7909_p5 }
0x319c   : > { %p7510_p7 = por %p7509_p4, %p7508_p3 }
0x319d   : > { %p7506_p2 = pneg %p7505_p1 }
0x319f   : > { %p7511_p8 = pnand %p7510_p7, %p7506_p2 }
0x31a1   : > { %7514 = shalt.err (!%p7511_p8)
}
0x31a2   : > { %s9320_s19 = scalar_lea.sflag [#allocation5], %s8879_s1  ;;  %s5678_s6 = sshll.u32 %s8533_s10, 4  ;;  %s5679_s6 = int_to_ptr.vmem [resolvable:$true] %s5678_s6 }
0x31a3   : > { %6913 = dma.vmem_to_hbm [thread:$0]  (%p7909_p5), %s5652_s18, 64, %s8951_s3, %s9320_s19  }
0x31a4   : > { %s7515_s8 = scalar_lea.vmem %s5679_s6, 128  ;;  %s7691_s25 = smov [#allocation9]  }
0x31a5   : > { %p7516_p9 = scmp.ne.s32.totalorder %s5679_s6, %s7515_s8  ;;  %s7519_s22 = sshll.u32 %s7691_s25, 4  ;;  %s7520_s22 = int_to_ptr.vmem [resolvable:$false] %s7519_s22 }
0x31a6   : > { %s7521_s14 = scalar_lea.vmem %s7520_s22, 256  ;;  %p7522_p12 = scmp.lt.s32.totalorder %s5679_s6, %s7520_s22 }
0x31a7   : > { %p7517_p10 = pnand %p7516_p9, %p7909_p5  ;;  %p7523_p13 = scmp.lt.s32.totalorder %s7521_s14, %s7515_s8 }
0x31a9   : > { %p7518_p11 = pneg %p7517_p10  ;;  %p7524_p0 = por %p7523_p13, %p7522_p12 }
0x31ab   : > { %p7525_p1 = pnand %p7524_p0, %p7518_p11 }
0x31ad   : > { %7528 = shalt.err (!%p7525_p1)
}
0x31ae   : > { %s7529_s10 = scalar_lea.hbm %s8970_s26, 128  ;;  %s7533_s3 = scalar_lea.hbm %s7852_s9, 256 }
0x31af   : > { %p7530_p2 = scmp.ne.s32.totalorder %s8970_s26, %s7529_s10  ;;  %p7534_p7 = scmp.lt.s32.totalorder %s8970_s26, %s7852_s9 }
0x31b0   : > { %p7535_p8 = scmp.lt.s32.totalorder %s7533_s3, %s7529_s10 }
0x31b1   : > { %p7531_p3 = pnand %p7530_p2, %p7909_p5 }
0x31b2   : > { %p7536_p9 = por %p7535_p8, %p7534_p7 }
0x31b3   : > { %p7532_p4 = pneg %p7531_p3 }
0x31b5   : > { %p7537_p10 = pnand %p7536_p9, %p7532_p4 }
0x31b7   : > { %7540 = shalt.err (!%p7537_p10)
}
0x31b8   : > { %s9321_s18 = scalar_lea.sflag [#allocation8], %s8879_s1  ;;  %v5433_v49 = vpop.permute.xlu0 %5432  ;;  %s1127_s12 = scalar_lea.vmem [#allocation12], %s8787_s4 }
0x31b9   : > { %6915 = dma.vmem_to_hbm [thread:$0]  (%p7909_p5), %s5679_s6, 128, %s8970_s26, %s9321_s18  }
0x31ba   : > { %s5706_s5 = sshll.u32 %s1127_s12, 4  ;;  %s9004_s26 = scalar_lea.hbm %s7862_s17, %s8912_s11  ;;  %s9006_s5 = int_to_ptr.vmem [resolvable:$true] %s5706_s5 }
0x31bb   : > { %s7541_s24 = scalar_lea.vmem %s9006_s5, 256  ;;  %s7692_s0 = smov [#allocation12]  }
0x31bc   : > { %p7542_p11 = scmp.ne.s32.totalorder %s9006_s5, %s7541_s24  ;;  %s7545_s16 = sshll.u32 %s7692_s0, 4  ;;  %s7546_s16 = int_to_ptr.vmem [resolvable:$false] %s7545_s16 }
0x31bd   : > { %s7547_s19 = scalar_lea.vmem %s7546_s16, 512  ;;  %p7548_p0 = scmp.lt.s32.totalorder %s9006_s5, %s7546_s16 }
0x31be   : > { %p7543_p12 = pnand %p7542_p11, %p7909_p5  ;;  %p7549_p1 = scmp.lt.s32.totalorder %s7547_s19, %s7541_s24 }
0x31c0   : > { %p7544_p13 = pneg %p7543_p12  ;;  %p7550_p2 = por %p7549_p1, %p7548_p0 }
0x31c2   : > { %p7551_p3 = pnand %p7550_p2, %p7544_p13 }
0x31f6   : > { %v5484_v52 = vpop.f32.mrf.mxu1  ;;  %v5525_v53 = vpop.f32.mrf.mxu0 }
0x31f7   : > { %v5485_v54 = vadd.f32 %v5484_v52, %v5433_v49  ;;  %v5526_v55 = vadd.f32 %v5525_v53, %v5433_v49 }
0x31f8   : > { %v5486_v7 = vpop.f32.mrf.mxu1  ;;  %v5527_v57 = vpop.f32.mrf.mxu0 }
0x31f9   : > { %v6403_v58 = vmul.f32 -1.442695, %v5485_v54  ;;  %v6405_v59 = vmul.f32 -1.442695, %v5526_v55  ;;  %v5487_v60 = vadd.f32 %v5486_v7, %v5433_v49  ;;  %v5528_v61 = vadd.f32 %v5527_v57, %v5433_v49 }
0x31fa   : > { %v5488_v62 = vpop.f32.mrf.mxu1  ;;  %v5529_v63 = vpop.f32.mrf.mxu0 }
0x31fb   : > { %7369 = vpow2.f32 %v6403_v58  ;;  %v5536_v0 = vcombine.low %v5485_v54, %v5487_v60  ;;  %v6404_v4 = vmul.f32 -1.442695, %v5487_v60  ;;  %v5537_v5 = vcombine.low %v5526_v55, %v5528_v61 }
0x31fc   : > { %7371 = vpow2.f32 %v6405_v59  ;;  %v6406_v6 = vmul.f32 -1.442695, %v5528_v61  ;;  %v5489_v9 = vpop.f32.mrf.mxu1  ;;  %v5530_v12 = vpop.f32.mrf.mxu0 }
0x31fd   : > { %5540 = vst [vmem:[%s1127_s12] sm:$0xff] %v5536_v0  ;;  %7373 = vpow2.f32 %v6404_v4  ;;  %5541 = vst [vmem:[%s1127_s12 + $0x8] sm:$0xff] %v5537_v5 }
0x31fe   : > { %7375 = vpow2.f32 %v6406_v6 }
0x31ff   : > { %7554 = shalt.err (!%p7551_p3)
}
0x3200   : > { %s7555_s6 = scalar_lea.hbm %s9004_s26, 256  ;;  %s7559_s8 = scalar_lea.hbm %s7862_s17, 512 }
0x3201   : > { %p7556_p4 = scmp.ne.s32.totalorder %s9004_s26, %s7555_s6  ;;  %p7560_p9 = scmp.lt.s32.totalorder %s9004_s26, %s7862_s17 }
0x3202   : > { %p7561_p10 = scmp.lt.s32.totalorder %s7559_s8, %s7555_s6 }
0x3203   : > { %p7557_p7 = pnand %p7556_p4, %p7909_p5 }
0x3204   : > { %p7562_p11 = por %p7561_p10, %p7560_p9 }
0x3205   : > { %p7558_p8 = pneg %p7557_p7 }
0x3207   : > { %p7563_p12 = pnand %p7562_p11, %p7558_p8 }
0x3209   : > { %7566 = shalt.err (!%p7563_p12)
}
0x320a   : > { %6917 = dma.vmem_to_hbm [thread:$0]  (%p7909_p5), %s9006_s5, 256, %s9004_s26, %s5602_s21   ;;  %v7370_v14 = vpop.eup %7369 }
0x320b   : > { %v7372_v37 = vpop.eup %7371  ;;  %v5554_v16 = vadd.f32 1.0, %v7370_v14  ;;  %s1134_s1 = scalar_lea.vmem [#allocation13], %s8787_s4  ;;  %s9029_s25 = scalar_lea.hbm %s7867_s13, %s8912_s11 }
0x320c   : > { %v7374_v19 = vpop.eup %7373  ;;  %v5556_v20 = vadd.f32 1.0, %v7372_v37  ;;  %s5720_s21 = sshll.u32 %s1134_s1, 4  ;;  %s5612_s22 = scalar_lea.sflag [#allocation14], %s7994_s23  ;;  %s5721_s21 = int_to_ptr.vmem [resolvable:$true] %s5720_s21 }
0x320d   : > { %v7376_v22 = vpop.eup %7375  ;;  %7377 = vrcp.f32 %v5554_v16  ;;  %v5555_v23 = vadd.f32 1.0, %v7374_v19  ;;  %s7567_s14 = scalar_lea.vmem %s5721_s21, 256  ;;  %s7693_s10 = smov [#allocation13]  }
0x320e   : > { %7379 = vrcp.f32 %v5556_v20  ;;  %v5557_v24 = vadd.f32 1.0, %v7376_v22  ;;  %p7568_p13 = scmp.ne.s32.totalorder %s5721_s21, %s7567_s14  ;;  %s7571_s3 = sshll.u32 %s7693_s10, 4  ;;  %s7572_s3 = int_to_ptr.vmem [resolvable:$false] %s7571_s3 }
0x320f   : > { %7381 = vrcp.f32 %v5555_v23  ;;  %s7573_s4 = scalar_lea.vmem %s7572_s3, 512  ;;  %p7574_p2 = scmp.lt.s32.totalorder %s5721_s21, %s7572_s3 }
0x3210   : > { %7383 = vrcp.f32 %v5557_v24  ;;  %p7569_p0 = pnand %p7568_p13, %p7909_p5  ;;  %p7575_p3 = scmp.lt.s32.totalorder %s7573_s4, %s7567_s14 }
0x3212   : > { %p7570_p1 = pneg %p7569_p0  ;;  %p7576_p4 = por %p7575_p3, %p7574_p2 }
0x3214   : > { %p7577_p7 = pnand %p7576_p4, %p7570_p1 }
0x321a   : > { %v7378_v25 = vpop.eup %7377 }
0x321b   : > { %v7380_v27 = vpop.eup %7379 }
0x321c   : > { %v7382_v28 = vpop.eup %7381 }
0x321d   : > { %v7384_v3 = vpop.eup %7383  ;;  %v5570_v31 = vcombine.low %v7378_v25, %v7382_v28 }
0x321e   : > { %v5571_v32 = vcombine.low %v7380_v27, %v7384_v3 }
0x321f   : > { %5574 = vst [vmem:[%s1134_s1] sm:$0xff] %v5570_v31 }
0x3220   : > { %5575 = vst [vmem:[%s1134_s1 + $0x8] sm:$0xff] %v5571_v32 }
0x3221   : > { %7580 = shalt.err (!%p7577_p7)
}
0x3222   : > { %s7581_s23 = scalar_lea.hbm %s9029_s25, 256  ;;  %s7585_s11 = scalar_lea.hbm %s7867_s13, 512 }
0x3223   : > { %p7582_p8 = scmp.ne.s32.totalorder %s9029_s25, %s7581_s23  ;;  %p7586_p11 = scmp.lt.s32.totalorder %s9029_s25, %s7867_s13 }
0x3224   : > { %p7587_p12 = scmp.lt.s32.totalorder %s7585_s11, %s7581_s23 }
0x3225   : > { %p7583_p9 = pnand %p7582_p8, %p7909_p5 }
0x3226   : > { %p7588_p13 = por %p7587_p12, %p7586_p11 }
0x3227   : > { %p7584_p10 = pneg %p7583_p9 }
0x3229   : > { %p7589_p0 = pnand %p7588_p13, %p7584_p10 }
0x322b   : > { %7592 = shalt.err (!%p7589_p0)
}
0x322c   : > { %6918 = dma.vmem_to_hbm [thread:$0]  (%p7909_p5), %s5721_s21, 256, %s9029_s25, %s5612_s22  }
0x322d PF: > { %p6952_p1 = scmp.ge.s32.totalorder %s7643_s15, 2  ;;  %s5732_s12 = sand.u32 1, %s7631_s7  }
0x322e   : > { %s5733_s26 = scalar_lea.sflag [#allocation3], %s5732_s12 }
0x322f   : > { %p6928_p2 = pnand %p6952_p1, %p7913_p6 }
0x3231   : > { %p9048_p3 = pneg %p6928_p2 }
0x3233   : > { %7610 = dma.done.wait (%p9048_p3), %s5733_s26, 64  }
0x3234   : > { %7612 = vsyncadd (%p9048_p3), %s5733_s26, 4294967232  ;;  %s9324_s28 = sadd.s32 4294967294, %s7643_s15  }
0x3235   : > { %s5741_s24 = sand.u32 1, %s9324_s28  }
0x3236   : > { %s5742_s0 = scalar_lea.sflag [#allocation5], %s5741_s24 }
0x3237   : > { %7614 = dma.done.wait (%p9048_p3), %s5742_s0, 128  }
0x3238   : > { %7616 = vsyncadd (%p9048_p3), %s5742_s0, 4294967168  ;;  %s5760_s7 = scalar_lea.sflag [#allocation8], %s5741_s24 }
0x3239   : > { %7618 = dma.done.wait (%p9048_p3), %s5760_s7, 192  }
0x323a   : > { %7620 = vsyncadd (%p9048_p3), %s5760_s7, 4294967104  ;;  %s5778_s16 = scalar_lea.sflag [#allocation11], %s5741_s24 }
0x323b   : > { %7622 = dma.done.wait (%p9048_p3), %s5778_s16, 512  }
0x323c   : > { %7624 = vsyncadd (%p9048_p3), %s5778_s16, 4294966784  ;;  %s5796_s15 = scalar_lea.sflag [#allocation14], %s5732_s12 }
0x323d   : > { %7626 = dma.done.wait (%p9048_p3), %s5796_s15, 256  }
0x323e   : > { %7628 = vsyncadd (%p9048_p3), %s5796_s15, 4294967040  ;;  %s9325_s15 = sld [smem:[#allocation50_spill]] }
0x323f   : > { %s9326_s7 = sld [smem:[#allocation48_spill]] }
0x3240   : > { %s9327_s10 = sld [smem:[#allocation49_spill]] }
0x3241   : > { %s9328_s11 = sld [smem:[#allocation51_spill]] }
0x3244   : > { %p90_p5 = scmp.ge.s32.totalorder %s9325_s15, 4  }
0x3246   :  { %92 = sbr.rel (!%p90_p5) target bundleno = 78 (0x4e), region = 382 }
0x324b   :  { %5801 = vsyncpa [#allocation3], 1 }
0x324c   :  { %5803 = vsyncpa [#allocation3 + $0x1], 1 }
0x324d   :  { %5804 = vsyncpa [#allocation5], 1 }
0x324e   :  { %5806 = vsyncpa [#allocation5 + $0x1], 1 }
0x324f   :  { %5807 = vsyncpa [#allocation8], 1 }
0x3250   :  { %5809 = vsyncpa [#allocation8 + $0x1], 1 }
0x3251   :  { %5810 = vsyncpa [#allocation11], 1 }
0x3252   :  { %5812 = vsyncpa [#allocation11 + $0x1], 1 }
0x3253   :  { %5813 = vsyncpa [#allocation14], 1 }
0x3254   :  { %5815 = vsyncpa [#allocation14 + $0x1], 1 }

</bundles_post_ra>
